<compile_context>
chip_gen: v7x
topology: tpu7x:2x2x1
jax: 0.10.0
libtpu: 0.0.40
codegen_flags: <defaults>
</compile_context>

<pallas_src>
import jax
import jax.numpy as jnp
from jax.experimental import pallas as pl
from jax.experimental.pallas import tpu as pltpu


TM = 512  # row tile for the M (pooled-pixel / batch) dimension


def _round_up(x, m):
    return (x + m - 1) // m * m


# ----------------------------------------------------------------------------
# Pallas kernels
# ----------------------------------------------------------------------------
def _conv_relu_pool_kernel(p_ref, w_ref, b_ref, o_ref):
    """Fused conv (matmul over im2col patches) + bias + ReLU + 2x2 maxpool.

    p_ref: [4, tm, K] bf16 -- 4 pool-window positions per pooled output pixel
    w_ref: [K, N]     bf16 -- resident across the grid
    b_ref: [1, N]     f32  -- resident across the grid
    o_ref: [tm, N]    bf16 -- pooled output rows (b, h2, w2) x channels
    """
    w = w_ref[...]
    b = b_ref[...]
    acc = None
    for j in range(4):  # static unroll over the 2x2 pool window
        y = jnp.dot(p_ref[j], w, preferred_element_type=jnp.float32)
        y = jnp.maximum(y + b, 0.0)  # bias + ReLU in f32 (v5e-safe epilogue)
        acc = y if acc is None else jnp.maximum(acc, y)
    o_ref[...] = acc.astype(o_ref.dtype)


def _fc_fused_kernel(x_ref, w1_ref, b1_ref, w2_ref, b2_ref, o_ref):
    """out = relu(x @ w1 + b1) @ w2 + b2 (fc1 bf16->f32, fc2 in f32)."""
    h = jnp.dot(x_ref[...], w1_ref[...], preferred_element_type=jnp.float32)
    h = jnp.maximum(h + b1_ref[...], 0.0)
    out = jnp.dot(h, w2_ref[...], preferred_element_type=jnp.float32) + b2_ref[...]
    o_ref[...] = out.astype(o_ref.dtype)


# ----------------------------------------------------------------------------
# Pallas wrappers (M-tiled, parallel grid, resident weights)
# ----------------------------------------------------------------------------
def conv_relu_pool(patches4, w, b):
    """patches4: [4, M, K] bf16; w: [K, N] bf16; b: [N] f32 -> [M, N] bf16."""
    _, M, K = patches4.shape
    N = w.shape[1]
    b2 = b.reshape(1, N).astype(jnp.float32)
    if M <= TM:
        tm, Mp = M, M
    else:
        tm = TM
        Mp = _round_up(M, tm)
        if Mp != M:
            patches4 = jnp.pad(patches4, ((0, 0), (0, Mp - M), (0, 0)))
    grid_m = Mp // tm
    out = pl.pallas_call(
        _conv_relu_pool_kernel,
        out_shape=jax.ShapeDtypeStruct((Mp, N), jnp.bfloat16),
        grid=(grid_m,),
        in_specs=[
            pl.BlockSpec((4, tm, K), lambda i: (0, i, 0)),
            pl.BlockSpec((K, N), lambda i: (0, 0)),   # weights stay resident
            pl.BlockSpec((1, N), lambda i: (0, 0)),   # bias stays resident
        ],
        out_specs=pl.BlockSpec((tm, N), lambda i: (i, 0)),
        compiler_params=pltpu.CompilerParams(
            dimension_semantics=("parallel",)),
    )(patches4, w, b2)
    return out[:M]


def fc_fused(x, w1, b1, w2, b2):
    """x:[M,K] bf16, w1:[K,H] bf16, w2:[H,N] f32 -> [M,N] f32 (relu between)."""
    M, K = x.shape
    H = w1.shape[1]
    N = w2.shape[1]
    b1r = b1.reshape(1, H).astype(jnp.float32)
    b2r = b2.reshape(1, N).astype(jnp.float32)
    if M <= TM:
        tm, Mp = M, M
    else:
        tm = TM
        Mp = _round_up(M, tm)
        if Mp != M:
            x = jnp.pad(x, ((0, Mp - M), (0, 0)))
    grid_m = Mp // tm
    out = pl.pallas_call(
        _fc_fused_kernel,
        out_shape=jax.ShapeDtypeStruct((Mp, N), jnp.float32),
        grid=(grid_m,),
        in_specs=[
            pl.BlockSpec((tm, K), lambda i: (i, 0)),
            pl.BlockSpec((K, H), lambda i: (0, 0)),
            pl.BlockSpec((1, H), lambda i: (0, 0)),
            pl.BlockSpec((H, N), lambda i: (0, 0)),
            pl.BlockSpec((1, N), lambda i: (0, 0)),
        ],
        out_specs=pl.BlockSpec((tm, N), lambda i: (i, 0)),
        compiler_params=pltpu.CompilerParams(
            dimension_semantics=("parallel",)),
    )(x, w1, b1r, w2, b2r)
    return out[:M]


# ----------------------------------------------------------------------------
# Glue: pool-ordered im2col + one-time parameter repacking (plain JAX)
# ----------------------------------------------------------------------------
def im2col_pool_order(x_nhwc):
    """[B, H, W, C] -> [4, B*(H//2)*(W//2), 9*C] bf16.

    Row m corresponds to pooled output pixel (b, h2, w2); the leading size-4
    axis enumerates the 2x2 pool-window positions (hi, wi), which lets the
    conv kernel fuse ReLU + maxpool in VMEM. Tap order along K is (kh, kw, cin).
    """
    B, H, W, C = x_nhwc.shape
    H2, W2 = H // 2, W // 2
    xp = jnp.pad(x_nhwc, ((0, 0), (1, 1), (1, 1), (0, 0)))
    taps = [xp[:, kh:kh + H, kw:kw + W, :] for kh in range(3) for kw in range(3)]
    p = jnp.stack(taps, axis=3).reshape(B, H, W, 9 * C)
    p = p.reshape(B, H2, 2, W2, 2, 9 * C)
    p = jnp.transpose(p, (2, 4, 0, 1, 3, 5))          # [2, 2, B, H2, W2, 9C]
    return p.reshape(4, B * H2 * W2, 9 * C).astype(jnp.bfloat16)


def prepare_params(params):
    """One-time repack: conv weights -> [9*Cin, Cout] bf16, fc1 columns permuted
    so activations can be flattened in (free) NHWC order, fc2 pre-transposed."""
    def conv_w(w):  # [Cout, Cin, 3, 3] -> [9*Cin, Cout], tap order (kh, kw, cin)
        cout, cin, kh, kw = w.shape
        return (jnp.transpose(w, (2, 3, 1, 0))
                .reshape(kh * kw * cin, cout).astype(jnp.bfloat16))

    w1 = params["fc1_w"].reshape(128, 64, 7, 7)       # [out, c, h, w]
    fc1_wm = (jnp.transpose(w1, (2, 3, 1, 0))         # [h, w, c, out]
              .reshape(64 * 7 * 7, 128).astype(jnp.bfloat16))
    return {
        "w1m": conv_w(params["w1"]), "b1": params["b1"].astype(jnp.float32),
        "w2m": conv_w(params["w2"]), "b2": params["b2"].astype(jnp.float32),
        "fc1_wm": fc1_wm, "fc1_b": params["fc1_b"].astype(jnp.float32),
        "fc2_wm": jnp.transpose(params["fc2_w"]).astype(jnp.float32),
        "fc2_b": params["fc2_b"].astype(jnp.float32),
    }


# ----------------------------------------------------------------------------
# Forward pass (mirrors PyTorch CNN.forward)
# ----------------------------------------------------------------------------
def cnn_forward(x_nchw, pp):
    B = x_nchw.shape[0]
    x = jnp.transpose(x_nchw, (0, 2, 3, 1))                 # NCHW -> NHWC

    # conv1 (1->32, 3x3, pad 1) + ReLU + 2x2 pool, fused
    p = im2col_pool_order(x)                                # [4, B*14*14, 9]
    y = conv_relu_pool(p, pp["w1m"], pp["b1"])              # [B*196, 32] bf16
    y = y.reshape(B, 14, 14, 32)

    # conv2 (32->64, 3x3, pad 1) + ReLU + 2x2 pool, fused
    p = im2col_pool_order(y)                                # [4, B*7*7, 288]
    y = conv_relu_pool(p, pp["w2m"], pp["b2"])              # [B*49, 64] bf16

    # NHWC flatten is free; the NCHW view(-1, 64*7*7) is folded into fc1_wm
    flat = y.reshape(B, 7 * 7 * 64)

    # fc1 + ReLU + fc2, fused
    return fc_fused(flat, pp["fc1_wm"], pp["fc1_b"],
                    pp["fc2_wm"], pp["fc2_b"])              # [B, 6] f32


# ----------------------------------------------------------------------------
# Pure-JAX f32 reference (sanity check)
# ----------------------------------------------------------------------------
def cnn_reference(x_nchw, params):
    x = jnp.transpose(x_nchw, (0, 2, 3, 1))

    def conv(x, w, b):
        w_hwio = jnp.transpose(w, (2, 3, 1, 0))
        y = jax.lax.conv_general_dilated(
            x, w_hwio, (1, 1), "SAME",
            dimension_numbers=("NHWC", "HWIO", "NHWC"))
        return jax.nn.relu(y + b.reshape(1, 1, 1, -1))

    def pool(x):
        return jax.lax.reduce_window(
            x, -jnp.inf, jax.lax.max, (1, 2, 2, 1), (1, 2, 2, 1), "VALID")

    y = pool(conv(x, params["w1"], params["b1"]))
    y = pool(conv(y, params["w2"], params["b2"]))
    flat = jnp.transpose(y, (0, 3, 1, 2)).reshape(x.shape[0], 64 * 7 * 7)
    h = jax.nn.relu(flat @ params["fc1_w"].T + params["fc1_b"])
    return h @ params["fc2_w"].T + params["fc2_b"]


# ----------------------------------------------------------------------------
# Main
# ----------------------------------------------------------------------------
if __name__ == "__main__":
    key = jax.random.PRNGKey(0)
    ks = jax.random.split(key, 9)

    # deterministic synthetic parameters (shapes from CNN.__init__)
    params = {
        "w1": jax.random.normal(ks[0], (32, 1, 3, 3), jnp.float32) * 0.1,
        "b1": jax.random.normal(ks[1], (32,), jnp.float32) * 0.1,
        "w2": jax.random.normal(ks[2], (64, 32, 3, 3), jnp.float32) * 0.05,
        "b2": jax.random.normal(ks[3], (64,), jnp.float32) * 0.05,
        "fc1_w": jax.random.normal(ks[4], (128, 64 * 7 * 7), jnp.float32) * 0.02,
        "fc1_b": jax.random.normal(ks[5], (128,), jnp.float32) * 0.02,
        "fc2_w": jax.random.normal(ks[6], (6, 128), jnp.float32) * 0.05,
        "fc2_b": jax.random.normal(ks[7], (6,), jnp.float32) * 0.05,
    }

    # input: batch=2, 1 channel, 28x28 (fc1 = 64*7*7 implies 28x28 spatial)
    x = jax.random.normal(ks[8], (2, 1, 28, 28), jnp.float32)

    prepped = prepare_params(params)          # one-time weight repacking
    forward = jax.jit(cnn_forward)

    out = jax.block_until_ready(forward(x, prepped))
    ref = jax.block_until_ready(cnn_reference(x, params))

    assert out.shape == (2, 6)
    # bf16 MXU operands with f32 accumulation -> loosened tolerances
    assert jnp.allclose(out, ref, rtol=2e-2, atol=2e-2), "mismatch vs reference"

    print("KERNEL_OK")
</pallas_src>

<mosaic_0001>
module attributes {stable_mosaic.version = 11 : i64} {
  func.func @_conv_relu_pool_kernel(%arg0: i32, %arg1: memref<4x392x9xbf16, #tpu.memory_space<vmem>>, %arg2: memref<9x32xbf16, #tpu.memory_space<vmem>>, %arg3: memref<1x32xf32, #tpu.memory_space<vmem>>, %arg4: memref<392x32xbf16, #tpu.memory_space<vmem>>) attributes {dimension_semantics = [#tpu.dimension_semantics<parallel>], iteration_bounds = array<i64: 1>, scalar_prefetch = 0 : i64, scratch_operands = 0 : i64, tpu.core_type = #tpu.core_type<tc>, window_params = [{transform_indices = @transform_0, window_bounds = array<i64: 4, 392, 9>}, {pipeline_mode = #tpu.pipeline_mode<synchronous>, transform_indices = @transform_1, window_bounds = array<i64: 9, 32>}, {pipeline_mode = #tpu.pipeline_mode<synchronous>, transform_indices = @transform_2, window_bounds = array<i64: 1, 32>}, {transform_indices = @transform_3, window_bounds = array<i64: 392, 32>}]} {
    %c0 = arith.constant 0 : index
    %c0_0 = arith.constant 0 : index
    %0 = vector.load %arg2[%c0, %c0_0] : memref<9x32xbf16, #tpu.memory_space<vmem>>, vector<9x32xbf16>
    %c0_1 = arith.constant 0 : index
    %c0_2 = arith.constant 0 : index
    %1 = vector.load %arg3[%c0_1, %c0_2] : memref<1x32xf32, #tpu.memory_space<vmem>>, vector<1x32xf32>
    %c0_3 = arith.constant 0 : index
    %c0_4 = arith.constant 0 : index
    %c0_5 = arith.constant 0 : index
    %2 = vector.load %arg1[%c0_3, %c0_4, %c0_5] : memref<4x392x9xbf16, #tpu.memory_space<vmem>>, vector<1x392x9xbf16>
    %3 = vector.shape_cast %2 : vector<1x392x9xbf16> to vector<392x9xbf16>
    %cst = arith.constant dense<0.000000e+00> : vector<392x32xf32>
    %4 = tpu.matmul %3, %0, %cst {dimension_numbers = #tpu.dot_dimension_numbers<[1], [0], [0], [1], [0, 0, 1, 1], [], []>} : vector<392x9xbf16>, vector<9x32xbf16>, vector<392x32xf32> -> vector<392x32xf32>
    %5 = vector.broadcast %1 : vector<1x32xf32> to vector<392x32xf32>
    %6 = arith.addf %4, %5 : vector<392x32xf32>
    %cst_6 = arith.constant 0.000000e+00 : f32
    %7 = vector.broadcast %cst_6 : f32 to vector<392x32xf32>
    %8 = arith.maximumf %6, %7 : vector<392x32xf32>
    %c1 = arith.constant 1 : index
    %c0_7 = arith.constant 0 : index
    %c0_8 = arith.constant 0 : index
    %9 = vector.load %arg1[%c1, %c0_7, %c0_8] : memref<4x392x9xbf16, #tpu.memory_space<vmem>>, vector<1x392x9xbf16>
    %10 = vector.shape_cast %9 : vector<1x392x9xbf16> to vector<392x9xbf16>
    %cst_9 = arith.constant dense<0.000000e+00> : vector<392x32xf32>
    %11 = tpu.matmul %10, %0, %cst_9 {dimension_numbers = #tpu.dot_dimension_numbers<[1], [0], [0], [1], [0, 0, 1, 1], [], []>} : vector<392x9xbf16>, vector<9x32xbf16>, vector<392x32xf32> -> vector<392x32xf32>
    %12 = vector.broadcast %1 : vector<1x32xf32> to vector<392x32xf32>
    %13 = arith.addf %11, %12 : vector<392x32xf32>
    %cst_10 = arith.constant 0.000000e+00 : f32
    %14 = vector.broadcast %cst_10 : f32 to vector<392x32xf32>
    %15 = arith.maximumf %13, %14 : vector<392x32xf32>
    %16 = arith.maximumf %8, %15 : vector<392x32xf32>
    %c2 = arith.constant 2 : index
    %c0_11 = arith.constant 0 : index
    %c0_12 = arith.constant 0 : index
    %17 = vector.load %arg1[%c2, %c0_11, %c0_12] : memref<4x392x9xbf16, #tpu.memory_space<vmem>>, vector<1x392x9xbf16>
    %18 = vector.shape_cast %17 : vector<1x392x9xbf16> to vector<392x9xbf16>
    %cst_13 = arith.constant dense<0.000000e+00> : vector<392x32xf32>
    %19 = tpu.matmul %18, %0, %cst_13 {dimension_numbers = #tpu.dot_dimension_numbers<[1], [0], [0], [1], [0, 0, 1, 1], [], []>} : vector<392x9xbf16>, vector<9x32xbf16>, vector<392x32xf32> -> vector<392x32xf32>
    %20 = vector.broadcast %1 : vector<1x32xf32> to vector<392x32xf32>
    %21 = arith.addf %19, %20 : vector<392x32xf32>
    %cst_14 = arith.constant 0.000000e+00 : f32
    %22 = vector.broadcast %cst_14 : f32 to vector<392x32xf32>
    %23 = arith.maximumf %21, %22 : vector<392x32xf32>
    %24 = arith.maximumf %16, %23 : vector<392x32xf32>
    %c3 = arith.constant 3 : index
    %c0_15 = arith.constant 0 : index
    %c0_16 = arith.constant 0 : index
    %25 = vector.load %arg1[%c3, %c0_15, %c0_16] : memref<4x392x9xbf16, #tpu.memory_space<vmem>>, vector<1x392x9xbf16>
    %26 = vector.shape_cast %25 : vector<1x392x9xbf16> to vector<392x9xbf16>
    %cst_17 = arith.constant dense<0.000000e+00> : vector<392x32xf32>
    %27 = tpu.matmul %26, %0, %cst_17 {dimension_numbers = #tpu.dot_dimension_numbers<[1], [0], [0], [1], [0, 0, 1, 1], [], []>} : vector<392x9xbf16>, vector<9x32xbf16>, vector<392x32xf32> -> vector<392x32xf32>
    %28 = vector.broadcast %1 : vector<1x32xf32> to vector<392x32xf32>
    %29 = arith.addf %27, %28 : vector<392x32xf32>
    %cst_18 = arith.constant 0.000000e+00 : f32
    %30 = vector.broadcast %cst_18 : f32 to vector<392x32xf32>
    %31 = arith.maximumf %29, %30 : vector<392x32xf32>
    %32 = arith.maximumf %24, %31 : vector<392x32xf32>
    %33 = arith.truncf %32 : vector<392x32xf32> to vector<392x32xbf16>
    %c0_19 = arith.constant 0 : index
    %c0_20 = arith.constant 0 : index
    %34 = vector.load %arg4[%c0_19, %c0_20] : memref<392x32xbf16, #tpu.memory_space<vmem>>, vector<392x32xbf16>
    tpu.vector_store %arg4[%c0_19, %c0_20], %33 {strides = array<i32>} : memref<392x32xbf16, #tpu.memory_space<vmem>>, vector<392x32xbf16>,
    return
  }
  func.func @transform_0(%arg0: i32) -> (i32, i32, i32) {
    %c0_i32 = arith.constant 0 : i32
    %c0_i32_0 = arith.constant 0 : i32
    %c0_i32_1 = arith.constant 0 : i32
    return %c0_i32, %arg0, %c0_i32_0 : i32, i32, i32
  }
  func.func @transform_1(%arg0: i32) -> (i32, i32) {
    %c0_i32 = arith.constant 0 : i32
    %c0_i32_0 = arith.constant 0 : i32
    %c0_i32_1 = arith.constant 0 : i32
    return %c0_i32, %c0_i32_0 : i32, i32
  }
  func.func @transform_2(%arg0: i32) -> (i32, i32) {
    %c0_i32 = arith.constant 0 : i32
    %c0_i32_0 = arith.constant 0 : i32
    %c0_i32_1 = arith.constant 0 : i32
    return %c0_i32, %c0_i32_0 : i32, i32
  }
  func.func @transform_3(%arg0: i32) -> (i32, i32) {
    %c0_i32 = arith.constant 0 : i32
    %c0_i32_0 = arith.constant 0 : i32
    return %arg0, %c0_i32 : i32, i32
  }
}

module attributes {stable_mosaic.version = 11 : i64} {
  func.func @_conv_relu_pool_kernel(%arg0: i32, %arg1: memref<4x98x288xbf16, #tpu.memory_space<vmem>>, %arg2: memref<288x64xbf16, #tpu.memory_space<vmem>>, %arg3: memref<1x64xf32, #tpu.memory_space<vmem>>, %arg4: memref<98x64xbf16, #tpu.memory_space<vmem>>) attributes {dimension_semantics = [#tpu.dimension_semantics<parallel>], iteration_bounds = array<i64: 1>, scalar_prefetch = 0 : i64, scratch_operands = 0 : i64, tpu.core_type = #tpu.core_type<tc>, window_params = [{transform_indices = @transform_0, window_bounds = array<i64: 4, 98, 288>}, {pipeline_mode = #tpu.pipeline_mode<synchronous>, transform_indices = @transform_1, window_bounds = array<i64: 288, 64>}, {pipeline_mode = #tpu.pipeline_mode<synchronous>, transform_indices = @transform_2, window_bounds = array<i64: 1, 64>}, {transform_indices = @transform_3, window_bounds = array<i64: 98, 64>}]} {
    %c0 = arith.constant 0 : index
    %c0_0 = arith.constant 0 : index
    %0 = vector.load %arg2[%c0, %c0_0] : memref<288x64xbf16, #tpu.memory_space<vmem>>, vector<288x64xbf16>
    %c0_1 = arith.constant 0 : index
    %c0_2 = arith.constant 0 : index
    %1 = vector.load %arg3[%c0_1, %c0_2] : memref<1x64xf32, #tpu.memory_space<vmem>>, vector<1x64xf32>
    %c0_3 = arith.constant 0 : index
    %c0_4 = arith.constant 0 : index
    %c0_5 = arith.constant 0 : index
    %2 = vector.load %arg1[%c0_3, %c0_4, %c0_5] : memref<4x98x288xbf16, #tpu.memory_space<vmem>>, vector<1x98x288xbf16>
    %3 = vector.shape_cast %2 : vector<1x98x288xbf16> to vector<98x288xbf16>
    %cst = arith.constant dense<0.000000e+00> : vector<98x64xf32>
    %4 = tpu.matmul %3, %0, %cst {dimension_numbers = #tpu.dot_dimension_numbers<[1], [0], [0], [1], [0, 0, 1, 1], [], []>} : vector<98x288xbf16>, vector<288x64xbf16>, vector<98x64xf32> -> vector<98x64xf32>
    %5 = vector.broadcast %1 : vector<1x64xf32> to vector<98x64xf32>
    %6 = arith.addf %4, %5 : vector<98x64xf32>
    %cst_6 = arith.constant 0.000000e+00 : f32
    %7 = vector.broadcast %cst_6 : f32 to vector<98x64xf32>
    %8 = arith.maximumf %6, %7 : vector<98x64xf32>
    %c1 = arith.constant 1 : index
    %c0_7 = arith.constant 0 : index
    %c0_8 = arith.constant 0 : index
    %9 = vector.load %arg1[%c1, %c0_7, %c0_8] : memref<4x98x288xbf16, #tpu.memory_space<vmem>>, vector<1x98x288xbf16>
    %10 = vector.shape_cast %9 : vector<1x98x288xbf16> to vector<98x288xbf16>
    %cst_9 = arith.constant dense<0.000000e+00> : vector<98x64xf32>
    %11 = tpu.matmul %10, %0, %cst_9 {dimension_numbers = #tpu.dot_dimension_numbers<[1], [0], [0], [1], [0, 0, 1, 1], [], []>} : vector<98x288xbf16>, vector<288x64xbf16>, vector<98x64xf32> -> vector<98x64xf32>
    %12 = vector.broadcast %1 : vector<1x64xf32> to vector<98x64xf32>
    %13 = arith.addf %11, %12 : vector<98x64xf32>
    %cst_10 = arith.constant 0.000000e+00 : f32
    %14 = vector.broadcast %cst_10 : f32 to vector<98x64xf32>
    %15 = arith.maximumf %13, %14 : vector<98x64xf32>
    %16 = arith.maximumf %8, %15 : vector<98x64xf32>
    %c2 = arith.constant 2 : index
    %c0_11 = arith.constant 0 : index
    %c0_12 = arith.constant 0 : index
    %17 = vector.load %arg1[%c2, %c0_11, %c0_12] : memref<4x98x288xbf16, #tpu.memory_space<vmem>>, vector<1x98x288xbf16>
    %18 = vector.shape_cast %17 : vector<1x98x288xbf16> to vector<98x288xbf16>
    %cst_13 = arith.constant dense<0.000000e+00> : vector<98x64xf32>
    %19 = tpu.matmul %18, %0, %cst_13 {dimension_numbers = #tpu.dot_dimension_numbers<[1], [0], [0], [1], [0, 0, 1, 1], [], []>} : vector<98x288xbf16>, vector<288x64xbf16>, vector<98x64xf32> -> vector<98x64xf32>
    %20 = vector.broadcast %1 : vector<1x64xf32> to vector<98x64xf32>
    %21 = arith.addf %19, %20 : vector<98x64xf32>
    %cst_14 = arith.constant 0.000000e+00 : f32
    %22 = vector.broadcast %cst_14 : f32 to vector<98x64xf32>
    %23 = arith.maximumf %21, %22 : vector<98x64xf32>
    %24 = arith.maximumf %16, %23 : vector<98x64xf32>
    %c3 = arith.constant 3 : index
    %c0_15 = arith.constant 0 : index
    %c0_16 = arith.constant 0 : index
    %25 = vector.load %arg1[%c3, %c0_15, %c0_16] : memref<4x98x288xbf16, #tpu.memory_space<vmem>>, vector<1x98x288xbf16>
    %26 = vector.shape_cast %25 : vector<1x98x288xbf16> to vector<98x288xbf16>
    %cst_17 = arith.constant dense<0.000000e+00> : vector<98x64xf32>
    %27 = tpu.matmul %26, %0, %cst_17 {dimension_numbers = #tpu.dot_dimension_numbers<[1], [0], [0], [1], [0, 0, 1, 1], [], []>} : vector<98x288xbf16>, vector<288x64xbf16>, vector<98x64xf32> -> vector<98x64xf32>
    %28 = vector.broadcast %1 : vector<1x64xf32> to vector<98x64xf32>
    %29 = arith.addf %27, %28 : vector<98x64xf32>
    %cst_18 = arith.constant 0.000000e+00 : f32
    %30 = vector.broadcast %cst_18 : f32 to vector<98x64xf32>
    %31 = arith.maximumf %29, %30 : vector<98x64xf32>
    %32 = arith.maximumf %24, %31 : vector<98x64xf32>
    %33 = arith.truncf %32 : vector<98x64xf32> to vector<98x64xbf16>
    %c0_19 = arith.constant 0 : index
    %c0_20 = arith.constant 0 : index
    %34 = vector.load %arg4[%c0_19, %c0_20] : memref<98x64xbf16, #tpu.memory_space<vmem>>, vector<98x64xbf16>
    tpu.vector_store %arg4[%c0_19, %c0_20], %33 {strides = array<i32>} : memref<98x64xbf16, #tpu.memory_space<vmem>>, vector<98x64xbf16>,
    return
  }
  func.func @transform_0(%arg0: i32) -> (i32, i32, i32) {
    %c0_i32 = arith.constant 0 : i32
    %c0_i32_0 = arith.constant 0 : i32
    %c0_i32_1 = arith.constant 0 : i32
    return %c0_i32, %arg0, %c0_i32_0 : i32, i32, i32
  }
  func.func @transform_1(%arg0: i32) -> (i32, i32) {
    %c0_i32 = arith.constant 0 : i32
    %c0_i32_0 = arith.constant 0 : i32
    %c0_i32_1 = arith.constant 0 : i32
    return %c0_i32, %c0_i32_0 : i32, i32
  }
  func.func @transform_2(%arg0: i32) -> (i32, i32) {
    %c0_i32 = arith.constant 0 : i32
    %c0_i32_0 = arith.constant 0 : i32
    %c0_i32_1 = arith.constant 0 : i32
    return %c0_i32, %c0_i32_0 : i32, i32
  }
  func.func @transform_3(%arg0: i32) -> (i32, i32) {
    %c0_i32 = arith.constant 0 : i32
    %c0_i32_0 = arith.constant 0 : i32
    return %arg0, %c0_i32 : i32, i32
  }
}

module attributes {stable_mosaic.version = 11 : i64} {
  func.func @_fc_fused_kernel(%arg0: i32, %arg1: memref<2x3136xbf16, #tpu.memory_space<vmem>>, %arg2: memref<3136x128xbf16, #tpu.memory_space<vmem>>, %arg3: memref<1x128xf32, #tpu.memory_space<vmem>>, %arg4: memref<128x6xf32, #tpu.memory_space<vmem>>, %arg5: memref<1x6xf32, #tpu.memory_space<vmem>>, %arg6: memref<2x6xf32, #tpu.memory_space<vmem>>) attributes {dimension_semantics = [#tpu.dimension_semantics<parallel>], iteration_bounds = array<i64: 1>, scalar_prefetch = 0 : i64, scratch_operands = 0 : i64, tpu.core_type = #tpu.core_type<tc>, window_params = [{transform_indices = @transform_0, window_bounds = array<i64: 2, 3136>}, {pipeline_mode = #tpu.pipeline_mode<synchronous>, transform_indices = @transform_1, window_bounds = array<i64: 3136, 128>}, {pipeline_mode = #tpu.pipeline_mode<synchronous>, transform_indices = @transform_2, window_bounds = array<i64: 1, 128>}, {pipeline_mode = #tpu.pipeline_mode<synchronous>, transform_indices = @transform_3, window_bounds = array<i64: 128, 6>}, {pipeline_mode = #tpu.pipeline_mode<synchronous>, transform_indices = @transform_4, window_bounds = array<i64: 1, 6>}, {transform_indices = @transform_5, window_bounds = array<i64: 2, 6>}]} {
    %c0 = arith.constant 0 : index
    %c0_0 = arith.constant 0 : index
    %0 = vector.load %arg1[%c0, %c0_0] : memref<2x3136xbf16, #tpu.memory_space<vmem>>, vector<2x3136xbf16>
    %c0_1 = arith.constant 0 : index
    %c0_2 = arith.constant 0 : index
    %1 = vector.load %arg2[%c0_1, %c0_2] : memref<3136x128xbf16, #tpu.memory_space<vmem>>, vector<3136x128xbf16>
    %cst = arith.constant dense<0.000000e+00> : vector<2x128xf32>
    %2 = tpu.matmul %0, %1, %cst {dimension_numbers = #tpu.dot_dimension_numbers<[1], [0], [0], [1], [0, 0, 1, 1], [], []>} : vector<2x3136xbf16>, vector<3136x128xbf16>, vector<2x128xf32> -> vector<2x128xf32>
    %c0_3 = arith.constant 0 : index
    %c0_4 = arith.constant 0 : index
    %3 = vector.load %arg3[%c0_3, %c0_4] : memref<1x128xf32, #tpu.memory_space<vmem>>, vector<1x128xf32>
    %4 = vector.broadcast %3 : vector<1x128xf32> to vector<2x128xf32>
    %5 = arith.addf %2, %4 : vector<2x128xf32>
    %cst_5 = arith.constant 0.000000e+00 : f32
    %6 = vector.broadcast %cst_5 : f32 to vector<2x128xf32>
    %7 = arith.maximumf %5, %6 : vector<2x128xf32>
    %c0_6 = arith.constant 0 : index
    %c0_7 = arith.constant 0 : index
    %8 = vector.load %arg4[%c0_6, %c0_7] : memref<128x6xf32, #tpu.memory_space<vmem>>, vector<128x6xf32>
    %cst_8 = arith.constant dense<0.000000e+00> : vector<2x6xf32>
    %9 = tpu.matmul %7, %8, %cst_8 {dimension_numbers = #tpu.dot_dimension_numbers<[1], [0], [0], [1], [0, 0, 1, 1], [], []>} : vector<2x128xf32>, vector<128x6xf32>, vector<2x6xf32> -> vector<2x6xf32>
    %c0_9 = arith.constant 0 : index
    %c0_10 = arith.constant 0 : index
    %10 = vector.load %arg5[%c0_9, %c0_10] : memref<1x6xf32, #tpu.memory_space<vmem>>, vector<1x6xf32>
    %11 = vector.broadcast %10 : vector<1x6xf32> to vector<2x6xf32>
    %12 = arith.addf %9, %11 : vector<2x6xf32>
    %c0_11 = arith.constant 0 : index
    %c0_12 = arith.constant 0 : index
    %13 = vector.load %arg6[%c0_11, %c0_12] : memref<2x6xf32, #tpu.memory_space<vmem>>, vector<2x6xf32>
    tpu.vector_store %arg6[%c0_11, %c0_12], %12 {strides = array<i32>} : memref<2x6xf32, #tpu.memory_space<vmem>>, vector<2x6xf32>,
    return
  }
  func.func @transform_0(%arg0: i32) -> (i32, i32) {
    %c0_i32 = arith.constant 0 : i32
    %c0_i32_0 = arith.constant 0 : i32
    return %arg0, %c0_i32 : i32, i32
  }
  func.func @transform_1(%arg0: i32) -> (i32, i32) {
    %c0_i32 = arith.constant 0 : i32
    %c0_i32_0 = arith.constant 0 : i32
    %c0_i32_1 = arith.constant 0 : i32
    return %c0_i32, %c0_i32_0 : i32, i32
  }
  func.func @transform_2(%arg0: i32) -> (i32, i32) {
    %c0_i32 = arith.constant 0 : i32
    %c0_i32_0 = arith.constant 0 : i32
    %c0_i32_1 = arith.constant 0 : i32
    return %c0_i32, %c0_i32_0 : i32, i32
  }
  func.func @transform_3(%arg0: i32) -> (i32, i32) {
    %c0_i32 = arith.constant 0 : i32
    %c0_i32_0 = arith.constant 0 : i32
    %c0_i32_1 = arith.constant 0 : i32
    return %c0_i32, %c0_i32_0 : i32, i32
  }
  func.func @transform_4(%arg0: i32) -> (i32, i32) {
    %c0_i32 = arith.constant 0 : i32
    %c0_i32_0 = arith.constant 0 : i32
    %c0_i32_1 = arith.constant 0 : i32
    return %c0_i32, %c0_i32_0 : i32, i32
  }
  func.func @transform_5(%arg0: i32) -> (i32, i32) {
    %c0_i32 = arith.constant 0 : i32
    %c0_i32_0 = arith.constant 0 : i32
    return %arg0, %c0_i32 : i32, i32
  }
}

</mosaic_0001>

<bundles_post_ra>
// kernel: cnn_forward.3
= control target key start
LH: loop header
LB: loop body
LE: loop exit
PB: predicated region body
PF: predicated region fallthrough
CT: control target
= control target key end

     0   :  { %vm277_vm0 = vcmask 1043456   ;;  %vm278_vm1 = vcmask 1044480   ;;  %v3615_v0 = vmov 0.0   ;;  %v3616_v2 = vmov 65535   ;;  %s4799_s1 = inlined_call_operand.vmem [shape: bf16[9,32], index: 1, kind: input, shape index: {}]   ;;  %s4800_s0 = inlined_call_operand.vmem [shape: bf16[4,392,9], index: 0, kind: input, shape index: {}]   ;;  %s4801_s2 = inlined_call_operand.vmem [shape: f32[1,32], index: 2, kind: input, shape index: {}]   ;;  %s4802_s3 = inlined_call_operand.vmem [shape: bf16[392,32], index: 3, kind: output, shape index: {}]  }
   0x1   :  { %3101 = vmatprep.subr.bf16.mxu0 %v3615_v0  ;;  %3203 = vmatprep.subr.bf16.mxu1 %v3615_v0  ;;  %v3512_v1 = vld [vmem:[%s4799_s1] sm:$0x1f]   ;;  %v279_v3 = vsel %vm277_vm0, 4294967295, %v3616_v2  ;;  %vm3617_vm2 = vmmov 0   ;;  %vm201_vm3 = vcmask 72704   ;;  %v3515_v8 = vld [vmem:[%s4800_s0 + $0x8] sm:$0xff]  }
   0x2   :  { %v280_v4 = vsel %vm278_vm1, %v279_v3, 0  ;;  %3103 = vmatprep.mubr.msk.bf16.mxu0 %vm3617_vm2, %v3615_v0  ;;  %3205 = vmatprep.mubr.msk.bf16.mxu1 %vm3617_vm2, %v3615_v0  ;;  %v3513_v5 = vld [vmem:[%s4800_s0] sm:$0xff]   ;;  %v3516_v9 = vld [vmem:[%s4800_s0 + $0xcc] sm:$0xff]   ;;  %v3518_v11 = vld [vmem:[%s4800_s0 + $0xd4] sm:$0xff]   ;;  %vm2496_vm4 = vcmask 257024  }
   0x3   :  { %v282_v6 = vand.u32 %v3512_v1, %v280_v4  ;;  %v3514_v7 = vld [vmem:[%s4800_s0 + $0xc4] sm:$0xff]   ;;  %v3517_v10 = vld [vmem:[%s4800_s0 + $0x10] sm:$0xff]   ;;  %v3519_v12 = vld [vmem:[%s4800_s0 + $0x18] sm:$0xff]  }
   0x4   :  { %v3520_v13 = vld [vmem:[%s4800_s0 + $0xdc] sm:$0xff]   ;;  %v3522_v15 = vld [vmem:[%s4800_s0 + $0xe4] sm:$0xff]   ;;  %v3524_v17 = vld [vmem:[%s4800_s0 + $0xec] sm:$0xff]  }
   0x5   :  { %3102 = vmatpush3.bf16.msra.mxu0 %v282_v6  ;;  %3204 = vmatpush3.bf16.msra.mxu1 %v282_v6  ;;  %v3521_v14 = vld [vmem:[%s4800_s0 + $0x20] sm:$0xff]   ;;  %v3523_v16 = vld [vmem:[%s4800_s0 + $0x28] sm:$0xff]   ;;  %v3525_v18 = vld [vmem:[%s4800_s0 + $0x30] sm:$0xff]  }
   0x6   :  { %3305 = vmatprep.subr.bf16.mxu0 %v3615_v0  ;;  %3407 = vmatprep.subr.bf16.mxu1 %v3615_v0  ;;  %v3526_v19 = vld [vmem:[%s4800_s0 + $0xf4] sm:$0xff]   ;;  %v3528_v21 = vld [vmem:[%s4800_s0 + $0xfc] sm:$0xff]   ;;  %v3530_v23 = vld [vmem:[%s4800_s0 + $0x104] sm:$0xff]  }
   0x7   :  { %v3527_v20 = vld [vmem:[%s4800_s0 + $0x38] sm:$0xff]   ;;  %v3529_v22 = vld [vmem:[%s4800_s0 + $0x40] sm:$0xff]   ;;  %v3531_v24 = vld [vmem:[%s4800_s0 + $0x48] sm:$0xff]  }
   0x8   :  { %3104 = vmatmul.mubr.msk.bf16.vlgmr.msra.gmra.mrb[0].mxu0 %vm201_vm3, %v3513_v5  ;;  %3206 = vmatmul.mubr.msk.bf16.vlgmr.msra.gmra.mrb[0].mxu1 %vm201_vm3, %v3514_v7  ;;  %v3532_v25 = vld [vmem:[%s4800_s0 + $0x10c] sm:$0xff]   ;;  %v3534_v27 = vld [vmem:[%s4800_s0 + $0x114] sm:$0xff]   ;;  %v3536_v29 = vld [vmem:[%s4800_s0 + $0x11c] sm:$0xff]  }
   0x9   :  { %3306 = vmatpush3.bf16.msra.mxu0 %v282_v6  ;;  %3408 = vmatpush3.bf16.msra.mxu1 %v282_v6  ;;  %v3533_v26 = vld [vmem:[%s4800_s0 + $0x50] sm:$0xff]   ;;  %v3535_v28 = vld [vmem:[%s4800_s0 + $0x58] sm:$0xff]   ;;  %v3537_v30 = vld [vmem:[%s4800_s0 + $0x60] sm:$0xff]  }
   0xa   :  { %3107 = vmatprep.mubr.msk.bf16.mxu0 %vm3617_vm2, %v3615_v0  ;;  %3209 = vmatprep.mubr.msk.bf16.mxu1 %vm3617_vm2, %v3615_v0  ;;  %v3538_v31 = vld [vmem:[%s4800_s0 + $0x124] sm:$0xff]   ;;  %v3540_v33 = vld [vmem:[%s4800_s0 + $0x12c] sm:$0xff]   ;;  %v3542_v35 = vld [vmem:[%s4800_s0 + $0x134] sm:$0xff]  }
   0xb   :  { %v3539_v32 = vld [vmem:[%s4800_s0 + $0x68] sm:$0xff]   ;;  %v3541_v34 = vld [vmem:[%s4800_s0 + $0x70] sm:$0xff]   ;;  %v3543_v36 = vld [vmem:[%s4800_s0 + $0x78] sm:$0xff]  }
   0xc   :  { %v3544_v37 = vld [vmem:[%s4800_s0 + $0x13c] sm:$0xff]   ;;  %v3546_v39 = vld [vmem:[%s4800_s0 + $0x144] sm:$0xff]   ;;  %v3548_v41 = vld [vmem:[%s4800_s0 + $0x14c] sm:$0xff]  }
   0xd   :  { %v3545_v38 = vld [vmem:[%s4800_s0 + $0x80] sm:$0xff]   ;;  %v3547_v40 = vld [vmem:[%s4800_s0 + $0x88] sm:$0xff]   ;;  %v3549_v42 = vld [vmem:[%s4800_s0 + $0x90] sm:$0xff]  }
   0xe   :  { %v3550_v43 = vld [vmem:[%s4800_s0 + $0x154] sm:$0xff]   ;;  %v3552_v45 = vld [vmem:[%s4800_s0 + $0x15c] sm:$0xff]   ;;  %v3554_v47 = vld [vmem:[%s4800_s0 + $0x164] sm:$0xff]  }
   0xf   :  { %v3551_v44 = vld [vmem:[%s4800_s0 + $0x98] sm:$0xff]   ;;  %v3553_v46 = vld [vmem:[%s4800_s0 + $0xa0] sm:$0xff]   ;;  %v3555_v48 = vld [vmem:[%s4800_s0 + $0xa8] sm:$0xff]  }
  0x10   :  { %3108 = vmatmul.mubr.msk.bf16.gmra.mrb[4].mxu0 %vm201_vm3, %v3515_v8  ;;  %3210 = vmatmul.mubr.msk.bf16.gmra.mrb[4].mxu1 %vm201_vm3, %v3516_v9  ;;  %v3556_v49 = vld [vmem:[%s4800_s0 + $0x16c] sm:$0xff]   ;;  %v3558_v51 = vld [vmem:[%s4800_s0 + $0x174] sm:$0xff]   ;;  %v3560_v53 = vld [vmem:[%s4800_s0 + $0x17c] sm:$0xff]  }
  0x11   :  { %3111 = vmatprep.mubr.msk.bf16.mxu0 %vm3617_vm2, %v3615_v0  ;;  %3213 = vmatprep.mubr.msk.bf16.mxu1 %vm3617_vm2, %v3615_v0  ;;  %v3557_v50 = vld [vmem:[%s4800_s0 + $0xb0] sm:$0xff]   ;;  %v3559_v52 = vld [vmem:[%s4800_s0 + $0xb8] sm:$0xff]   ;;  %v3561_v54 = vld [vmem:[%s4800_s0 + $0xc0] ss:$0 sps:$4 sm:$0xff]  }
  0x12   :  { %v3562_v55 = vld [vmem:[%s4800_s0 + $0x184] ss:$0 sps:$4 sm:$0xff]   ;;  %v3563_v56 = vld [vmem:[%s4800_s0 + $0x188] sm:$0xff]   ;;  %v3565_v58 = vld [vmem:[%s4800_s0 + $0x190] sm:$0xff]  }
  0x13   :  { %v3564_v57 = vld [vmem:[%s4800_s0 + $0x24c] sm:$0xff]   ;;  %v3566_v59 = vld [vmem:[%s4800_s0 + $0x254] sm:$0xff]   ;;  %v3972_v60 = vld [vmem:[%s4801_s2] ss:$0 sm:$0xff] }
  0x14   :  { %v3567_v4 = vld [vmem:[%s4800_s0 + $0x198] sm:$0xff]  }
  0x15   :  { %v3568_v5 = vld [vmem:[%s4800_s0 + $0x25c] sm:$0xff]  }
  0x18   :  { %3112 = vmatmul.mubr.msk.bf16.gmra.mrb[8].mxu0 %vm201_vm3, %v3517_v10  ;;  %3214 = vmatmul.mubr.msk.bf16.gmra.mrb[8].mxu1 %vm201_vm3, %v3518_v11 }
  0x19   :  { %3115 = vmatprep.mubr.msk.bf16.mxu0 %vm3617_vm2, %v3615_v0  ;;  %3217 = vmatprep.mubr.msk.bf16.mxu1 %vm3617_vm2, %v3615_v0 }
  0x20   :  { %3116 = vmatmul.mubr.msk.bf16.gmra.mrb[12].mxu0 %vm201_vm3, %v3519_v12  ;;  %3218 = vmatmul.mubr.msk.bf16.gmra.mrb[12].mxu1 %vm201_vm3, %v3520_v13 }
  0x21   :  { %3119 = vmatprep.mubr.msk.bf16.mxu0 %vm3617_vm2, %v3615_v0  ;;  %3221 = vmatprep.mubr.msk.bf16.mxu1 %vm3617_vm2, %v3615_v0 }
  0x28   :  { %3120 = vmatmul.mubr.msk.bf16.gmra.mrb[16].mxu0 %vm201_vm3, %v3521_v14  ;;  %3222 = vmatmul.mubr.msk.bf16.gmra.mrb[16].mxu1 %vm201_vm3, %v3522_v15 }
  0x29   :  { %3123 = vmatprep.mubr.msk.bf16.mxu0 %vm3617_vm2, %v3615_v0  ;;  %3225 = vmatprep.mubr.msk.bf16.mxu1 %vm3617_vm2, %v3615_v0 }
  0x30   :  { %3124 = vmatmul.mubr.msk.bf16.gmra.mrb[20].mxu0 %vm201_vm3, %v3523_v16  ;;  %3226 = vmatmul.mubr.msk.bf16.gmra.mrb[20].mxu1 %vm201_vm3, %v3524_v17 }
  0x31   :  { %3127 = vmatprep.mubr.msk.bf16.mxu0 %vm3617_vm2, %v3615_v0  ;;  %3229 = vmatprep.mubr.msk.bf16.mxu1 %vm3617_vm2, %v3615_v0 }
  0x38   :  { %3128 = vmatmul.mubr.msk.bf16.gmra.mrb[24].mxu0 %vm201_vm3, %v3525_v18  ;;  %3230 = vmatmul.mubr.msk.bf16.gmra.mrb[24].mxu1 %vm201_vm3, %v3526_v19 }
  0x39   :  { %3131 = vmatprep.mubr.msk.bf16.mxu0 %vm3617_vm2, %v3615_v0  ;;  %3233 = vmatprep.mubr.msk.bf16.mxu1 %vm3617_vm2, %v3615_v0 }
  0x40   :  { %3132 = vmatmul.mubr.msk.bf16.gmra.mrb[28].mxu0 %vm201_vm3, %v3527_v20  ;;  %3234 = vmatmul.mubr.msk.bf16.gmra.mrb[28].mxu1 %vm201_vm3, %v3528_v21 }
  0x41   :  { %3135 = vmatprep.mubr.msk.bf16.mxu0 %vm3617_vm2, %v3615_v0  ;;  %3237 = vmatprep.mubr.msk.bf16.mxu1 %vm3617_vm2, %v3615_v0 }
  0x48   :  { %3136 = vmatmul.mubr.msk.bf16.gmra.mrb[32].mxu0 %vm201_vm3, %v3529_v22  ;;  %3238 = vmatmul.mubr.msk.bf16.gmra.mrb[32].mxu1 %vm201_vm3, %v3530_v23 }
  0x49   :  { %3139 = vmatprep.mubr.msk.bf16.mxu0 %vm3617_vm2, %v3615_v0  ;;  %3241 = vmatprep.mubr.msk.bf16.mxu1 %vm3617_vm2, %v3615_v0 }
  0x50   :  { %3140 = vmatmul.mubr.msk.bf16.gmra.mrb[36].mxu0 %vm201_vm3, %v3531_v24  ;;  %3242 = vmatmul.mubr.msk.bf16.gmra.mrb[36].mxu1 %vm201_vm3, %v3532_v25  ;;  %v3569_v24 = vld [vmem:[%s4800_s0 + $0x1a0] sm:$0xff]  }
  0x51   :  { %3143 = vmatprep.mubr.msk.bf16.mxu0 %vm3617_vm2, %v3615_v0  ;;  %3245 = vmatprep.mubr.msk.bf16.mxu1 %vm3617_vm2, %v3615_v0  ;;  %v3570_v25 = vld [vmem:[%s4800_s0 + $0x264] sm:$0xff]  }
  0x58   :  { %3144 = vmatmul.mubr.msk.bf16.gmra.mrb[40].mxu0 %vm201_vm3, %v3533_v26  ;;  %3246 = vmatmul.mubr.msk.bf16.gmra.mrb[40].mxu1 %vm201_vm3, %v3534_v27 }
  0x59   :  { %3147 = vmatprep.mubr.msk.bf16.mxu0 %vm3617_vm2, %v3615_v0  ;;  %3249 = vmatprep.mubr.msk.bf16.mxu1 %vm3617_vm2, %v3615_v0 }
  0x60   :  { %3148 = vmatmul.mubr.msk.bf16.gmra.mrb[44].mxu0 %vm201_vm3, %v3535_v28  ;;  %3250 = vmatmul.mubr.msk.bf16.gmra.mrb[44].mxu1 %vm201_vm3, %v3536_v29 }
  0x61   :  { %3151 = vmatprep.mubr.msk.bf16.mxu0 %vm3617_vm2, %v3615_v0  ;;  %3253 = vmatprep.mubr.msk.bf16.mxu1 %vm3617_vm2, %v3615_v0 }
  0x68   :  { %3152 = vmatmul.mubr.msk.bf16.gmra.mrb[48].mxu0 %vm201_vm3, %v3537_v30  ;;  %3254 = vmatmul.mubr.msk.bf16.gmra.mrb[48].mxu1 %vm201_vm3, %v3538_v31 }
  0x69   :  { %3155 = vmatprep.mubr.msk.bf16.mxu0 %vm3617_vm2, %v3615_v0  ;;  %3257 = vmatprep.mubr.msk.bf16.mxu1 %vm3617_vm2, %v3615_v0 }
  0x70   :  { %3156 = vmatmul.mubr.msk.bf16.gmra.mrb[52].mxu0 %vm201_vm3, %v3539_v32  ;;  %3258 = vmatmul.mubr.msk.bf16.gmra.mrb[52].mxu1 %vm201_vm3, %v3540_v33 }
  0x71   :  { %3159 = vmatprep.mubr.msk.bf16.mxu0 %vm3617_vm2, %v3615_v0  ;;  %3261 = vmatprep.mubr.msk.bf16.mxu1 %vm3617_vm2, %v3615_v0 }
  0x78   :  { %3160 = vmatmul.mubr.msk.bf16.gmra.mrb[56].mxu0 %vm201_vm3, %v3541_v34  ;;  %3262 = vmatmul.mubr.msk.bf16.gmra.mrb[56].mxu1 %vm201_vm3, %v3542_v35 }
  0x79   :  { %3163 = vmatprep.mubr.msk.bf16.mxu0 %vm3617_vm2, %v3615_v0  ;;  %3265 = vmatprep.mubr.msk.bf16.mxu1 %vm3617_vm2, %v3615_v0 }
  0x80   :  { %3164 = vmatmul.mubr.msk.bf16.gmra.mrb[60].mxu0 %vm201_vm3, %v3543_v36  ;;  %3266 = vmatmul.mubr.msk.bf16.gmra.mrb[60].mxu1 %vm201_vm3, %v3544_v37 }
  0x81   :  { %3167 = vmatprep.mubr.msk.bf16.mxu0 %vm3617_vm2, %v3615_v0  ;;  %3269 = vmatprep.mubr.msk.bf16.mxu1 %vm3617_vm2, %v3615_v0 }
  0x88   :  { %3168 = vmatmul.mubr.msk.bf16.gmra.mrb[64].mxu0 %vm201_vm3, %v3545_v38  ;;  %3270 = vmatmul.mubr.msk.bf16.gmra.mrb[64].mxu1 %vm201_vm3, %v3546_v39 }
  0x89   :  { %3171 = vmatprep.mubr.msk.bf16.mxu0 %vm3617_vm2, %v3615_v0  ;;  %3273 = vmatprep.mubr.msk.bf16.mxu1 %vm3617_vm2, %v3615_v0 }
  0x90   :  { %3172 = vmatmul.mubr.msk.bf16.gmra.mrb[68].mxu0 %vm201_vm3, %v3547_v40  ;;  %3274 = vmatmul.mubr.msk.bf16.gmra.mrb[68].mxu1 %vm201_vm3, %v3548_v41 }
  0x91   :  { %3175 = vmatprep.mubr.msk.bf16.mxu0 %vm3617_vm2, %v3615_v0  ;;  %3277 = vmatprep.mubr.msk.bf16.mxu1 %vm3617_vm2, %v3615_v0 }
  0x98   :  { %3176 = vmatmul.mubr.msk.bf16.gmra.mrb[72].mxu0 %vm201_vm3, %v3549_v42  ;;  %3278 = vmatmul.mubr.msk.bf16.gmra.mrb[72].mxu1 %vm201_vm3, %v3550_v43 }
  0x99   :  { %3179 = vmatprep.mubr.msk.bf16.mxu0 %vm3617_vm2, %v3615_v0  ;;  %3281 = vmatprep.mubr.msk.bf16.mxu1 %vm3617_vm2, %v3615_v0 }
  0xa0   :  { %3180 = vmatmul.mubr.msk.bf16.gmra.mrb[76].mxu0 %vm201_vm3, %v3551_v44  ;;  %3282 = vmatmul.mubr.msk.bf16.gmra.mrb[76].mxu1 %vm201_vm3, %v3552_v45  ;;  %v3571_v44 = vld [vmem:[%s4800_s0 + $0x1a8] sm:$0xff]  }
  0xa1   :  { %3183 = vmatprep.mubr.msk.bf16.mxu0 %vm3617_vm2, %v3615_v0  ;;  %3285 = vmatprep.mubr.msk.bf16.mxu1 %vm3617_vm2, %v3615_v0  ;;  %v3572_v45 = vld [vmem:[%s4800_s0 + $0x26c] sm:$0xff]  }
  0xa8   :  { %3184 = vmatmul.mubr.msk.bf16.gmra.mrb[80].mxu0 %vm201_vm3, %v3553_v46  ;;  %3286 = vmatmul.mubr.msk.bf16.gmra.mrb[80].mxu1 %vm201_vm3, %v3554_v47 }
  0xa9   :  { %3187 = vmatprep.mubr.msk.bf16.mxu0 %vm3617_vm2, %v3615_v0  ;;  %3289 = vmatprep.mubr.msk.bf16.mxu1 %vm3617_vm2, %v3615_v0 }
  0xb0   :  { %3188 = vmatmul.mubr.msk.bf16.gmra.mrb[84].mxu0 %vm201_vm3, %v3555_v48  ;;  %3290 = vmatmul.mubr.msk.bf16.gmra.mrb[84].mxu1 %vm201_vm3, %v3556_v49 }
  0xb1   :  { %3191 = vmatprep.mubr.msk.bf16.mxu0 %vm3617_vm2, %v3615_v0  ;;  %3293 = vmatprep.mubr.msk.bf16.mxu1 %vm3617_vm2, %v3615_v0 }
  0xb8   :  { %3192 = vmatmul.mubr.msk.bf16.gmra.mrb[88].mxu0 %vm201_vm3, %v3557_v50  ;;  %3294 = vmatmul.mubr.msk.bf16.gmra.mrb[88].mxu1 %vm201_vm3, %v3558_v51 }
  0xb9   :  { %3195 = vmatprep.mubr.msk.bf16.mxu0 %vm3617_vm2, %v3615_v0  ;;  %3297 = vmatprep.mubr.msk.bf16.mxu1 %vm3617_vm2, %v3615_v0 }
  0xc0   :  { %3196 = vmatmul.mubr.msk.bf16.gmra.mrb[92].mxu0 %vm201_vm3, %v3559_v52  ;;  %3298 = vmatmul.mubr.msk.bf16.gmra.mrb[92].mxu1 %vm201_vm3, %v3560_v53 }
  0xc1   :  { %3199 = vmatprep.mubr.msk.bf16.mxu0 %vm3617_vm2, %v3615_v0  ;;  %3301 = vmatprep.mubr.msk.bf16.mxu1 %vm3617_vm2, %v3615_v0 }
  0xc8   :  { %3200 = vmatmul.mubr.msk.bf16.gmra.mrb[96].mxu0 %vm201_vm3, %v3561_v54  ;;  %3302 = vmatmul.mubr.msk.bf16.gmra.mrb[96].mxu1 %vm201_vm3, %v3562_v55 }
  0xc9   :  { %3307 = vmatprep.mubr.msk.bf16.mxu0 %vm3617_vm2, %v3615_v0  ;;  %3409 = vmatprep.mubr.msk.bf16.mxu1 %vm3617_vm2, %v3615_v0 }
  0xd0   :  { %3308 = vmatmul.mubr.msk.bf16.vlgmr.msra.gmra.mrb[100].mxu0 %vm201_vm3, %v3563_v56  ;;  %3410 = vmatmul.mubr.msk.bf16.vlgmr.msra.gmra.mrb[100].mxu1 %vm201_vm3, %v3564_v57 }
  0xd1   :  { %3311 = vmatprep.mubr.msk.bf16.mxu0 %vm3617_vm2, %v3615_v0  ;;  %3413 = vmatprep.mubr.msk.bf16.mxu1 %vm3617_vm2, %v3615_v0 }
  0xd8   :  { %3312 = vmatmul.mubr.msk.bf16.gmra.mrb[104].mxu0 %vm201_vm3, %v3565_v58  ;;  %3414 = vmatmul.mubr.msk.bf16.gmra.mrb[104].mxu1 %vm201_vm3, %v3566_v59 }
  0xd9   :  { %3315 = vmatprep.mubr.msk.bf16.mxu0 %vm3617_vm2, %v3615_v0  ;;  %3417 = vmatprep.mubr.msk.bf16.mxu1 %vm3617_vm2, %v3615_v0 }
  0xdb   :  { %v318_v61 = vpop.f32.mrb[0].mxu0  ;;  %v847_v62 = vpop.f32.mrb[0].mxu1 }
  0xdc   :  { %v319_v63 = vadd.f32 %v3972_v60, %v318_v61  ;;  %v848_v1 = vadd.f32 %v3972_v60, %v847_v62  ;;  %v3105_v2 = vpop.f32.mrb[1].mxu0  ;;  %v3207_v3 = vpop.f32.mrb[1].mxu1 }
  0xdd   :  { %v321_v6 = vpop.f32.mrb[2].mxu0  ;;  %v850_v7 = vpop.f32.mrb[2].mxu1  ;;  %v3573_v2 = vld [vmem:[%s4800_s0 + $0x1b0] sm:$0xff]  }
  0xde   :  { %v516_v8 = vmax.f32 %v319_v63, 0.0  ;;  %v1045_v9 = vmax.f32 %v848_v1, 0.0  ;;  %v322_v10 = vadd.f32 %v3972_v60, %v321_v6  ;;  %v851_v11 = vadd.f32 %v3972_v60, %v850_v7  ;;  %v3106_v12 = vpop.f32.mrb[3].mxu0  ;;  %v3208_v13 = vpop.f32.mrb[3].mxu1  ;;  %v3574_v3 = vld [vmem:[%s4800_s0 + $0x274] sm:$0xff]  }
  0xe0   :  { %v3988_v14 = vmax.f32 %v516_v8, %v1045_v9  ;;  %v517_v15 = vmax.f32 %v322_v10, 0.0  ;;  %v1046_v16 = vmax.f32 %v851_v11, 0.0  ;;  %3316 = vmatmul.mubr.msk.bf16.gmra.mrb[108].mxu0 %vm201_vm3, %v3567_v4  ;;  %3418 = vmatmul.mubr.msk.bf16.gmra.mrb[108].mxu1 %vm201_vm3, %v3568_v5 }
  0xe1   :  { %3319 = vmatprep.mubr.msk.bf16.mxu0 %vm3617_vm2, %v3615_v0  ;;  %3421 = vmatprep.mubr.msk.bf16.mxu1 %vm3617_vm2, %v3615_v0 }
  0xe2   :  { %v3996_v17 = vmax.f32 %v517_v15, %v1046_v16 }
  0xe3   :  { %v326_v18 = vpop.f32.mrb[4].mxu0  ;;  %v855_v19 = vpop.f32.mrb[4].mxu1 }
  0xe4   :  { %v327_v20 = vadd.f32 %v3972_v60, %v326_v18  ;;  %v856_v21 = vadd.f32 %v3972_v60, %v855_v19  ;;  %v3109_v22 = vpop.f32.mrb[5].mxu0  ;;  %v3211_v23 = vpop.f32.mrb[5].mxu1 }
  0xe5   :  { %v329_v26 = vpop.f32.mrb[6].mxu0  ;;  %v858_v27 = vpop.f32.mrb[6].mxu1 }
  0xe6   :  { %v518_v28 = vmax.f32 %v327_v20, 0.0  ;;  %v1047_v29 = vmax.f32 %v856_v21, 0.0  ;;  %v330_v30 = vadd.f32 %v3972_v60, %v329_v26  ;;  %v859_v31 = vadd.f32 %v3972_v60, %v858_v27  ;;  %v3110_v32 = vpop.f32.mrb[7].mxu0  ;;  %v3212_v33 = vpop.f32.mrb[7].mxu1 }
  0xe8   :  { %v4008_v34 = vmax.f32 %v518_v28, %v1047_v29  ;;  %v519_v35 = vmax.f32 %v330_v30, 0.0  ;;  %v1048_v36 = vmax.f32 %v859_v31, 0.0  ;;  %3320 = vmatmul.mubr.msk.bf16.gmra.mrb[112].mxu0 %vm201_vm3, %v3569_v24  ;;  %3422 = vmatmul.mubr.msk.bf16.gmra.mrb[112].mxu1 %vm201_vm3, %v3570_v25  ;;  %v3575_v24 = vld [vmem:[%s4800_s0 + $0x1b8] sm:$0xff]  }
  0xe9   :  { %3323 = vmatprep.mubr.msk.bf16.mxu0 %vm3617_vm2, %v3615_v0  ;;  %3425 = vmatprep.mubr.msk.bf16.mxu1 %vm3617_vm2, %v3615_v0  ;;  %v3576_v25 = vld [vmem:[%s4800_s0 + $0x27c] sm:$0xff]  }
  0xea   :  { %v4016_v37 = vmax.f32 %v519_v35, %v1048_v36 }
  0xeb   :  { %v334_v38 = vpop.f32.mrb[8].mxu0  ;;  %v863_v39 = vpop.f32.mrb[8].mxu1 }
  0xec   :  { %v335_v40 = vadd.f32 %v3972_v60, %v334_v38  ;;  %v864_v41 = vadd.f32 %v3972_v60, %v863_v39  ;;  %v3113_v42 = vpop.f32.mrb[9].mxu0  ;;  %v3215_v43 = vpop.f32.mrb[9].mxu1 }
  0xed   :  { %v337_v46 = vpop.f32.mrb[10].mxu0  ;;  %v866_v47 = vpop.f32.mrb[10].mxu1 }
  0xee   :  { %v520_v48 = vmax.f32 %v335_v40, 0.0  ;;  %v1049_v49 = vmax.f32 %v864_v41, 0.0  ;;  %v338_v50 = vadd.f32 %v3972_v60, %v337_v46  ;;  %v867_v51 = vadd.f32 %v3972_v60, %v866_v47  ;;  %v3114_v52 = vpop.f32.mrb[11].mxu0  ;;  %v3216_v53 = vpop.f32.mrb[11].mxu1  ;;  %v3577_v46 = vld [vmem:[%s4800_s0 + $0x1c0] sm:$0xff]  }
  0xef   :  { %v3578_v47 = vld [vmem:[%s4800_s0 + $0x284] sm:$0xff]  }
  0xf0   :  { %v4028_v54 = vmax.f32 %v520_v48, %v1049_v49  ;;  %v521_v55 = vmax.f32 %v338_v50, 0.0  ;;  %v1050_v56 = vmax.f32 %v867_v51, 0.0  ;;  %3324 = vmatmul.mubr.msk.bf16.gmra.mrb[116].mxu0 %vm201_vm3, %v3571_v44  ;;  %3426 = vmatmul.mubr.msk.bf16.gmra.mrb[116].mxu1 %vm201_vm3, %v3572_v45 }
  0xf1   :  { %3327 = vmatprep.mubr.msk.bf16.mxu0 %vm3617_vm2, %v3615_v0  ;;  %3429 = vmatprep.mubr.msk.bf16.mxu1 %vm3617_vm2, %v3615_v0 }
  0xf2   :  { %v4036_v57 = vmax.f32 %v521_v55, %v1050_v56 }
  0xf3   :  { %v342_v58 = vpop.f32.mrb[12].mxu0  ;;  %v871_v59 = vpop.f32.mrb[12].mxu1 }
  0xf4   :  { %v343_v61 = vadd.f32 %v3972_v60, %v342_v58  ;;  %v872_v62 = vadd.f32 %v3972_v60, %v871_v59  ;;  %v3117_v63 = vpop.f32.mrb[13].mxu0  ;;  %v3219_v1 = vpop.f32.mrb[13].mxu1 }
  0xf5   :  { %v345_v4 = vpop.f32.mrb[14].mxu0  ;;  %v874_v5 = vpop.f32.mrb[14].mxu1 }
  0xf6   :  { %v522_v6 = vmax.f32 %v343_v61, 0.0  ;;  %v1051_v7 = vmax.f32 %v872_v62, 0.0  ;;  %v346_v8 = vadd.f32 %v3972_v60, %v345_v4  ;;  %v875_v9 = vadd.f32 %v3972_v60, %v874_v5  ;;  %v3118_v10 = vpop.f32.mrb[15].mxu0  ;;  %v3220_v11 = vpop.f32.mrb[15].mxu1 }
  0xf8   :  { %v4048_v12 = vmax.f32 %v522_v6, %v1051_v7  ;;  %v523_v13 = vmax.f32 %v346_v8, 0.0  ;;  %v1052_v15 = vmax.f32 %v875_v9, 0.0  ;;  %3328 = vmatmul.mubr.msk.bf16.gmra.mrb[120].mxu0 %vm201_vm3, %v3573_v2  ;;  %3430 = vmatmul.mubr.msk.bf16.gmra.mrb[120].mxu1 %vm201_vm3, %v3574_v3  ;;  %v3579_v6 = vld [vmem:[%s4800_s0 + $0x1c8] sm:$0xff]  }
  0xf9   :  { %3331 = vmatprep.mubr.msk.bf16.mxu0 %vm3617_vm2, %v3615_v0  ;;  %3433 = vmatprep.mubr.msk.bf16.mxu1 %vm3617_vm2, %v3615_v0  ;;  %v3580_v7 = vld [vmem:[%s4800_s0 + $0x28c] sm:$0xff]  }
  0xfa   :  { %v4056_v16 = vmax.f32 %v523_v13, %v1052_v15 }
  0xfb   :  { %v350_v18 = vpop.f32.mrb[16].mxu0  ;;  %v879_v19 = vpop.f32.mrb[16].mxu1 }
  0xfc   :  { %v351_v20 = vadd.f32 %v3972_v60, %v350_v18  ;;  %v880_v21 = vadd.f32 %v3972_v60, %v879_v19  ;;  %v3121_v22 = vpop.f32.mrb[17].mxu0  ;;  %v3223_v23 = vpop.f32.mrb[17].mxu1 }
  0xfd   :  { %v353_v26 = vpop.f32.mrb[18].mxu0  ;;  %v882_v27 = vpop.f32.mrb[18].mxu1 }
  0xfe   :  { %v524_v28 = vmax.f32 %v351_v20, 0.0  ;;  %v1053_v29 = vmax.f32 %v880_v21, 0.0  ;;  %v354_v30 = vadd.f32 %v3972_v60, %v353_v26  ;;  %v883_v31 = vadd.f32 %v3972_v60, %v882_v27  ;;  %v3122_v32 = vpop.f32.mrb[19].mxu0  ;;  %v3224_v33 = vpop.f32.mrb[19].mxu1 }
 0x100   :  { %v4068_v35 = vmax.f32 %v524_v28, %v1053_v29  ;;  %v525_v36 = vmax.f32 %v354_v30, 0.0  ;;  %v1054_v38 = vmax.f32 %v883_v31, 0.0  ;;  %3332 = vmatmul.mubr.msk.bf16.gmra.mrb[124].mxu0 %vm201_vm3, %v3575_v24  ;;  %3434 = vmatmul.mubr.msk.bf16.gmra.mrb[124].mxu1 %vm201_vm3, %v3576_v25  ;;  %v3581_v30 = vld [vmem:[%s4800_s0 + $0x1d0] sm:$0xff]  }
 0x101   :  { %3335 = vmatprep.mubr.msk.bf16.mxu0 %vm3617_vm2, %v3615_v0  ;;  %3437 = vmatprep.mubr.msk.bf16.mxu1 %vm3617_vm2, %v3615_v0  ;;  %v3582_v31 = vld [vmem:[%s4800_s0 + $0x294] sm:$0xff]  }
 0x102   :  { %v4076_v39 = vmax.f32 %v525_v36, %v1054_v38 }
 0x103   :  { %v358_v40 = vpop.f32.mrb[20].mxu0  ;;  %v887_v41 = vpop.f32.mrb[20].mxu1 }
 0x104   :  { %v359_v42 = vadd.f32 %v3972_v60, %v358_v40  ;;  %v888_v43 = vadd.f32 %v3972_v60, %v887_v41  ;;  %v3125_v44 = vpop.f32.mrb[21].mxu0  ;;  %v3227_v45 = vpop.f32.mrb[21].mxu1 }
 0x105   :  { %v361_v48 = vpop.f32.mrb[22].mxu0  ;;  %v890_v49 = vpop.f32.mrb[22].mxu1 }
 0x106   :  { %v526_v50 = vmax.f32 %v359_v42, 0.0  ;;  %v1055_v51 = vmax.f32 %v888_v43, 0.0  ;;  %v362_v52 = vadd.f32 %v3972_v60, %v361_v48  ;;  %v891_v53 = vadd.f32 %v3972_v60, %v890_v49  ;;  %v3126_v55 = vpop.f32.mrb[23].mxu0  ;;  %v3228_v56 = vpop.f32.mrb[23].mxu1 }
 0x107   :  { %v3583_v55 = vld [vmem:[%s4800_s0 + $0x1d8] sm:$0xff]  }
 0x108   :  { %v4088_v58 = vmax.f32 %v526_v50, %v1055_v51  ;;  %v527_v59 = vmax.f32 %v362_v52, 0.0  ;;  %v1056_v61 = vmax.f32 %v891_v53, 0.0  ;;  %3336 = vmatmul.mubr.msk.bf16.gmra.mrb[128].mxu0 %vm201_vm3, %v3577_v46  ;;  %3438 = vmatmul.mubr.msk.bf16.gmra.mrb[128].mxu1 %vm201_vm3, %v3578_v47  ;;  %v3584_v56 = vld [vmem:[%s4800_s0 + $0x29c] sm:$0xff]  }
 0x109   :  { %3339 = vmatprep.mubr.msk.bf16.mxu0 %vm3617_vm2, %v3615_v0  ;;  %3441 = vmatprep.mubr.msk.bf16.mxu1 %vm3617_vm2, %v3615_v0 }
 0x10a   :  { %v4096_v62 = vmax.f32 %v527_v59, %v1056_v61 }
 0x10b   :  { %v366_v63 = vpop.f32.mrb[24].mxu0  ;;  %v895_v1 = vpop.f32.mrb[24].mxu1 }
 0x10c   :  { %v367_v2 = vadd.f32 %v3972_v60, %v366_v63  ;;  %v896_v3 = vadd.f32 %v3972_v60, %v895_v1  ;;  %v3129_v4 = vpop.f32.mrb[25].mxu0  ;;  %v3231_v5 = vpop.f32.mrb[25].mxu1 }
 0x10d   :  { %v369_v8 = vpop.f32.mrb[26].mxu0  ;;  %v898_v9 = vpop.f32.mrb[26].mxu1 }
 0x10e   :  { %v528_v10 = vmax.f32 %v367_v2, 0.0  ;;  %v1057_v11 = vmax.f32 %v896_v3, 0.0  ;;  %v370_v13 = vadd.f32 %v3972_v60, %v369_v8  ;;  %v899_v15 = vadd.f32 %v3972_v60, %v898_v9  ;;  %v3130_v18 = vpop.f32.mrb[27].mxu0  ;;  %v3232_v19 = vpop.f32.mrb[27].mxu1 }
 0x110   :  { %v4108_v20 = vmax.f32 %v528_v10, %v1057_v11  ;;  %v529_v21 = vmax.f32 %v370_v13, 0.0  ;;  %v1058_v22 = vmax.f32 %v899_v15, 0.0  ;;  %3340 = vmatmul.mubr.msk.bf16.gmra.mrb[132].mxu0 %vm201_vm3, %v3579_v6  ;;  %3442 = vmatmul.mubr.msk.bf16.gmra.mrb[132].mxu1 %vm201_vm3, %v3580_v7 }
 0x111   :  { %3343 = vmatprep.mubr.msk.bf16.mxu0 %vm3617_vm2, %v3615_v0  ;;  %3445 = vmatprep.mubr.msk.bf16.mxu1 %vm3617_vm2, %v3615_v0 }
 0x112   :  { %v4116_v23 = vmax.f32 %v529_v21, %v1058_v22  ;;  %v3585_v21 = vld [vmem:[%s4800_s0 + $0x1e0] sm:$0xff]  }
 0x113   :  { %v374_v24 = vpop.f32.mrb[28].mxu0  ;;  %v903_v25 = vpop.f32.mrb[28].mxu1  ;;  %v3586_v22 = vld [vmem:[%s4800_s0 + $0x2a4] sm:$0xff]  }
 0x114   :  { %v375_v26 = vadd.f32 %v3972_v60, %v374_v24  ;;  %v904_v27 = vadd.f32 %v3972_v60, %v903_v25  ;;  %v3133_v28 = vpop.f32.mrb[29].mxu0  ;;  %v3235_v29 = vpop.f32.mrb[29].mxu1 }
 0x115   :  { %v377_v32 = vpop.f32.mrb[30].mxu0  ;;  %v906_v33 = vpop.f32.mrb[30].mxu1 }
 0x116   :  { %v530_v36 = vmax.f32 %v375_v26, 0.0  ;;  %v1059_v38 = vmax.f32 %v904_v27, 0.0  ;;  %v378_v40 = vadd.f32 %v3972_v60, %v377_v32  ;;  %v907_v41 = vadd.f32 %v3972_v60, %v906_v33  ;;  %v3134_v42 = vpop.f32.mrb[31].mxu0  ;;  %v3236_v43 = vpop.f32.mrb[31].mxu1 }
 0x118   :  { %v4128_v44 = vmax.f32 %v530_v36, %v1059_v38  ;;  %v531_v45 = vmax.f32 %v378_v40, 0.0  ;;  %v1060_v46 = vmax.f32 %v907_v41, 0.0  ;;  %3344 = vmatmul.mubr.msk.bf16.gmra.mrb[136].mxu0 %vm201_vm3, %v3581_v30  ;;  %3446 = vmatmul.mubr.msk.bf16.gmra.mrb[136].mxu1 %vm201_vm3, %v3582_v31 }
 0x119   :  { %3347 = vmatprep.mubr.msk.bf16.mxu0 %vm3617_vm2, %v3615_v0  ;;  %3449 = vmatprep.mubr.msk.bf16.mxu1 %vm3617_vm2, %v3615_v0 }
 0x11a   :  { %v4136_v47 = vmax.f32 %v531_v45, %v1060_v46 }
 0x11b   :  { %v382_v48 = vpop.f32.mrb[32].mxu0  ;;  %v911_v49 = vpop.f32.mrb[32].mxu1 }
 0x11c   :  { %v383_v50 = vadd.f32 %v3972_v60, %v382_v48  ;;  %v912_v51 = vadd.f32 %v3972_v60, %v911_v49  ;;  %v3137_v52 = vpop.f32.mrb[33].mxu0  ;;  %v3239_v53 = vpop.f32.mrb[33].mxu1  ;;  %v3587_v48 = vld [vmem:[%s4800_s0 + $0x1e8] sm:$0xff]  }
 0x11d   :  { %v385_v59 = vpop.f32.mrb[34].mxu0  ;;  %v914_v61 = vpop.f32.mrb[34].mxu1  ;;  %v3588_v49 = vld [vmem:[%s4800_s0 + $0x2ac] sm:$0xff]  }
 0x11e   :  { %v532_v63 = vmax.f32 %v383_v50, 0.0  ;;  %v1061_v1 = vmax.f32 %v912_v51, 0.0  ;;  %v386_v2 = vadd.f32 %v3972_v60, %v385_v59  ;;  %v915_v3 = vadd.f32 %v3972_v60, %v914_v61  ;;  %v3138_v4 = vpop.f32.mrb[35].mxu0  ;;  %v3240_v5 = vpop.f32.mrb[35].mxu1 }
 0x120   :  { %v4148_v6 = vmax.f32 %v532_v63, %v1061_v1  ;;  %v533_v7 = vmax.f32 %v386_v2, 0.0  ;;  %v1062_v8 = vmax.f32 %v915_v3, 0.0  ;;  %3348 = vmatmul.mubr.msk.bf16.gmra.mrb[140].mxu0 %vm201_vm3, %v3583_v55  ;;  %3450 = vmatmul.mubr.msk.bf16.gmra.mrb[140].mxu1 %vm201_vm3, %v3584_v56 }
 0x121   :  { %3351 = vmatprep.mubr.msk.bf16.mxu0 %vm3617_vm2, %v3615_v0  ;;  %3453 = vmatprep.mubr.msk.bf16.mxu1 %vm3617_vm2, %v3615_v0 }
 0x122   :  { %v4156_v9 = vmax.f32 %v533_v7, %v1062_v8 }
 0x123   :  { %v390_v10 = vpop.f32.mrb[36].mxu0  ;;  %v919_v11 = vpop.f32.mrb[36].mxu1 }
 0x124   :  { %v391_v13 = vadd.f32 %v3972_v60, %v390_v10  ;;  %v920_v15 = vadd.f32 %v3972_v60, %v919_v11  ;;  %v3141_v18 = vpop.f32.mrb[37].mxu0  ;;  %v3243_v19 = vpop.f32.mrb[37].mxu1 }
 0x125   :  { %v393_v24 = vpop.f32.mrb[38].mxu0  ;;  %v922_v25 = vpop.f32.mrb[38].mxu1 }
 0x126   :  { %v534_v26 = vmax.f32 %v391_v13, 0.0  ;;  %v1063_v27 = vmax.f32 %v920_v15, 0.0  ;;  %v394_v28 = vadd.f32 %v3972_v60, %v393_v24  ;;  %v923_v29 = vadd.f32 %v3972_v60, %v922_v25  ;;  %v3142_v30 = vpop.f32.mrb[39].mxu0  ;;  %v3244_v31 = vpop.f32.mrb[39].mxu1  ;;  %v3589_v13 = vld [vmem:[%s4800_s0 + $0x1f0] sm:$0xff]  }
 0x127   :  { %v3590_v15 = vld [vmem:[%s4800_s0 + $0x2b4] sm:$0xff]  }
 0x128   :  { %v4168_v32 = vmax.f32 %v534_v26, %v1063_v27  ;;  %v535_v33 = vmax.f32 %v394_v28, 0.0  ;;  %v1064_v36 = vmax.f32 %v923_v29, 0.0  ;;  %3352 = vmatmul.mubr.msk.bf16.gmra.mrb[144].mxu0 %vm201_vm3, %v3585_v21  ;;  %3454 = vmatmul.mubr.msk.bf16.gmra.mrb[144].mxu1 %vm201_vm3, %v3586_v22 }
 0x129   :  { %3355 = vmatprep.mubr.msk.bf16.mxu0 %vm3617_vm2, %v3615_v0  ;;  %3457 = vmatprep.mubr.msk.bf16.mxu1 %vm3617_vm2, %v3615_v0 }
 0x12a   :  { %v4176_v38 = vmax.f32 %v535_v33, %v1064_v36 }
 0x12b   :  { %v398_v40 = vpop.f32.mrb[40].mxu0  ;;  %v927_v41 = vpop.f32.mrb[40].mxu1 }
 0x12c   :  { %v399_v42 = vadd.f32 %v3972_v60, %v398_v40  ;;  %v928_v43 = vadd.f32 %v3972_v60, %v927_v41  ;;  %v3145_v45 = vpop.f32.mrb[41].mxu0  ;;  %v3247_v46 = vpop.f32.mrb[41].mxu1 }
 0x12d   :  { %v401_v50 = vpop.f32.mrb[42].mxu0  ;;  %v930_v51 = vpop.f32.mrb[42].mxu1  ;;  %v3591_v45 = vld [vmem:[%s4800_s0 + $0x1f8] sm:$0xff]  }
 0x12e   :  { %v536_v52 = vmax.f32 %v399_v42, 0.0  ;;  %v1065_v53 = vmax.f32 %v928_v43, 0.0  ;;  %v402_v55 = vadd.f32 %v3972_v60, %v401_v50  ;;  %v931_v56 = vadd.f32 %v3972_v60, %v930_v51  ;;  %v3146_v59 = vpop.f32.mrb[43].mxu0  ;;  %v3248_v61 = vpop.f32.mrb[43].mxu1  ;;  %v3592_v46 = vld [vmem:[%s4800_s0 + $0x2bc] sm:$0xff]  }
 0x130   :  { %v4188_v63 = vmax.f32 %v536_v52, %v1065_v53  ;;  %v537_v1 = vmax.f32 %v402_v55, 0.0  ;;  %v1066_v2 = vmax.f32 %v931_v56, 0.0  ;;  %3356 = vmatmul.mubr.msk.bf16.gmra.mrb[148].mxu0 %vm201_vm3, %v3587_v48  ;;  %3458 = vmatmul.mubr.msk.bf16.gmra.mrb[148].mxu1 %vm201_vm3, %v3588_v49 }
 0x131   :  { %3359 = vmatprep.mubr.msk.bf16.mxu0 %vm3617_vm2, %v3615_v0  ;;  %3461 = vmatprep.mubr.msk.bf16.mxu1 %vm3617_vm2, %v3615_v0 }
 0x132   :  { %v4196_v3 = vmax.f32 %v537_v1, %v1066_v2 }
 0x133   :  { %v406_v4 = vpop.f32.mrb[44].mxu0  ;;  %v935_v5 = vpop.f32.mrb[44].mxu1 }
 0x134   :  { %v407_v7 = vadd.f32 %v3972_v60, %v406_v4  ;;  %v936_v8 = vadd.f32 %v3972_v60, %v935_v5  ;;  %v3149_v10 = vpop.f32.mrb[45].mxu0  ;;  %v3251_v11 = vpop.f32.mrb[45].mxu1 }
 0x135   :  { %v409_v18 = vpop.f32.mrb[46].mxu0  ;;  %v938_v19 = vpop.f32.mrb[46].mxu1 }
 0x136   :  { %v538_v21 = vmax.f32 %v407_v7, 0.0  ;;  %v1067_v22 = vmax.f32 %v936_v8, 0.0  ;;  %v410_v24 = vadd.f32 %v3972_v60, %v409_v18  ;;  %v939_v25 = vadd.f32 %v3972_v60, %v938_v19  ;;  %v3150_v26 = vpop.f32.mrb[47].mxu0  ;;  %v3252_v27 = vpop.f32.mrb[47].mxu1 }
 0x138   :  { %v4208_v28 = vmax.f32 %v538_v21, %v1067_v22  ;;  %v539_v29 = vmax.f32 %v410_v24, 0.0  ;;  %v1068_v30 = vmax.f32 %v939_v25, 0.0  ;;  %3360 = vmatmul.mubr.msk.bf16.gmra.mrb[152].mxu0 %vm201_vm3, %v3589_v13  ;;  %3462 = vmatmul.mubr.msk.bf16.gmra.mrb[152].mxu1 %vm201_vm3, %v3590_v15  ;;  %v3593_v13 = vld [vmem:[%s4800_s0 + $0x200] sm:$0xff]  }
 0x139   :  { %3363 = vmatprep.mubr.msk.bf16.mxu0 %vm3617_vm2, %v3615_v0  ;;  %3465 = vmatprep.mubr.msk.bf16.mxu1 %vm3617_vm2, %v3615_v0  ;;  %v3594_v15 = vld [vmem:[%s4800_s0 + $0x2c4] sm:$0xff]  }
 0x13a   :  { %v4216_v31 = vmax.f32 %v539_v29, %v1068_v30 }
 0x13b   :  { %v414_v33 = vpop.f32.mrb[48].mxu0  ;;  %v943_v36 = vpop.f32.mrb[48].mxu1 }
 0x13c   :  { %v415_v40 = vadd.f32 %v3972_v60, %v414_v33  ;;  %v944_v41 = vadd.f32 %v3972_v60, %v943_v36  ;;  %v3153_v42 = vpop.f32.mrb[49].mxu0  ;;  %v3255_v43 = vpop.f32.mrb[49].mxu1 }
 0x13d   :  { %v417_v48 = vpop.f32.mrb[50].mxu0  ;;  %v946_v49 = vpop.f32.mrb[50].mxu1 }
 0x13e   :  { %v540_v50 = vmax.f32 %v415_v40, 0.0  ;;  %v1069_v51 = vmax.f32 %v944_v41, 0.0  ;;  %v418_v52 = vadd.f32 %v3972_v60, %v417_v48  ;;  %v947_v53 = vadd.f32 %v3972_v60, %v946_v49  ;;  %v3154_v55 = vpop.f32.mrb[51].mxu0  ;;  %v3256_v56 = vpop.f32.mrb[51].mxu1  ;;  %v3595_v48 = vld [vmem:[%s4800_s0 + $0x208] sm:$0xff]  }
 0x13f   :  { %v3596_v49 = vld [vmem:[%s4800_s0 + $0x2cc] sm:$0xff]  }
 0x140   :  { %v4228_v59 = vmax.f32 %v540_v50, %v1069_v51  ;;  %v541_v61 = vmax.f32 %v418_v52, 0.0  ;;  %v1070_v1 = vmax.f32 %v947_v53, 0.0  ;;  %3364 = vmatmul.mubr.msk.bf16.gmra.mrb[156].mxu0 %vm201_vm3, %v3591_v45  ;;  %3466 = vmatmul.mubr.msk.bf16.gmra.mrb[156].mxu1 %vm201_vm3, %v3592_v46 }
 0x141   :  { %3367 = vmatprep.mubr.msk.bf16.mxu0 %vm3617_vm2, %v3615_v0  ;;  %3469 = vmatprep.mubr.msk.bf16.mxu1 %vm3617_vm2, %v3615_v0 }
 0x142   :  { %v4236_v2 = vmax.f32 %v541_v61, %v1070_v1 }
 0x143   :  { %v422_v4 = vpop.f32.mrb[52].mxu0  ;;  %v951_v5 = vpop.f32.mrb[52].mxu1 }
 0x144   :  { %v423_v7 = vadd.f32 %v3972_v60, %v422_v4  ;;  %v952_v8 = vadd.f32 %v3972_v60, %v951_v5  ;;  %v3157_v10 = vpop.f32.mrb[53].mxu0  ;;  %v3259_v11 = vpop.f32.mrb[53].mxu1 }
 0x145   :  { %v425_v18 = vpop.f32.mrb[54].mxu0  ;;  %v954_v19 = vpop.f32.mrb[54].mxu1 }
 0x146   :  { %v542_v21 = vmax.f32 %v423_v7, 0.0  ;;  %v1071_v22 = vmax.f32 %v952_v8, 0.0  ;;  %v426_v24 = vadd.f32 %v3972_v60, %v425_v18  ;;  %v955_v25 = vadd.f32 %v3972_v60, %v954_v19  ;;  %v3158_v26 = vpop.f32.mrb[55].mxu0  ;;  %v3260_v27 = vpop.f32.mrb[55].mxu1 }
 0x148   :  { %v4248_v29 = vmax.f32 %v542_v21, %v1071_v22  ;;  %v543_v30 = vmax.f32 %v426_v24, 0.0  ;;  %v1072_v33 = vmax.f32 %v955_v25, 0.0  ;;  %3368 = vmatmul.mubr.msk.bf16.gmra.mrb[160].mxu0 %vm201_vm3, %v3593_v13  ;;  %3470 = vmatmul.mubr.msk.bf16.gmra.mrb[160].mxu1 %vm201_vm3, %v3594_v15  ;;  %v3597_v21 = vld [vmem:[%s4800_s0 + $0x210] sm:$0xff]  }
 0x149   :  { %3371 = vmatprep.mubr.msk.bf16.mxu0 %vm3617_vm2, %v3615_v0  ;;  %3473 = vmatprep.mubr.msk.bf16.mxu1 %vm3617_vm2, %v3615_v0  ;;  %v3598_v22 = vld [vmem:[%s4800_s0 + $0x2d4] sm:$0xff]  }
 0x14a   :  { %v4256_v36 = vmax.f32 %v543_v30, %v1072_v33 }
 0x14b   :  { %v430_v40 = vpop.f32.mrb[56].mxu0  ;;  %v959_v41 = vpop.f32.mrb[56].mxu1 }
 0x14c   :  { %v431_v42 = vadd.f32 %v3972_v60, %v430_v40  ;;  %v960_v43 = vadd.f32 %v3972_v60, %v959_v41  ;;  %v3161_v45 = vpop.f32.mrb[57].mxu0  ;;  %v3263_v46 = vpop.f32.mrb[57].mxu1 }
 0x14d   :  { %v433_v50 = vpop.f32.mrb[58].mxu0  ;;  %v962_v51 = vpop.f32.mrb[58].mxu1 }
 0x14e   :  { %v544_v52 = vmax.f32 %v431_v42, 0.0  ;;  %v1073_v53 = vmax.f32 %v960_v43, 0.0  ;;  %v434_v55 = vadd.f32 %v3972_v60, %v433_v50  ;;  %v963_v56 = vadd.f32 %v3972_v60, %v962_v51  ;;  %v3162_v61 = vpop.f32.mrb[59].mxu0  ;;  %v3264_v1 = vpop.f32.mrb[59].mxu1 }
 0x150   :  { %v4268_v4 = vmax.f32 %v544_v52, %v1073_v53  ;;  %v545_v5 = vmax.f32 %v434_v55, 0.0  ;;  %v1074_v7 = vmax.f32 %v963_v56, 0.0  ;;  %3372 = vmatmul.mubr.msk.bf16.gmra.mrb[164].mxu0 %vm201_vm3, %v3595_v48  ;;  %3474 = vmatmul.mubr.msk.bf16.gmra.mrb[164].mxu1 %vm201_vm3, %v3596_v49  ;;  %v3599_v55 = vld [vmem:[%s4800_s0 + $0x218] sm:$0xff]  }
 0x151   :  { %3375 = vmatprep.mubr.msk.bf16.mxu0 %vm3617_vm2, %v3615_v0  ;;  %3477 = vmatprep.mubr.msk.bf16.mxu1 %vm3617_vm2, %v3615_v0  ;;  %v3600_v56 = vld [vmem:[%s4800_s0 + $0x2dc] sm:$0xff]  }
 0x152   :  { %v4276_v8 = vmax.f32 %v545_v5, %v1074_v7 }
 0x153   :  { %v438_v10 = vpop.f32.mrb[60].mxu0  ;;  %v967_v11 = vpop.f32.mrb[60].mxu1 }
 0x154   :  { %v439_v13 = vadd.f32 %v3972_v60, %v438_v10  ;;  %v968_v15 = vadd.f32 %v3972_v60, %v967_v11  ;;  %v3165_v18 = vpop.f32.mrb[61].mxu0  ;;  %v3267_v19 = vpop.f32.mrb[61].mxu1 }
 0x155   :  { %v441_v24 = vpop.f32.mrb[62].mxu0  ;;  %v970_v25 = vpop.f32.mrb[62].mxu1 }
 0x156   :  { %v546_v26 = vmax.f32 %v439_v13, 0.0  ;;  %v1075_v27 = vmax.f32 %v968_v15, 0.0  ;;  %v442_v30 = vadd.f32 %v3972_v60, %v441_v24  ;;  %v971_v33 = vadd.f32 %v3972_v60, %v970_v25  ;;  %v3166_v40 = vpop.f32.mrb[63].mxu0  ;;  %v3268_v41 = vpop.f32.mrb[63].mxu1 }
 0x157   :  { %v3601_v40 = vld [vmem:[%s4800_s0 + $0x220] sm:$0xff]  }
 0x158   :  { %v4288_v42 = vmax.f32 %v546_v26, %v1075_v27  ;;  %v547_v43 = vmax.f32 %v442_v30, 0.0  ;;  %v1076_v45 = vmax.f32 %v971_v33, 0.0  ;;  %3376 = vmatmul.mubr.msk.bf16.gmra.mrb[168].mxu0 %vm201_vm3, %v3597_v21  ;;  %3478 = vmatmul.mubr.msk.bf16.gmra.mrb[168].mxu1 %vm201_vm3, %v3598_v22  ;;  %v3602_v41 = vld [vmem:[%s4800_s0 + $0x2e4] sm:$0xff]  }
 0x159   :  { %3379 = vmatprep.mubr.msk.bf16.mxu0 %vm3617_vm2, %v3615_v0  ;;  %3481 = vmatprep.mubr.msk.bf16.mxu1 %vm3617_vm2, %v3615_v0 }
 0x15a   :  { %v4296_v46 = vmax.f32 %v547_v43, %v1076_v45 }
 0x15b   :  { %v446_v48 = vpop.f32.mrb[64].mxu0  ;;  %v975_v49 = vpop.f32.mrb[64].mxu1 }
 0x15c   :  { %v447_v50 = vadd.f32 %v3972_v60, %v446_v48  ;;  %v976_v51 = vadd.f32 %v3972_v60, %v975_v49  ;;  %v3169_v52 = vpop.f32.mrb[65].mxu0  ;;  %v3271_v53 = vpop.f32.mrb[65].mxu1 }
 0x15d   :  { %v449_v61 = vpop.f32.mrb[66].mxu0  ;;  %v978_v1 = vpop.f32.mrb[66].mxu1 }
 0x15e   :  { %v548_v5 = vmax.f32 %v447_v50, 0.0  ;;  %v1077_v7 = vmax.f32 %v976_v51, 0.0  ;;  %v450_v10 = vadd.f32 %v3972_v60, %v449_v61  ;;  %v979_v11 = vadd.f32 %v3972_v60, %v978_v1  ;;  %v3170_v13 = vpop.f32.mrb[67].mxu0  ;;  %v3272_v15 = vpop.f32.mrb[67].mxu1 }
 0x160   :  { %v4308_v18 = vmax.f32 %v548_v5, %v1077_v7  ;;  %v549_v19 = vmax.f32 %v450_v10, 0.0  ;;  %v1078_v21 = vmax.f32 %v979_v11, 0.0  ;;  %3380 = vmatmul.mubr.msk.bf16.gmra.mrb[172].mxu0 %vm201_vm3, %v3599_v55  ;;  %3482 = vmatmul.mubr.msk.bf16.gmra.mrb[172].mxu1 %vm201_vm3, %v3600_v56 }
 0x161   :  { %3383 = vmatprep.mubr.msk.bf16.mxu0 %vm3617_vm2, %v3615_v0  ;;  %3485 = vmatprep.mubr.msk.bf16.mxu1 %vm3617_vm2, %v3615_v0 }
 0x162   :  { %v4316_v22 = vmax.f32 %v549_v19, %v1078_v21  ;;  %v3603_v19 = vld [vmem:[%s4800_s0 + $0x228] sm:$0xff]  }
 0x163   :  { %v454_v24 = vpop.f32.mrb[68].mxu0  ;;  %v983_v25 = vpop.f32.mrb[68].mxu1  ;;  %v3604_v21 = vld [vmem:[%s4800_s0 + $0x2ec] sm:$0xff]  }
 0x164   :  { %v455_v26 = vadd.f32 %v3972_v60, %v454_v24  ;;  %v984_v27 = vadd.f32 %v3972_v60, %v983_v25  ;;  %v3173_v30 = vpop.f32.mrb[69].mxu0  ;;  %v3275_v33 = vpop.f32.mrb[69].mxu1 }
 0x165   :  { %v457_v43 = vpop.f32.mrb[70].mxu0  ;;  %v986_v45 = vpop.f32.mrb[70].mxu1 }
 0x166   :  { %v550_v48 = vmax.f32 %v455_v26, 0.0  ;;  %v1079_v49 = vmax.f32 %v984_v27, 0.0  ;;  %v458_v50 = vadd.f32 %v3972_v60, %v457_v43  ;;  %v987_v51 = vadd.f32 %v3972_v60, %v986_v45  ;;  %v3174_v52 = vpop.f32.mrb[71].mxu0  ;;  %v3276_v53 = vpop.f32.mrb[71].mxu1 }
 0x168   :  { %v4328_v55 = vmax.f32 %v550_v48, %v1079_v49  ;;  %v551_v56 = vmax.f32 %v458_v50, 0.0  ;;  %v1080_v61 = vmax.f32 %v987_v51, 0.0  ;;  %3384 = vmatmul.mubr.msk.bf16.gmra.mrb[176].mxu0 %vm201_vm3, %v3601_v40  ;;  %3486 = vmatmul.mubr.msk.bf16.gmra.mrb[176].mxu1 %vm201_vm3, %v3602_v41 }
 0x169   :  { %3387 = vmatprep.mubr.msk.bf16.mxu0 %vm3617_vm2, %v3615_v0  ;;  %3489 = vmatprep.mubr.msk.bf16.mxu1 %vm3617_vm2, %v3615_v0 }
 0x16a   :  { %v4336_v1 = vmax.f32 %v551_v56, %v1080_v61 }
 0x16b   :  { %v462_v5 = vpop.f32.mrb[72].mxu0  ;;  %v991_v7 = vpop.f32.mrb[72].mxu1 }
 0x16c   :  { %v463_v10 = vadd.f32 %v3972_v60, %v462_v5  ;;  %v992_v11 = vadd.f32 %v3972_v60, %v991_v7  ;;  %v3177_v13 = vpop.f32.mrb[73].mxu0  ;;  %v3279_v15 = vpop.f32.mrb[73].mxu1  ;;  %v3605_v5 = vld [vmem:[%s4800_s0 + $0x230] sm:$0xff]  }
 0x16d   :  { %v465_v24 = vpop.f32.mrb[74].mxu0  ;;  %v994_v25 = vpop.f32.mrb[74].mxu1  ;;  %v3606_v7 = vld [vmem:[%s4800_s0 + $0x2f4] sm:$0xff]  }
 0x16e   :  { %v552_v26 = vmax.f32 %v463_v10, 0.0  ;;  %v1081_v27 = vmax.f32 %v992_v11, 0.0  ;;  %v466_v30 = vadd.f32 %v3972_v60, %v465_v24  ;;  %v995_v33 = vadd.f32 %v3972_v60, %v994_v25  ;;  %v3178_v40 = vpop.f32.mrb[75].mxu0  ;;  %v3280_v41 = vpop.f32.mrb[75].mxu1 }
 0x170   :  { %v4348_v43 = vmax.f32 %v552_v26, %v1081_v27  ;;  %v553_v45 = vmax.f32 %v466_v30, 0.0  ;;  %v1082_v48 = vmax.f32 %v995_v33, 0.0  ;;  %3388 = vmatmul.mubr.msk.bf16.gmra.mrb[180].mxu0 %vm201_vm3, %v3603_v19  ;;  %3490 = vmatmul.mubr.msk.bf16.gmra.mrb[180].mxu1 %vm201_vm3, %v3604_v21 }
 0x171   :  { %3391 = vmatprep.mubr.msk.bf16.mxu0 %vm3617_vm2, %v3615_v0  ;;  %3493 = vmatprep.mubr.msk.bf16.mxu1 %vm3617_vm2, %v3615_v0 }
 0x172   :  { %v4356_v49 = vmax.f32 %v553_v45, %v1082_v48 }
 0x173   :  { %v470_v50 = vpop.f32.mrb[76].mxu0  ;;  %v999_v51 = vpop.f32.mrb[76].mxu1 }
 0x174   :  { %v471_v52 = vadd.f32 %v3972_v60, %v470_v50  ;;  %v1000_v53 = vadd.f32 %v3972_v60, %v999_v51  ;;  %v3181_v56 = vpop.f32.mrb[77].mxu0  ;;  %v3283_v61 = vpop.f32.mrb[77].mxu1 }
 0x175   :  { %v473_v10 = vpop.f32.mrb[78].mxu0  ;;  %v1002_v11 = vpop.f32.mrb[78].mxu1 }
 0x176   :  { %v554_v13 = vmax.f32 %v471_v52, 0.0  ;;  %v1083_v15 = vmax.f32 %v1000_v53, 0.0  ;;  %v474_v19 = vadd.f32 %v3972_v60, %v473_v10  ;;  %v1003_v21 = vadd.f32 %v3972_v60, %v1002_v11  ;;  %v3182_v24 = vpop.f32.mrb[79].mxu0  ;;  %v3284_v25 = vpop.f32.mrb[79].mxu1  ;;  %v3607_v52 = vld [vmem:[%s4800_s0 + $0x238] sm:$0xff]  }
 0x177   :  { %v3608_v53 = vld [vmem:[%s4800_s0 + $0x2fc] sm:$0xff]  }
 0x178   :  { %v4368_v26 = vmax.f32 %v554_v13, %v1083_v15  ;;  %v555_v27 = vmax.f32 %v474_v19, 0.0  ;;  %v1084_v30 = vmax.f32 %v1003_v21, 0.0  ;;  %3392 = vmatmul.mubr.msk.bf16.gmra.mrb[184].mxu0 %vm201_vm3, %v3605_v5  ;;  %3494 = vmatmul.mubr.msk.bf16.gmra.mrb[184].mxu1 %vm201_vm3, %v3606_v7 }
 0x179   :  { %3395 = vmatprep.mubr.msk.bf16.mxu0 %vm3617_vm2, %v3615_v0  ;;  %3497 = vmatprep.mubr.msk.bf16.mxu1 %vm3617_vm2, %v3615_v0 }
 0x17a   :  { %v4376_v33 = vmax.f32 %v555_v27, %v1084_v30 }
 0x17b   :  { %v478_v40 = vpop.f32.mrb[80].mxu0  ;;  %v1007_v41 = vpop.f32.mrb[80].mxu1 }
 0x17c   :  { %v479_v45 = vadd.f32 %v3972_v60, %v478_v40  ;;  %v1008_v48 = vadd.f32 %v3972_v60, %v1007_v41  ;;  %v3185_v50 = vpop.f32.mrb[81].mxu0  ;;  %v3287_v51 = vpop.f32.mrb[81].mxu1 }
 0x17d   :  { %v481_v56 = vpop.f32.mrb[82].mxu0  ;;  %v1010_v61 = vpop.f32.mrb[82].mxu1  ;;  %v3609_v50 = vld [vmem:[%s4800_s0 + $0x240] sm:$0xff]  }
 0x17e   :  { %v556_v5 = vmax.f32 %v479_v45, 0.0  ;;  %v1085_v7 = vmax.f32 %v1008_v48, 0.0  ;;  %v482_v10 = vadd.f32 %v3972_v60, %v481_v56  ;;  %v1011_v11 = vadd.f32 %v3972_v60, %v1010_v61  ;;  %v3186_v13 = vpop.f32.mrb[83].mxu0  ;;  %v3288_v15 = vpop.f32.mrb[83].mxu1  ;;  %v3610_v51 = vld [vmem:[%s4800_s0 + $0x304] sm:$0xff]  }
 0x180   :  { %v4388_v19 = vmax.f32 %v556_v5, %v1085_v7  ;;  %v557_v21 = vmax.f32 %v482_v10, 0.0  ;;  %v1086_v24 = vmax.f32 %v1011_v11, 0.0  ;;  %3396 = vmatmul.mubr.msk.bf16.gmra.mrb[188].mxu0 %vm201_vm3, %v3607_v52  ;;  %3498 = vmatmul.mubr.msk.bf16.gmra.mrb[188].mxu1 %vm201_vm3, %v3608_v53  ;;  %v4409_v5 = vld [vmem:[%s4801_s2] ss:$0 sm:$0xff] }
 0x181   :  { %3399 = vmatprep.mubr.msk.bf16.mxu0 %vm3617_vm2, %v3615_v0  ;;  %3501 = vmatprep.mubr.msk.bf16.mxu1 %vm3617_vm2, %v3615_v0 }
 0x182   :  { %v4396_v25 = vmax.f32 %v557_v21, %v1086_v24 }
 0x183   :  { %v486_v27 = vpop.f32.mrb[84].mxu0  ;;  %v1015_v30 = vpop.f32.mrb[84].mxu1 }
 0x184   :  { %v487_v40 = vadd.f32 %v3972_v60, %v486_v27  ;;  %v1016_v41 = vadd.f32 %v3972_v60, %v1015_v30  ;;  %v3189_v45 = vpop.f32.mrb[85].mxu0  ;;  %v3291_v48 = vpop.f32.mrb[85].mxu1 }
 0x185   :  { %v489_v52 = vpop.f32.mrb[86].mxu0  ;;  %v1018_v53 = vpop.f32.mrb[86].mxu1 }
 0x186   :  { %v558_v56 = vmax.f32 %v487_v40, 0.0  ;;  %v1087_v61 = vmax.f32 %v1016_v41, 0.0  ;;  %v490_v60 = vadd.f32 %v4409_v5, %v489_v52  ;;  %v1019_v7 = vadd.f32 %v4409_v5, %v1018_v53  ;;  %v3190_v10 = vpop.f32.mrb[87].mxu0  ;;  %v3292_v11 = vpop.f32.mrb[87].mxu1 }
 0x188   :  { %v4413_v13 = vmax.f32 %v558_v56, %v1087_v61  ;;  %v559_v15 = vmax.f32 %v490_v60, 0.0  ;;  %v1088_v21 = vmax.f32 %v1019_v7, 0.0  ;;  %3400 = vmatmul.mubr.msk.bf16.gmra.mrb[192].mxu0 %vm201_vm3, %v3609_v50  ;;  %3502 = vmatmul.mubr.msk.bf16.gmra.mrb[192].mxu1 %vm201_vm3, %v3610_v51  ;;  %v3611_v50 = vld [vmem:[%s4800_s0 + $0x248] ss:$0 sps:$4 sm:$0xff]   ;;  %v3612_v51 = vld [vmem:[%s4800_s0 + $0x30c] ss:$0 sps:$4 sm:$0xff]  }
 0x189   :  { %3403 = vmatprep.mubr.msk.bf16.mxu0 %vm3617_vm2, %v3615_v0  ;;  %3505 = vmatprep.mubr.msk.bf16.mxu1 %vm3617_vm2, %v3615_v0 }
 0x18a   :  { %v4421_v24 = vmax.f32 %v559_v15, %v1088_v21 }
 0x18b   :  { %v494_v27 = vpop.f32.mrb[88].mxu0  ;;  %v1023_v30 = vpop.f32.mrb[88].mxu1 }
 0x18c   :  { %4803 = vst [vmem:[#allocation2_spill] sm:$0xff] %v4421_v24  ;;  %v495_v40 = vadd.f32 %v4409_v5, %v494_v27  ;;  %v1024_v41 = vadd.f32 %v4409_v5, %v1023_v30  ;;  %v3193_v45 = vpop.f32.mrb[89].mxu0  ;;  %v3295_v48 = vpop.f32.mrb[89].mxu1 }
 0x18d   :  { %v497_v52 = vpop.f32.mrb[90].mxu0  ;;  %v1026_v0 = vpop.f32.mrb[90].mxu1 }
 0x18e   :  { %v560_v53 = vmax.f32 %v495_v40, 0.0  ;;  %v1089_v56 = vmax.f32 %v1024_v41, 0.0  ;;  %v498_v61 = vadd.f32 %v4409_v5, %v497_v52  ;;  %v1027_v60 = vadd.f32 %v4409_v5, %v1026_v0  ;;  %v3194_v7 = vpop.f32.mrb[91].mxu0  ;;  %v3296_v10 = vpop.f32.mrb[91].mxu1 }
 0x190   :  { %v4433_v11 = vmax.f32 %v560_v53, %v1089_v56  ;;  %v561_v15 = vmax.f32 %v498_v61, 0.0  ;;  %v1090_v21 = vmax.f32 %v1027_v60, 0.0  ;;  %3404 = vmatmul.mubr.msk.bf16.gmra.mrb[196].mxu0 %vm201_vm3, %v3611_v50  ;;  %3506 = vmatmul.mubr.msk.bf16.gmra.mrb[196].mxu1 %vm201_vm3, %v3612_v51 }
 0x192   :  { %4804 = vst [vmem:[#allocation3_spill] sm:$0xff] %v4433_v11  ;;  %v4437_v27 = vmax.f32 %v561_v15, %v1090_v21 }
 0x193   :  { %v502_v30 = vpop.f32.mrb[92].mxu0  ;;  %v1031_v45 = vpop.f32.mrb[92].mxu1 }
 0x194   :  { %4805 = vst [vmem:[#allocation4_spill] sm:$0xff] %v4437_v27  ;;  %v503_v40 = vadd.f32 %v4409_v5, %v502_v30  ;;  %v1032_v41 = vadd.f32 %v4409_v5, %v1031_v45  ;;  %v3197_v48 = vpop.f32.mrb[93].mxu0  ;;  %v3299_v52 = vpop.f32.mrb[93].mxu1 }
 0x195   :  { %v505_v0 = vpop.f32.mrb[94].mxu0  ;;  %v1034_v7 = vpop.f32.mrb[94].mxu1 }
 0x196   :  { %v562_v53 = vmax.f32 %v503_v40, 0.0  ;;  %v1091_v56 = vmax.f32 %v1032_v41, 0.0  ;;  %v506_v61 = vadd.f32 %v4409_v5, %v505_v0  ;;  %v1035_v50 = vadd.f32 %v4409_v5, %v1034_v7  ;;  %v3198_v60 = vpop.f32.mrb[95].mxu0  ;;  %v3300_v51 = vpop.f32.mrb[95].mxu1 }
 0x198   :  { %v4443_v10 = vmax.f32 %v562_v53, %v1091_v56  ;;  %v563_v15 = vmax.f32 %v506_v61, 0.0  ;;  %v1092_v21 = vmax.f32 %v1035_v50, 0.0 }
 0x19a   :  { %v4445_v27 = vmax.f32 %v563_v15, %v1092_v21 }
 0x19b   :  { %v510_v30 = vpop.f32.mrb[96].mxu0  ;;  %v1039_v45 = vpop.f32.mrb[96].mxu1 }
 0x19c   :  { %4806 = vst [vmem:[#allocation5_spill] sm:$0xff] %v4445_v27  ;;  %v511_v48 = vadd.f32 %v4409_v5, %v510_v30  ;;  %v1040_v52 = vadd.f32 %v4409_v5, %v1039_v45  ;;  %v3201_v40 = vpop.f32.mrb[97].mxu0  ;;  %v3303_v41 = vpop.f32.mrb[97].mxu1 }
 0x19d   :  { %v513_v11 = vpop.f32.mrb[98].mxu0  ;;  %v1042_v0 = vpop.f32.mrb[98].mxu1 }
 0x19e   :  { %v564_v24 = vmax.f32 %v511_v48, 0.0  ;;  %v1093_v7 = vmax.f32 %v1040_v52, 0.0  ;;  %v3202_v60 = vpop.f32.mrb[99].mxu0  ;;  %v3304_v51 = vpop.f32.mrb[99].mxu1 }
 0x1a0   :  { %v4449_v53 = vmax.f32 %v564_v24, %v1093_v7 }
 0x1a2   :  { %4807 = vst [vmem:[#allocation6_spill] sm:$0xff] %v4449_v53 }
 0x1a3   :  { %v1425_v56 = vpop.f32.mrb[100].mxu0  ;;  %v2003_v61 = vpop.f32.mrb[100].mxu1 }
 0x1a4   :  { %v1426_v50 = vadd.f32 %v4409_v5, %v1425_v56  ;;  %v2004_v15 = vadd.f32 %v4409_v5, %v2003_v61  ;;  %v3309_v21 = vpop.f32.mrb[101].mxu0  ;;  %v3411_v30 = vpop.f32.mrb[101].mxu1 }
 0x1a5   :  { %v1428_v27 = vpop.f32.mrb[102].mxu0  ;;  %v2006_v45 = vpop.f32.mrb[102].mxu1 }
 0x1a6   :  { %v1623_v40 = vmax.f32 %v1426_v50, 0.0  ;;  %v2201_v41 = vmax.f32 %v2004_v15, 0.0  ;;  %v1429_v11 = vadd.f32 %v4409_v5, %v1428_v27  ;;  %v2007_v48 = vadd.f32 %v4409_v5, %v2006_v45  ;;  %v3310_v52 = vpop.f32.mrb[103].mxu0  ;;  %v3412_v0 = vpop.f32.mrb[103].mxu1 }
 0x1a8   :  { %v1672_v24 = vmax.f32 %v3988_v14, %v1623_v40  ;;  %v1624_v7 = vmax.f32 %v1429_v11, 0.0  ;;  %v2202_v56 = vmax.f32 %v2007_v48, 0.0 }
 0x1aa   :  { %v2250_v60 = vmax.f32 %v1672_v24, %v2201_v41  ;;  %v1673_v51 = vmax.f32 %v3996_v17, %v1624_v7 }
 0x1ab   :  { %v1433_v61 = vpop.f32.mrb[104].mxu0  ;;  %v2011_v21 = vpop.f32.mrb[104].mxu1 }
 0x1ac   :  { %v2948_v30 = vpack.c.bf16 %v2250_v60, %v2250_v60  ;;  %v2251_v53 = vmax.f32 %v1673_v51, %v2202_v56  ;;  %v1434_v50 = vadd.f32 %v4409_v5, %v1433_v61  ;;  %v2012_v27 = vadd.f32 %v4409_v5, %v2011_v21  ;;  %v3313_v15 = vpop.f32.mrb[105].mxu0  ;;  %v3415_v45 = vpop.f32.mrb[105].mxu1 }
 0x1ad   :  { %v1436_v52 = vpop.f32.mrb[106].mxu0  ;;  %v2014_v0 = vpop.f32.mrb[106].mxu1 }
 0x1ae   :  { %2497 = vst.msk [vmem:[%s4802_s3] sm:$0xf] %vm2496_vm4, %v2948_v30  ;;  %v2949_v14 = vpack.c.bf16 %v2251_v53, %v2251_v53  ;;  %v1625_v17 = vmax.f32 %v1434_v50, 0.0  ;;  %v2203_v40 = vmax.f32 %v2012_v27, 0.0  ;;  %v1437_v41 = vadd.f32 %v4409_v5, %v1436_v52  ;;  %v3314_v11 = vpop.f32.mrb[107].mxu0  ;;  %v3416_v48 = vpop.f32.mrb[107].mxu1 }
 0x1af   :  { %v2015_v24 = vadd.f32 %v4409_v5, %v2014_v0 }
 0x1b0   :  { %2498 = vst.msk [vmem:[%s4802_s3 + $0x4] sm:$0xf] %vm2496_vm4, %v2949_v14  ;;  %v1674_v7 = vmax.f32 %v4008_v34, %v1625_v17  ;;  %v1626_v60 = vmax.f32 %v1437_v41, 0.0 }
 0x1b1   :  { %v2204_v53 = vmax.f32 %v2015_v24, 0.0 }
 0x1b2   :  { %v2252_v51 = vmax.f32 %v1674_v7, %v2203_v40  ;;  %v1675_v56 = vmax.f32 %v4016_v37, %v1626_v60 }
 0x1b3   :  { %v1441_v61 = vpop.f32.mrb[108].mxu0  ;;  %v2019_v21 = vpop.f32.mrb[108].mxu1 }
 0x1b4   :  { %v2950_v30 = vpack.c.bf16 %v2252_v51, %v2252_v51  ;;  %v2253_v50 = vmax.f32 %v1675_v56, %v2204_v53  ;;  %v1442_v27 = vadd.f32 %v4409_v5, %v1441_v61  ;;  %v2020_v15 = vadd.f32 %v4409_v5, %v2019_v21  ;;  %v3317_v45 = vpop.f32.mrb[109].mxu0  ;;  %v3419_v52 = vpop.f32.mrb[109].mxu1 }
 0x1b5   :  { %v1444_v0 = vpop.f32.mrb[110].mxu0  ;;  %v2022_v11 = vpop.f32.mrb[110].mxu1 }
 0x1b6   :  { %2499 = vst.msk [vmem:[%s4802_s3 + $0x8] sm:$0xf] %vm2496_vm4, %v2950_v30  ;;  %v2951_v34 = vpack.c.bf16 %v2253_v50, %v2253_v50  ;;  %v1627_v37 = vmax.f32 %v1442_v27, 0.0  ;;  %v2205_v14 = vmax.f32 %v2020_v15, 0.0  ;;  %v1445_v17 = vadd.f32 %v4409_v5, %v1444_v0  ;;  %v3318_v40 = vpop.f32.mrb[111].mxu0  ;;  %v3420_v41 = vpop.f32.mrb[111].mxu1 }
 0x1b7   :  { %v2023_v48 = vadd.f32 %v4409_v5, %v2022_v11 }
 0x1b8   :  { %2500 = vst.msk [vmem:[%s4802_s3 + $0xc] sm:$0xf] %vm2496_vm4, %v2951_v34  ;;  %v1676_v24 = vmax.f32 %v4028_v54, %v1627_v37  ;;  %v1628_v7 = vmax.f32 %v1445_v17, 0.0 }
 0x1b9   :  { %v2206_v56 = vmax.f32 %v2023_v48, 0.0 }
 0x1ba   :  { %v2254_v60 = vmax.f32 %v1676_v24, %v2205_v14  ;;  %v1677_v51 = vmax.f32 %v4036_v57, %v1628_v7 }
 0x1bb   :  { %v1449_v53 = vpop.f32.mrb[112].mxu0  ;;  %v2027_v61 = vpop.f32.mrb[112].mxu1 }
 0x1bc   :  { %v2952_v21 = vpack.c.bf16 %v2254_v60, %v2254_v60  ;;  %v2255_v30 = vmax.f32 %v1677_v51, %v2206_v56  ;;  %v1450_v50 = vadd.f32 %v4409_v5, %v1449_v53  ;;  %v2028_v27 = vadd.f32 %v4409_v5, %v2027_v61  ;;  %v3321_v15 = vpop.f32.mrb[113].mxu0  ;;  %v3423_v45 = vpop.f32.mrb[113].mxu1 }
 0x1bd   :  { %v1452_v52 = vpop.f32.mrb[114].mxu0  ;;  %v2030_v0 = vpop.f32.mrb[114].mxu1 }
 0x1be   :  { %2501 = vst.msk [vmem:[%s4802_s3 + $0x10] sm:$0xf] %vm2496_vm4, %v2952_v21  ;;  %v2953_v54 = vpack.c.bf16 %v2255_v30, %v2255_v30  ;;  %v1629_v57 = vmax.f32 %v1450_v50, 0.0  ;;  %v2207_v11 = vmax.f32 %v2028_v27, 0.0  ;;  %v1453_v34 = vadd.f32 %v4409_v5, %v1452_v52  ;;  %v3322_v37 = vpop.f32.mrb[115].mxu0  ;;  %v3424_v14 = vpop.f32.mrb[115].mxu1 }
 0x1bf   :  { %v2031_v17 = vadd.f32 %v4409_v5, %v2030_v0 }
 0x1c0   :  { %2502 = vst.msk [vmem:[%s4802_s3 + $0x14] sm:$0xf] %vm2496_vm4, %v2953_v54  ;;  %v1678_v40 = vmax.f32 %v4048_v12, %v1629_v57  ;;  %v1630_v41 = vmax.f32 %v1453_v34, 0.0 }
 0x1c1   :  { %v2208_v7 = vmax.f32 %v2031_v17, 0.0 }
 0x1c2   :  { %v2256_v48 = vmax.f32 %v1678_v40, %v2207_v11  ;;  %v1679_v24 = vmax.f32 %v4056_v16, %v1630_v41 }
 0x1c3   :  { %v1457_v60 = vpop.f32.mrb[116].mxu0  ;;  %v2035_v51 = vpop.f32.mrb[116].mxu1 }
 0x1c4   :  { %v2954_v56 = vpack.c.bf16 %v2256_v48, %v2256_v48  ;;  %v2257_v53 = vmax.f32 %v1679_v24, %v2208_v7  ;;  %v1458_v61 = vadd.f32 %v4409_v5, %v1457_v60  ;;  %v2036_v21 = vadd.f32 %v4409_v5, %v2035_v51  ;;  %v3325_v30 = vpop.f32.mrb[117].mxu0  ;;  %v3427_v50 = vpop.f32.mrb[117].mxu1 }
 0x1c5   :  { %v1460_v27 = vpop.f32.mrb[118].mxu0  ;;  %v2038_v15 = vpop.f32.mrb[118].mxu1 }
 0x1c6   :  { %2503 = vst.msk [vmem:[%s4802_s3 + $0x18] sm:$0xf] %vm2496_vm4, %v2954_v56  ;;  %v2955_v12 = vpack.c.bf16 %v2257_v53, %v2257_v53  ;;  %v1631_v16 = vmax.f32 %v1458_v61, 0.0  ;;  %v2209_v45 = vmax.f32 %v2036_v21, 0.0  ;;  %v1461_v52 = vadd.f32 %v4409_v5, %v1460_v27  ;;  %v3326_v0 = vpop.f32.mrb[119].mxu0  ;;  %v3428_v54 = vpop.f32.mrb[119].mxu1 }
 0x1c7   :  { %v2039_v57 = vadd.f32 %v4409_v5, %v2038_v15 }
 0x1c8   :  { %2504 = vst.msk [vmem:[%s4802_s3 + $0x1c] sm:$0xf] %vm2496_vm4, %v2955_v12  ;;  %v1680_v11 = vmax.f32 %v4068_v35, %v1631_v16  ;;  %v1632_v34 = vmax.f32 %v1461_v52, 0.0 }
 0x1c9   :  { %v2210_v17 = vmax.f32 %v2039_v57, 0.0 }
 0x1ca   :  { %v2258_v37 = vmax.f32 %v1680_v11, %v2209_v45  ;;  %v1681_v14 = vmax.f32 %v4076_v39, %v1632_v34 }
 0x1cb   :  { %v1465_v40 = vpop.f32.mrb[120].mxu0  ;;  %v2043_v41 = vpop.f32.mrb[120].mxu1 }
 0x1cc   :  { %v2956_v48 = vpack.c.bf16 %v2258_v37, %v2258_v37  ;;  %v2259_v24 = vmax.f32 %v1681_v14, %v2210_v17  ;;  %v1466_v7 = vadd.f32 %v4409_v5, %v1465_v40  ;;  %v2044_v60 = vadd.f32 %v4409_v5, %v2043_v41  ;;  %v3329_v51 = vpop.f32.mrb[121].mxu0  ;;  %v3431_v56 = vpop.f32.mrb[121].mxu1 }
 0x1cd   :  { %v1468_v53 = vpop.f32.mrb[122].mxu0  ;;  %v2046_v61 = vpop.f32.mrb[122].mxu1 }
 0x1ce   :  { %2505 = vst.msk [vmem:[%s4802_s3 + $0x20] sm:$0xf] %vm2496_vm4, %v2956_v48  ;;  %v2957_v35 = vpack.c.bf16 %v2259_v24, %v2259_v24  ;;  %v1633_v39 = vmax.f32 %v1466_v7, 0.0  ;;  %v2211_v21 = vmax.f32 %v2044_v60, 0.0  ;;  %v1469_v30 = vadd.f32 %v4409_v5, %v1468_v53  ;;  %v3330_v50 = vpop.f32.mrb[123].mxu0  ;;  %v3432_v27 = vpop.f32.mrb[123].mxu1 }
 0x1cf   :  { %v2047_v15 = vadd.f32 %v4409_v5, %v2046_v61 }
 0x1d0   :  { %2506 = vst.msk [vmem:[%s4802_s3 + $0x24] sm:$0xf] %vm2496_vm4, %v2957_v35  ;;  %v1682_v12 = vmax.f32 %v4088_v58, %v1633_v39  ;;  %v1634_v16 = vmax.f32 %v1469_v30, 0.0 }
 0x1d1   :  { %v2212_v0 = vmax.f32 %v2047_v15, 0.0 }
 0x1d2   :  { %v2260_v45 = vmax.f32 %v1682_v12, %v2211_v21  ;;  %v1683_v52 = vmax.f32 %v4096_v62, %v1634_v16 }
 0x1d3   :  { %v1473_v54 = vpop.f32.mrb[124].mxu0  ;;  %v2051_v57 = vpop.f32.mrb[124].mxu1 }
 0x1d4   :  { %v2958_v11 = vpack.c.bf16 %v2260_v45, %v2260_v45  ;;  %v2261_v34 = vmax.f32 %v1683_v52, %v2212_v0  ;;  %v1474_v37 = vadd.f32 %v4409_v5, %v1473_v54  ;;  %v2052_v14 = vadd.f32 %v4409_v5, %v2051_v57  ;;  %v3333_v17 = vpop.f32.mrb[125].mxu0  ;;  %v3435_v40 = vpop.f32.mrb[125].mxu1 }
 0x1d5   :  { %v1476_v41 = vpop.f32.mrb[126].mxu0  ;;  %v2054_v48 = vpop.f32.mrb[126].mxu1 }
 0x1d6   :  { %2507 = vst.msk [vmem:[%s4802_s3 + $0x28] sm:$0xf] %vm2496_vm4, %v2958_v11  ;;  %v2959_v58 = vpack.c.bf16 %v2261_v34, %v2261_v34  ;;  %v1635_v62 = vmax.f32 %v1474_v37, 0.0  ;;  %v2213_v24 = vmax.f32 %v2052_v14, 0.0  ;;  %v1477_v7 = vadd.f32 %v4409_v5, %v1476_v41  ;;  %v3334_v60 = vpop.f32.mrb[127].mxu0  ;;  %v3436_v51 = vpop.f32.mrb[127].mxu1 }
 0x1d7   :  { %v2055_v56 = vadd.f32 %v4409_v5, %v2054_v48 }
 0x1d8   :  { %2508 = vst.msk [vmem:[%s4802_s3 + $0x2c] sm:$0xf] %vm2496_vm4, %v2959_v58  ;;  %v1684_v53 = vmax.f32 %v4108_v20, %v1635_v62  ;;  %v1636_v61 = vmax.f32 %v1477_v7, 0.0 }
 0x1d9   :  { %v2214_v21 = vmax.f32 %v2055_v56, 0.0 }
 0x1da   :  { %v2262_v35 = vmax.f32 %v1684_v53, %v2213_v24  ;;  %v1685_v39 = vmax.f32 %v4116_v23, %v1636_v61 }
 0x1db   :  { %v1481_v30 = vpop.f32.mrb[128].mxu0  ;;  %v2059_v50 = vpop.f32.mrb[128].mxu1 }
 0x1dc   :  { %v2960_v27 = vpack.c.bf16 %v2262_v35, %v2262_v35  ;;  %v2263_v15 = vmax.f32 %v1685_v39, %v2214_v21  ;;  %v1482_v12 = vadd.f32 %v4409_v5, %v1481_v30  ;;  %v2060_v16 = vadd.f32 %v4409_v5, %v2059_v50  ;;  %v3337_v45 = vpop.f32.mrb[129].mxu0  ;;  %v3439_v52 = vpop.f32.mrb[129].mxu1 }
 0x1dd   :  { %v1484_v0 = vpop.f32.mrb[130].mxu0  ;;  %v2062_v54 = vpop.f32.mrb[130].mxu1 }
 0x1de   :  { %2509 = vst.msk [vmem:[%s4802_s3 + $0x30] sm:$0xf] %vm2496_vm4, %v2960_v27  ;;  %v2961_v20 = vpack.c.bf16 %v2263_v15, %v2263_v15  ;;  %v1637_v23 = vmax.f32 %v1482_v12, 0.0  ;;  %v2215_v57 = vmax.f32 %v2060_v16, 0.0  ;;  %v1485_v11 = vadd.f32 %v4409_v5, %v1484_v0  ;;  %v3338_v34 = vpop.f32.mrb[131].mxu0  ;;  %v3440_v37 = vpop.f32.mrb[131].mxu1 }
 0x1df   :  { %v2063_v14 = vadd.f32 %v4409_v5, %v2062_v54 }
 0x1e0   :  { %2510 = vst.msk [vmem:[%s4802_s3 + $0x34] sm:$0xf] %vm2496_vm4, %v2961_v20  ;;  %v1686_v17 = vmax.f32 %v4128_v44, %v1637_v23  ;;  %v1638_v40 = vmax.f32 %v1485_v11, 0.0 }
 0x1e1   :  { %v2216_v58 = vmax.f32 %v2063_v14, 0.0 }
 0x1e2   :  { %v2264_v41 = vmax.f32 %v1686_v17, %v2215_v57  ;;  %v1687_v48 = vmax.f32 %v4136_v47, %v1638_v40 }
 0x1e3   :  { %v1489_v62 = vpop.f32.mrb[132].mxu0  ;;  %v2067_v24 = vpop.f32.mrb[132].mxu1 }
 0x1e4   :  { %v2962_v7 = vpack.c.bf16 %v2264_v41, %v2264_v41  ;;  %v2265_v60 = vmax.f32 %v1687_v48, %v2216_v58  ;;  %v1490_v51 = vadd.f32 %v4409_v5, %v1489_v62  ;;  %v2068_v56 = vadd.f32 %v4409_v5, %v2067_v24  ;;  %v3341_v53 = vpop.f32.mrb[133].mxu0  ;;  %v3443_v61 = vpop.f32.mrb[133].mxu1 }
 0x1e5   :  { %v1492_v35 = vpop.f32.mrb[134].mxu0  ;;  %v2070_v39 = vpop.f32.mrb[134].mxu1 }
 0x1e6   :  { %2511 = vst.msk [vmem:[%s4802_s3 + $0x38] sm:$0xf] %vm2496_vm4, %v2962_v7  ;;  %v2963_v44 = vpack.c.bf16 %v2265_v60, %v2265_v60  ;;  %v1639_v47 = vmax.f32 %v1490_v51, 0.0  ;;  %v2217_v21 = vmax.f32 %v2068_v56, 0.0  ;;  %v1493_v30 = vadd.f32 %v4409_v5, %v1492_v35  ;;  %v3342_v50 = vpop.f32.mrb[135].mxu0  ;;  %v3444_v27 = vpop.f32.mrb[135].mxu1 }
 0x1e7   :  { %v2071_v15 = vadd.f32 %v4409_v5, %v2070_v39 }
 0x1e8   :  { %2512 = vst.msk [vmem:[%s4802_s3 + $0x3c] sm:$0xf] %vm2496_vm4, %v2963_v44  ;;  %v1688_v12 = vmax.f32 %v4148_v6, %v1639_v47  ;;  %v1640_v16 = vmax.f32 %v1493_v30, 0.0 }
 0x1e9   :  { %v2218_v0 = vmax.f32 %v2071_v15, 0.0 }
 0x1ea   :  { %v2266_v45 = vmax.f32 %v1688_v12, %v2217_v21  ;;  %v1689_v52 = vmax.f32 %v4156_v9, %v1640_v16 }
 0x1eb   :  { %v1497_v54 = vpop.f32.mrb[136].mxu0  ;;  %v2075_v20 = vpop.f32.mrb[136].mxu1 }
 0x1ec   :  { %v2964_v23 = vpack.c.bf16 %v2266_v45, %v2266_v45  ;;  %v2267_v57 = vmax.f32 %v1689_v52, %v2218_v0  ;;  %v1498_v11 = vadd.f32 %v4409_v5, %v1497_v54  ;;  %v2076_v34 = vadd.f32 %v4409_v5, %v2075_v20  ;;  %v3345_v37 = vpop.f32.mrb[137].mxu0  ;;  %v3447_v14 = vpop.f32.mrb[137].mxu1 }
 0x1ed   :  { %v1500_v17 = vpop.f32.mrb[138].mxu0  ;;  %v2078_v40 = vpop.f32.mrb[138].mxu1 }
 0x1ee   :  { %2513 = vst.msk [vmem:[%s4802_s3 + $0x40] sm:$0xf] %vm2496_vm4, %v2964_v23  ;;  %v2965_v6 = vpack.c.bf16 %v2267_v57, %v2267_v57  ;;  %v1641_v9 = vmax.f32 %v1498_v11, 0.0  ;;  %v2219_v41 = vmax.f32 %v2076_v34, 0.0  ;;  %v1501_v48 = vadd.f32 %v4409_v5, %v1500_v17  ;;  %v3346_v58 = vpop.f32.mrb[139].mxu0  ;;  %v3448_v62 = vpop.f32.mrb[139].mxu1 }
 0x1ef   :  { %v2079_v24 = vadd.f32 %v4409_v5, %v2078_v40 }
 0x1f0   :  { %2514 = vst.msk [vmem:[%s4802_s3 + $0x44] sm:$0xf] %vm2496_vm4, %v2965_v6  ;;  %v1690_v7 = vmax.f32 %v4168_v32, %v1641_v9  ;;  %v1642_v60 = vmax.f32 %v1501_v48, 0.0 }
 0x1f1   :  { %v2220_v53 = vmax.f32 %v2079_v24, 0.0 }
 0x1f2   :  { %v2268_v51 = vmax.f32 %v1690_v7, %v2219_v41  ;;  %v1691_v56 = vmax.f32 %v4176_v38, %v1642_v60 }
 0x1f3   :  { %v1505_v61 = vpop.f32.mrb[140].mxu0  ;;  %v2083_v35 = vpop.f32.mrb[140].mxu1 }
 0x1f4   :  { %v2966_v39 = vpack.c.bf16 %v2268_v51, %v2268_v51  ;;  %v2269_v44 = vmax.f32 %v1691_v56, %v2220_v53  ;;  %v1506_v47 = vadd.f32 %v4409_v5, %v1505_v61  ;;  %v2084_v21 = vadd.f32 %v4409_v5, %v2083_v35  ;;  %v3349_v30 = vpop.f32.mrb[141].mxu0  ;;  %v3451_v50 = vpop.f32.mrb[141].mxu1 }
 0x1f5   :  { %v1508_v27 = vpop.f32.mrb[142].mxu0  ;;  %v2086_v15 = vpop.f32.mrb[142].mxu1 }
 0x1f6   :  { %2515 = vst.msk [vmem:[%s4802_s3 + $0x48] sm:$0xf] %vm2496_vm4, %v2966_v39  ;;  %v2967_v32 = vpack.c.bf16 %v2269_v44, %v2269_v44  ;;  %v1643_v38 = vmax.f32 %v1506_v47, 0.0  ;;  %v2221_v12 = vmax.f32 %v2084_v21, 0.0  ;;  %v1509_v16 = vadd.f32 %v4409_v5, %v1508_v27  ;;  %v3350_v45 = vpop.f32.mrb[143].mxu0  ;;  %v3452_v52 = vpop.f32.mrb[143].mxu1 }
 0x1f7   :  { %v2087_v0 = vadd.f32 %v4409_v5, %v2086_v15 }
 0x1f8   :  { %2516 = vst.msk [vmem:[%s4802_s3 + $0x4c] sm:$0xf] %vm2496_vm4, %v2967_v32  ;;  %v1692_v54 = vmax.f32 %v4188_v63, %v1643_v38  ;;  %v1644_v20 = vmax.f32 %v1509_v16, 0.0 }
 0x1f9   :  { %v2222_v11 = vmax.f32 %v2087_v0, 0.0 }
 0x1fa   :  { %v2270_v23 = vmax.f32 %v1692_v54, %v2221_v12  ;;  %v1693_v57 = vmax.f32 %v4196_v3, %v1644_v20 }
 0x1fb   :  { %v1513_v34 = vpop.f32.mrb[144].mxu0  ;;  %v2091_v37 = vpop.f32.mrb[144].mxu1 }
 0x1fc   :  { %v2968_v14 = vpack.c.bf16 %v2270_v23, %v2270_v23  ;;  %v2271_v17 = vmax.f32 %v1693_v57, %v2222_v11  ;;  %v1514_v40 = vadd.f32 %v4409_v5, %v1513_v34  ;;  %v2092_v6 = vadd.f32 %v4409_v5, %v2091_v37  ;;  %v3353_v9 = vpop.f32.mrb[145].mxu0  ;;  %v3455_v41 = vpop.f32.mrb[145].mxu1 }
 0x1fd   :  { %v1516_v48 = vpop.f32.mrb[146].mxu0  ;;  %v2094_v58 = vpop.f32.mrb[146].mxu1 }
 0x1fe   :  { %2517 = vst.msk [vmem:[%s4802_s3 + $0x50] sm:$0xf] %vm2496_vm4, %v2968_v14  ;;  %v2969_v63 = vpack.c.bf16 %v2271_v17, %v2271_v17  ;;  %v1645_v3 = vmax.f32 %v1514_v40, 0.0  ;;  %v2223_v62 = vmax.f32 %v2092_v6, 0.0  ;;  %v1517_v24 = vadd.f32 %v4409_v5, %v1516_v48  ;;  %v3354_v7 = vpop.f32.mrb[147].mxu0  ;;  %v3456_v60 = vpop.f32.mrb[147].mxu1 }
 0x1ff   :  { %v2095_v51 = vadd.f32 %v4409_v5, %v2094_v58 }
 0x200   :  { %2518 = vst.msk [vmem:[%s4802_s3 + $0x54] sm:$0xf] %vm2496_vm4, %v2969_v63  ;;  %v1694_v56 = vmax.f32 %v4208_v28, %v1645_v3  ;;  %v1646_v53 = vmax.f32 %v1517_v24, 0.0 }
 0x201   :  { %v2224_v39 = vmax.f32 %v2095_v51, 0.0 }
 0x202   :  { %v2272_v61 = vmax.f32 %v1694_v56, %v2223_v62  ;;  %v1695_v35 = vmax.f32 %v4216_v31, %v1646_v53 }
 0x203   :  { %v1521_v44 = vpop.f32.mrb[148].mxu0  ;;  %v2099_v47 = vpop.f32.mrb[148].mxu1 }
 0x204   :  { %v2970_v21 = vpack.c.bf16 %v2272_v61, %v2272_v61  ;;  %v2273_v30 = vmax.f32 %v1695_v35, %v2224_v39  ;;  %v1522_v50 = vadd.f32 %v4409_v5, %v1521_v44  ;;  %v2100_v27 = vadd.f32 %v4409_v5, %v2099_v47  ;;  %v3357_v15 = vpop.f32.mrb[149].mxu0  ;;  %v3459_v32 = vpop.f32.mrb[149].mxu1 }
 0x205   :  { %v1524_v38 = vpop.f32.mrb[150].mxu0  ;;  %v2102_v12 = vpop.f32.mrb[150].mxu1 }
 0x206   :  { %2519 = vst.msk [vmem:[%s4802_s3 + $0x58] sm:$0xf] %vm2496_vm4, %v2970_v21  ;;  %v2971_v28 = vpack.c.bf16 %v2273_v30, %v2273_v30  ;;  %v1647_v31 = vmax.f32 %v1522_v50, 0.0  ;;  %v2225_v16 = vmax.f32 %v2100_v27, 0.0  ;;  %v1525_v45 = vadd.f32 %v4409_v5, %v1524_v38  ;;  %v3358_v52 = vpop.f32.mrb[151].mxu0  ;;  %v3460_v0 = vpop.f32.mrb[151].mxu1 }
 0x207   :  { %v2103_v54 = vadd.f32 %v4409_v5, %v2102_v12 }
 0x208   :  { %2520 = vst.msk [vmem:[%s4802_s3 + $0x5c] sm:$0xf] %vm2496_vm4, %v2971_v28  ;;  %v1696_v20 = vmax.f32 %v4228_v59, %v1647_v31  ;;  %v1648_v23 = vmax.f32 %v1525_v45, 0.0 }
 0x209   :  { %v2226_v34 = vmax.f32 %v2103_v54, 0.0 }
 0x20a   :  { %v2274_v57 = vmax.f32 %v1696_v20, %v2225_v16  ;;  %v1697_v11 = vmax.f32 %v4236_v2, %v1648_v23 }
 0x20b   :  { %v1529_v37 = vpop.f32.mrb[152].mxu0  ;;  %v2107_v14 = vpop.f32.mrb[152].mxu1 }
 0x20c   :  { %v2972_v17 = vpack.c.bf16 %v2274_v57, %v2274_v57  ;;  %v2275_v40 = vmax.f32 %v1697_v11, %v2226_v34  ;;  %v1530_v6 = vadd.f32 %v4409_v5, %v1529_v37  ;;  %v2108_v9 = vadd.f32 %v4409_v5, %v2107_v14  ;;  %v3361_v41 = vpop.f32.mrb[153].mxu0  ;;  %v3463_v48 = vpop.f32.mrb[153].mxu1 }
 0x20d   :  { %v1532_v58 = vpop.f32.mrb[154].mxu0  ;;  %v2110_v63 = vpop.f32.mrb[154].mxu1 }
 0x20e   :  { %2521 = vst.msk [vmem:[%s4802_s3 + $0x60] sm:$0xf] %vm2496_vm4, %v2972_v17  ;;  %v2973_v59 = vpack.c.bf16 %v2275_v40, %v2275_v40  ;;  %v1649_v2 = vmax.f32 %v1530_v6, 0.0  ;;  %v2227_v3 = vmax.f32 %v2108_v9, 0.0  ;;  %v1533_v62 = vadd.f32 %v4409_v5, %v1532_v58  ;;  %v3362_v24 = vpop.f32.mrb[155].mxu0  ;;  %v3464_v7 = vpop.f32.mrb[155].mxu1 }
 0x20f   :  { %v2111_v60 = vadd.f32 %v4409_v5, %v2110_v63 }
 0x210   :  { %2522 = vst.msk [vmem:[%s4802_s3 + $0x64] sm:$0xf] %vm2496_vm4, %v2973_v59  ;;  %v1698_v51 = vmax.f32 %v4248_v29, %v1649_v2  ;;  %v1650_v56 = vmax.f32 %v1533_v62, 0.0 }
 0x211   :  { %v2228_v35 = vmax.f32 %v2111_v60, 0.0 }
 0x212   :  { %v2276_v53 = vmax.f32 %v1698_v51, %v2227_v3  ;;  %v1699_v61 = vmax.f32 %v4256_v36, %v1650_v56 }
 0x213   :  { %v1537_v39 = vpop.f32.mrb[156].mxu0  ;;  %v2115_v44 = vpop.f32.mrb[156].mxu1 }
 0x214   :  { %v2974_v47 = vpack.c.bf16 %v2276_v53, %v2276_v53  ;;  %v2277_v21 = vmax.f32 %v1699_v61, %v2228_v35  ;;  %v1538_v30 = vadd.f32 %v4409_v5, %v1537_v39  ;;  %v2116_v50 = vadd.f32 %v4409_v5, %v2115_v44  ;;  %v3365_v27 = vpop.f32.mrb[157].mxu0  ;;  %v3467_v15 = vpop.f32.mrb[157].mxu1 }
 0x215   :  { %v1540_v32 = vpop.f32.mrb[158].mxu0  ;;  %v2118_v38 = vpop.f32.mrb[158].mxu1 }
 0x216   :  { %2523 = vst.msk [vmem:[%s4802_s3 + $0x68] sm:$0xf] %vm2496_vm4, %v2974_v47  ;;  %v2975_v29 = vpack.c.bf16 %v2277_v21, %v2277_v21  ;;  %v1651_v36 = vmax.f32 %v1538_v30, 0.0  ;;  %v2229_v12 = vmax.f32 %v2116_v50, 0.0  ;;  %v1541_v28 = vadd.f32 %v4409_v5, %v1540_v32  ;;  %v3366_v31 = vpop.f32.mrb[159].mxu0  ;;  %v3468_v16 = vpop.f32.mrb[159].mxu1 }
 0x217   :  { %v2119_v45 = vadd.f32 %v4409_v5, %v2118_v38 }
 0x218   :  { %2524 = vst.msk [vmem:[%s4802_s3 + $0x6c] sm:$0xf] %vm2496_vm4, %v2975_v29  ;;  %v1700_v52 = vmax.f32 %v4268_v4, %v1651_v36  ;;  %v1652_v0 = vmax.f32 %v1541_v28, 0.0 }
 0x219   :  { %v2230_v23 = vmax.f32 %v2119_v45, 0.0 }
 0x21a   :  { %v2278_v54 = vmax.f32 %v1700_v52, %v2229_v12  ;;  %v1701_v20 = vmax.f32 %v4276_v8, %v1652_v0 }
 0x21b   :  { %v1545_v57 = vpop.f32.mrb[160].mxu0  ;;  %v2123_v11 = vpop.f32.mrb[160].mxu1 }
 0x21c   :  { %v2976_v34 = vpack.c.bf16 %v2278_v54, %v2278_v54  ;;  %v2279_v37 = vmax.f32 %v1701_v20, %v2230_v23  ;;  %v1546_v14 = vadd.f32 %v4409_v5, %v1545_v57  ;;  %v2124_v17 = vadd.f32 %v4409_v5, %v2123_v11  ;;  %v3369_v40 = vpop.f32.mrb[161].mxu0  ;;  %v3471_v6 = vpop.f32.mrb[161].mxu1 }
 0x21d   :  { %v1548_v9 = vpop.f32.mrb[162].mxu0  ;;  %v2126_v41 = vpop.f32.mrb[162].mxu1 }
 0x21e   :  { %2525 = vst.msk [vmem:[%s4802_s3 + $0x70] sm:$0xf] %vm2496_vm4, %v2976_v34  ;;  %v2977_v4 = vpack.c.bf16 %v2279_v37, %v2279_v37  ;;  %v1653_v8 = vmax.f32 %v1546_v14, 0.0  ;;  %v2231_v48 = vmax.f32 %v2124_v17, 0.0  ;;  %v1549_v58 = vadd.f32 %v4409_v5, %v1548_v9  ;;  %v3370_v63 = vpop.f32.mrb[163].mxu0  ;;  %v3472_v59 = vpop.f32.mrb[163].mxu1 }
 0x21f   :  { %v2127_v2 = vadd.f32 %v4409_v5, %v2126_v41 }
 0x220   :  { %2526 = vst.msk [vmem:[%s4802_s3 + $0x74] sm:$0xf] %vm2496_vm4, %v2977_v4  ;;  %v1702_v3 = vmax.f32 %v4288_v42, %v1653_v8  ;;  %v1654_v62 = vmax.f32 %v1549_v58, 0.0 }
 0x221   :  { %v2232_v60 = vmax.f32 %v2127_v2, 0.0 }
 0x222   :  { %v2280_v24 = vmax.f32 %v1702_v3, %v2231_v48  ;;  %v1703_v7 = vmax.f32 %v4296_v46, %v1654_v62 }
 0x223   :  { %v1553_v51 = vpop.f32.mrb[164].mxu0  ;;  %v2131_v56 = vpop.f32.mrb[164].mxu1 }
 0x224   :  { %v2978_v53 = vpack.c.bf16 %v2280_v24, %v2280_v24  ;;  %v2281_v61 = vmax.f32 %v1703_v7, %v2232_v60  ;;  %v1554_v35 = vadd.f32 %v4409_v5, %v1553_v51  ;;  %v2132_v39 = vadd.f32 %v4409_v5, %v2131_v56  ;;  %v3373_v44 = vpop.f32.mrb[165].mxu0  ;;  %v3475_v47 = vpop.f32.mrb[165].mxu1 }
 0x225   :  { %v1556_v21 = vpop.f32.mrb[166].mxu0  ;;  %v2134_v30 = vpop.f32.mrb[166].mxu1 }
 0x226   :  { %2527 = vst.msk [vmem:[%s4802_s3 + $0x78] sm:$0xf] %vm2496_vm4, %v2978_v53  ;;  %v2979_v42 = vpack.c.bf16 %v2281_v61, %v2281_v61  ;;  %v1655_v46 = vmax.f32 %v1554_v35, 0.0  ;;  %v2233_v50 = vmax.f32 %v2132_v39, 0.0  ;;  %v1557_v27 = vadd.f32 %v4409_v5, %v1556_v21  ;;  %v3374_v15 = vpop.f32.mrb[167].mxu0  ;;  %v3476_v32 = vpop.f32.mrb[167].mxu1 }
 0x227   :  { %v2135_v38 = vadd.f32 %v4409_v5, %v2134_v30 }
 0x228   :  { %2528 = vst.msk [vmem:[%s4802_s3 + $0x7c] sm:$0xf] %vm2496_vm4, %v2979_v42  ;;  %v1704_v29 = vmax.f32 %v4308_v18, %v1655_v46  ;;  %v1656_v36 = vmax.f32 %v1557_v27, 0.0 }
 0x229   :  { %v2234_v31 = vmax.f32 %v2135_v38, 0.0 }
 0x22a   :  { %v2282_v12 = vmax.f32 %v1704_v29, %v2233_v50  ;;  %v1705_v28 = vmax.f32 %v4316_v22, %v1656_v36 }
 0x22b   :  { %v1561_v16 = vpop.f32.mrb[168].mxu0  ;;  %v2139_v45 = vpop.f32.mrb[168].mxu1 }
 0x22c   :  { %v2980_v52 = vpack.c.bf16 %v2282_v12, %v2282_v12  ;;  %v2283_v0 = vmax.f32 %v1705_v28, %v2234_v31  ;;  %v1562_v54 = vadd.f32 %v4409_v5, %v1561_v16  ;;  %v2140_v20 = vadd.f32 %v4409_v5, %v2139_v45  ;;  %v3377_v23 = vpop.f32.mrb[169].mxu0  ;;  %v3479_v57 = vpop.f32.mrb[169].mxu1 }
 0x22d   :  { %v1564_v11 = vpop.f32.mrb[170].mxu0  ;;  %v2142_v34 = vpop.f32.mrb[170].mxu1 }
 0x22e   :  { %2529 = vst.msk [vmem:[%s4802_s3 + $0x80] sm:$0xf] %vm2496_vm4, %v2980_v52  ;;  %v2981_v18 = vpack.c.bf16 %v2283_v0, %v2283_v0  ;;  %v1657_v22 = vmax.f32 %v1562_v54, 0.0  ;;  %v2235_v37 = vmax.f32 %v2140_v20, 0.0  ;;  %v1565_v14 = vadd.f32 %v4409_v5, %v1564_v11  ;;  %v3378_v17 = vpop.f32.mrb[171].mxu0  ;;  %v3480_v40 = vpop.f32.mrb[171].mxu1 }
 0x22f   :  { %v2143_v6 = vadd.f32 %v4409_v5, %v2142_v34 }
 0x230   :  { %2530 = vst.msk [vmem:[%s4802_s3 + $0x84] sm:$0xf] %vm2496_vm4, %v2981_v18  ;;  %v1706_v9 = vmax.f32 %v4328_v55, %v1657_v22  ;;  %v1658_v41 = vmax.f32 %v1565_v14, 0.0 }
 0x231   :  { %v2236_v48 = vmax.f32 %v2143_v6, 0.0 }
 0x232   :  { %v2284_v4 = vmax.f32 %v1706_v9, %v2235_v37  ;;  %v1707_v8 = vmax.f32 %v4336_v1, %v1658_v41 }
 0x233   :  { %v1569_v58 = vpop.f32.mrb[172].mxu0  ;;  %v2147_v63 = vpop.f32.mrb[172].mxu1 }
 0x234   :  { %v2982_v59 = vpack.c.bf16 %v2284_v4, %v2284_v4  ;;  %v2285_v2 = vmax.f32 %v1707_v8, %v2236_v48  ;;  %v1570_v3 = vadd.f32 %v4409_v5, %v1569_v58  ;;  %v2148_v62 = vadd.f32 %v4409_v5, %v2147_v63  ;;  %v3381_v24 = vpop.f32.mrb[173].mxu0  ;;  %v3483_v7 = vpop.f32.mrb[173].mxu1 }
 0x235   :  { %v1572_v60 = vpop.f32.mrb[174].mxu0  ;;  %v2150_v51 = vpop.f32.mrb[174].mxu1 }
 0x236   :  { %2531 = vst.msk [vmem:[%s4802_s3 + $0x88] sm:$0xf] %vm2496_vm4, %v2982_v59  ;;  %v2983_v55 = vpack.c.bf16 %v2285_v2, %v2285_v2  ;;  %v1659_v1 = vmax.f32 %v1570_v3, 0.0  ;;  %v2237_v56 = vmax.f32 %v2148_v62, 0.0  ;;  %v1573_v53 = vadd.f32 %v4409_v5, %v1572_v60  ;;  %v3382_v61 = vpop.f32.mrb[175].mxu0  ;;  %v3484_v35 = vpop.f32.mrb[175].mxu1 }
 0x237   :  { %v2151_v39 = vadd.f32 %v4409_v5, %v2150_v51  ;;  %v4712_v5 = vld [vmem:[%s4801_s2] ss:$0 sm:$0xff] }
 0x238   :  { %2532 = vst.msk [vmem:[%s4802_s3 + $0x8c] sm:$0xf] %vm2496_vm4, %v2983_v55  ;;  %v1708_v44 = vmax.f32 %v4348_v43, %v1659_v1  ;;  %v1660_v47 = vmax.f32 %v1573_v53, 0.0 }
 0x239   :  { %v2238_v42 = vmax.f32 %v2151_v39, 0.0 }
 0x23a   :  { %v2286_v21 = vmax.f32 %v1708_v44, %v2237_v56  ;;  %v1709_v30 = vmax.f32 %v4356_v49, %v1660_v47 }
 0x23b   :  { %v1577_v46 = vpop.f32.mrb[176].mxu0  ;;  %v2155_v50 = vpop.f32.mrb[176].mxu1 }
 0x23c   :  { %v2984_v27 = vpack.c.bf16 %v2286_v21, %v2286_v21  ;;  %v2287_v15 = vmax.f32 %v1709_v30, %v2238_v42  ;;  %v1578_v32 = vadd.f32 %v4712_v5, %v1577_v46  ;;  %v2156_v38 = vadd.f32 %v4712_v5, %v2155_v50  ;;  %v3385_v29 = vpop.f32.mrb[177].mxu0  ;;  %v3487_v43 = vpop.f32.mrb[177].mxu1 }
 0x23d   :  { %v1580_v36 = vpop.f32.mrb[178].mxu0  ;;  %v2158_v12 = vpop.f32.mrb[178].mxu1 }
 0x23e   :  { %2533 = vst.msk [vmem:[%s4802_s3 + $0x90] sm:$0xf] %vm2496_vm4, %v2984_v27  ;;  %v2985_v49 = vpack.c.bf16 %v2287_v15, %v2287_v15  ;;  %v1661_v28 = vmax.f32 %v1578_v32, 0.0  ;;  %v2239_v31 = vmax.f32 %v2156_v38, 0.0  ;;  %v1581_v16 = vadd.f32 %v4712_v5, %v1580_v36  ;;  %v3386_v45 = vpop.f32.mrb[179].mxu0  ;;  %v3488_v52 = vpop.f32.mrb[179].mxu1 }
 0x23f   :  { %v2159_v0 = vadd.f32 %v4712_v5, %v2158_v12  ;;  %v4808_v15 = vld [vmem:[#allocation2_spill] sm:$0xff] }
 0x240   :  { %2534 = vst.msk [vmem:[%s4802_s3 + $0x94] sm:$0xf] %vm2496_vm4, %v2985_v49  ;;  %v1710_v54 = vmax.f32 %v4368_v26, %v1661_v28  ;;  %v1662_v20 = vmax.f32 %v1581_v16, 0.0 }
 0x241   :  { %v2240_v11 = vmax.f32 %v2159_v0, 0.0 }
 0x242   :  { %v2288_v23 = vmax.f32 %v1710_v54, %v2239_v31  ;;  %v1711_v57 = vmax.f32 %v4376_v33, %v1662_v20 }
 0x243   :  { %v1585_v34 = vpop.f32.mrb[180].mxu0  ;;  %v2163_v18 = vpop.f32.mrb[180].mxu1 }
 0x244   :  { %v2986_v22 = vpack.c.bf16 %v2288_v23, %v2288_v23  ;;  %v2289_v37 = vmax.f32 %v1711_v57, %v2240_v11  ;;  %v1586_v14 = vadd.f32 %v4712_v5, %v1585_v34  ;;  %v2164_v17 = vadd.f32 %v4712_v5, %v2163_v18  ;;  %v3389_v40 = vpop.f32.mrb[181].mxu0  ;;  %v3491_v6 = vpop.f32.mrb[181].mxu1  ;;  %v4809_v34 = vld [vmem:[#allocation3_spill] sm:$0xff] }
 0x245   :  { %v1588_v9 = vpop.f32.mrb[182].mxu0  ;;  %v2166_v41 = vpop.f32.mrb[182].mxu1 }
 0x246   :  { %2535 = vst.msk [vmem:[%s4802_s3 + $0x98] sm:$0xf] %vm2496_vm4, %v2986_v22  ;;  %v2987_v26 = vpack.c.bf16 %v2289_v37, %v2289_v37  ;;  %v1663_v33 = vmax.f32 %v1586_v14, 0.0  ;;  %v2241_v4 = vmax.f32 %v2164_v17, 0.0  ;;  %v1589_v8 = vadd.f32 %v4712_v5, %v1588_v9  ;;  %v3390_v48 = vpop.f32.mrb[183].mxu0  ;;  %v3492_v58 = vpop.f32.mrb[183].mxu1 }
 0x247   :  { %v2167_v63 = vadd.f32 %v4712_v5, %v2166_v41  ;;  %v4810_v14 = vld [vmem:[#allocation4_spill] sm:$0xff] }
 0x248   :  { %2536 = vst.msk [vmem:[%s4802_s3 + $0x9c] sm:$0xf] %vm2496_vm4, %v2987_v26  ;;  %v1712_v59 = vmax.f32 %v4388_v19, %v1663_v33  ;;  %v1664_v2 = vmax.f32 %v1589_v8, 0.0 }
 0x249   :  { %v2242_v24 = vmax.f32 %v2167_v63, 0.0 }
 0x24a   :  { %v2290_v3 = vmax.f32 %v1712_v59, %v2241_v4  ;;  %v1713_v62 = vmax.f32 %v4396_v25, %v1664_v2 }
 0x24b   :  { %v1593_v7 = vpop.f32.mrb[184].mxu0  ;;  %v2171_v60 = vpop.f32.mrb[184].mxu1 }
 0x24c   :  { %v2988_v51 = vpack.c.bf16 %v2290_v3, %v2290_v3  ;;  %v2291_v55 = vmax.f32 %v1713_v62, %v2242_v24  ;;  %v1594_v1 = vadd.f32 %v4712_v5, %v1593_v7  ;;  %v2172_v56 = vadd.f32 %v4712_v5, %v2171_v60  ;;  %v3393_v53 = vpop.f32.mrb[185].mxu0  ;;  %v3495_v61 = vpop.f32.mrb[185].mxu1 }
 0x24d   :  { %v1596_v35 = vpop.f32.mrb[186].mxu0  ;;  %v2174_v39 = vpop.f32.mrb[186].mxu1 }
 0x24e   :  { %2537 = vst.msk [vmem:[%s4802_s3 + $0xa0] sm:$0xf] %vm2496_vm4, %v2988_v51  ;;  %v2989_v19 = vpack.c.bf16 %v2291_v55, %v2291_v55  ;;  %v1665_v25 = vmax.f32 %v1594_v1, 0.0  ;;  %v2243_v44 = vmax.f32 %v2172_v56, 0.0  ;;  %v1597_v47 = vadd.f32 %v4712_v5, %v1596_v35  ;;  %v3394_v21 = vpop.f32.mrb[187].mxu0  ;;  %v3496_v30 = vpop.f32.mrb[187].mxu1 }
 0x24f   :  { %v2175_v42 = vadd.f32 %v4712_v5, %v2174_v39  ;;  %v4811_v56 = vld [vmem:[#allocation5_spill] sm:$0xff] }
 0x250   :  { %2538 = vst.msk [vmem:[%s4802_s3 + $0xa4] sm:$0xf] %vm2496_vm4, %v2989_v19  ;;  %v1714_v46 = vmax.f32 %v4413_v13, %v1665_v25  ;;  %v1666_v50 = vmax.f32 %v1597_v47, 0.0 }
 0x251   :  { %v2244_v38 = vmax.f32 %v2175_v42, 0.0 }
 0x252   :  { %v2292_v27 = vmax.f32 %v1714_v46, %v2243_v44  ;;  %v1715_v32 = vmax.f32 %v4808_v15, %v1666_v50 }
 0x253   :  { %v1601_v29 = vpop.f32.mrb[188].mxu0  ;;  %v2179_v43 = vpop.f32.mrb[188].mxu1 }
 0x254   :  { %v2990_v36 = vpack.c.bf16 %v2292_v27, %v2292_v27  ;;  %v2293_v12 = vmax.f32 %v1715_v32, %v2244_v38  ;;  %v1602_v49 = vadd.f32 %v4712_v5, %v1601_v29  ;;  %v2180_v28 = vadd.f32 %v4712_v5, %v2179_v43  ;;  %v3397_v31 = vpop.f32.mrb[189].mxu0  ;;  %v3499_v16 = vpop.f32.mrb[189].mxu1 }
 0x255   :  { %v1604_v45 = vpop.f32.mrb[190].mxu0  ;;  %v2182_v52 = vpop.f32.mrb[190].mxu1 }
 0x256   :  { %2539 = vst.msk [vmem:[%s4802_s3 + $0xa8] sm:$0xf] %vm2496_vm4, %v2990_v36  ;;  %v2991_v13 = vpack.c.bf16 %v2293_v12, %v2293_v12  ;;  %v1667_v0 = vmax.f32 %v1602_v49, 0.0  ;;  %v2245_v54 = vmax.f32 %v2180_v28, 0.0  ;;  %v1605_v20 = vadd.f32 %v4712_v5, %v1604_v45  ;;  %v3398_v23 = vpop.f32.mrb[191].mxu0  ;;  %v3500_v57 = vpop.f32.mrb[191].mxu1 }
 0x257   :  { %v2183_v11 = vadd.f32 %v4712_v5, %v2182_v52 }
 0x258   :  { %2540 = vst.msk [vmem:[%s4802_s3 + $0xac] sm:$0xf] %vm2496_vm4, %v2991_v13  ;;  %v1716_v18 = vmax.f32 %v4809_v34, %v1667_v0  ;;  %v1668_v22 = vmax.f32 %v1605_v20, 0.0 }
 0x259   :  { %v2246_v40 = vmax.f32 %v2183_v11, 0.0 }
 0x25a   :  { %v2294_v37 = vmax.f32 %v1716_v18, %v2245_v54  ;;  %v1717_v17 = vmax.f32 %v4810_v14, %v1668_v22 }
 0x25b   :  { %v1609_v6 = vpop.f32.mrb[192].mxu0  ;;  %v2187_v9 = vpop.f32.mrb[192].mxu1 }
 0x25c   :  { %v2992_v41 = vpack.c.bf16 %v2294_v37, %v2294_v37  ;;  %v2295_v26 = vmax.f32 %v1717_v17, %v2246_v40  ;;  %v1610_v33 = vadd.f32 %v4712_v5, %v1609_v6  ;;  %v2188_v4 = vadd.f32 %v4712_v5, %v2187_v9  ;;  %v3401_v8 = vpop.f32.mrb[193].mxu0  ;;  %v3503_v48 = vpop.f32.mrb[193].mxu1 }
 0x25d   :  { %v1612_v58 = vpop.f32.mrb[194].mxu0  ;;  %v2190_v63 = vpop.f32.mrb[194].mxu1 }
 0x25e   :  { %2541 = vst.msk [vmem:[%s4802_s3 + $0xb0] sm:$0xf] %vm2496_vm4, %v2992_v41  ;;  %v2993_v59 = vpack.c.bf16 %v2295_v26, %v2295_v26  ;;  %v1669_v2 = vmax.f32 %v1610_v33, 0.0  ;;  %v2247_v3 = vmax.f32 %v2188_v4, 0.0  ;;  %v1613_v62 = vadd.f32 %v4712_v5, %v1612_v58  ;;  %v3402_v24 = vpop.f32.mrb[195].mxu0  ;;  %v3504_v7 = vpop.f32.mrb[195].mxu1 }
 0x25f   :  { %v2191_v60 = vadd.f32 %v4712_v5, %v2190_v63 }
 0x260   :  { %2542 = vst.msk [vmem:[%s4802_s3 + $0xb4] sm:$0xf] %vm2496_vm4, %v2993_v59  ;;  %v1718_v51 = vmax.f32 %v4443_v10, %v1669_v2  ;;  %v1670_v55 = vmax.f32 %v1613_v62, 0.0 }
 0x261   :  { %v2248_v61 = vmax.f32 %v2191_v60, 0.0 }
 0x262   :  { %v2296_v1 = vmax.f32 %v1718_v51, %v2247_v3  ;;  %v1719_v53 = vmax.f32 %v4811_v56, %v1670_v55 }
 0x263   :  { %v1617_v35 = vpop.f32.mrb[196].mxu0  ;;  %v2195_v39 = vpop.f32.mrb[196].mxu1 }
 0x264   :  { %v2994_v19 = vpack.c.bf16 %v2296_v1, %v2296_v1  ;;  %v2297_v25 = vmax.f32 %v1719_v53, %v2248_v61  ;;  %v1618_v44 = vadd.f32 %v4712_v5, %v1617_v35  ;;  %v2196_v47 = vadd.f32 %v4712_v5, %v2195_v39  ;;  %v3405_v21 = vpop.f32.mrb[197].mxu0  ;;  %v3507_v30 = vpop.f32.mrb[197].mxu1  ;;  %v4812_v5 = vld [vmem:[#allocation6_spill] sm:$0xff] }
 0x265   :  { %v1620_v42 = vpop.f32.mrb[198].mxu0  ;;  %v2198_v46 = vpop.f32.mrb[198].mxu1 }
 0x266   :  { %2543 = vst.msk [vmem:[%s4802_s3 + $0xb8] sm:$0xf] %vm2496_vm4, %v2994_v19  ;;  %v2995_v10 = vpack.c.bf16 %v2297_v25, %v2297_v25  ;;  %v1671_v50 = vmax.f32 %v1618_v44, 0.0  ;;  %v2249_v27 = vmax.f32 %v2196_v47, 0.0  ;;  %v3406_v15 = vpop.f32.mrb[199].mxu0  ;;  %v3508_v32 = vpop.f32.mrb[199].mxu1 }
 0x268   :  { %2544 = vst.msk [vmem:[%s4802_s3 + $0xbc] sm:$0xf] %vm2496_vm4, %v2995_v10  ;;  %v1720_v38 = vmax.f32 %v4812_v5, %v1671_v50 }
 0x26a   :  { %v2298_v29 = vmax.f32 %v1720_v38, %v2249_v27 }
 0x26c   :  { %v2996_v43 = vpack.c.bf16 %v2298_v29, %v2298_v29 }
 0x26e   :  { %2545 = vst.msk [vmem:[%s4802_s3 + $0xc0] sm:$0xf] %vm2496_vm4, %v2996_v43 }

// kernel: cnn_forward.4
= control target key start
LH: loop header
LB: loop body
LE: loop exit
PB: predicated region body
PF: predicated region fallthrough
CT: control target
= control target key end

     0   :  { %v2388_v0 = vmov 0.0   ;;  %vm2389_vm0 = vmmov 0   ;;  %vm292_vm1 = vcmask 261120   ;;  %vm1606_vm2 = vcmask 519168   ;;  %s3133_s1 = inlined_call_operand.vmem [shape: bf16[288,64], index: 1, kind: input, shape index: {}]   ;;  %s3134_s0 = inlined_call_operand.vmem [shape: bf16[4,98,288], index: 0, kind: input, shape index: {}]   ;;  %s3135_s2 = inlined_call_operand.vmem [shape: f32[1,64], index: 2, kind: input, shape index: {}]   ;;  %s3136_s3 = inlined_call_operand.vmem [shape: bf16[98,64], index: 3, kind: output, shape index: {}]  }
   0x1   :  { %2128 = vmatprep.subr.bf16.mxu1 %v2388_v0  ;;  %v2414_v1 = vld [vmem:[%s3133_s1 + $0x40] sm:$0xff]   ;;  %2132 = vmatprep.mubr.msk.bf16.mxu1 %vm2389_vm0, %v2388_v0  ;;  %v2433_v4 = vld [vmem:[%s3133_s1 + $0x48] sm:$0xff]   ;;  %v2455_v8 = vld [vmem:[%s3133_s1 + $0x50] sm:$0xff]   ;;  %vm1619_vm3 = vcmask 516096  }
   0x2   :  { %v2421_v2 = vld [vmem:[%s3133_s1 + $0x80] sm:$0xff]   ;;  %1860 = vmatprep.subr.bf16.mxu0 %v2414_v1  ;;  %v2440_v5 = vld [vmem:[%s3133_s1 + $0x88] sm:$0xff]   ;;  %v2461_v9 = vld [vmem:[%s3133_s1 + $0x10] sm:$0xff]  }
   0x3   :  { %v2427_v3 = vld [vmem:[%s3133_s1] sm:$0xff]   ;;  %2129 = vmatpush3.bf16.msra.mxu1 %v2421_v2  ;;  %v2446_v6 = vld [vmem:[%s3133_s1 + $0x8] sm:$0xff]   ;;  %v2468_v10 = vld [vmem:[%s3133_s1 + $0x58] sm:$0xff]  }
   0x4   :  { %1861 = vmatpush3.bf16.msra.mxu0 %v2427_v3  ;;  %2130 = vmatprep.subr.bf16.mxu1 %v2388_v0  ;;  %v2268_v7 = vld [vmem:[%s3134_s0 + $0x8] ss:$12 sps:$4 sm:$0xff]   ;;  %v2478_v11 = vld [vmem:[%s3133_s1 + $0x18] sm:$0xff]   ;;  %v2485_v12 = vld [vmem:[%s3133_s1 + $0x60] sm:$0xff]  }
   0x5   :  { %1862 = vmatprep.subr.bf16.mxu0 %v2433_v4  ;;  %v2273_v13 = vld [vmem:[%s3134_s0 + $0x20] ss:$12 sps:$4 sm:$0xff]   ;;  %v2278_v17 = vld [vmem:[%s3134_s0 + $0x38] ss:$12 sps:$4 sm:$0xff]   ;;  %v2522_v18 = vld [vmem:[%s3133_s1 + $0x70] sm:$0xff]  }
   0x6   :  { %v2495_v14 = vld [vmem:[%s3133_s1 + $0x20] sm:$0xff]   ;;  %v2502_v15 = vld [vmem:[%s3133_s1 + $0x68] sm:$0xff]   ;;  %v2532_v20 = vld [vmem:[%s3133_s1 + $0x30] sm:$0xff]  }
   0x7   :  { %2131 = vmatpush3.bf16.msra.mxu1 %v2440_v5  ;;  %v2508_v16 = vld [vmem:[%s3133_s1 + $0x28] sm:$0xff]   ;;  %v2285_v19 = vld [vmem:[%s3134_s0 + $0x4] ss:$12 sps:$4 sm:$0xff]   ;;  %v2538_v21 = vld [vmem:[%s3133_s1 + $0x78] sm:$0xff]  }
   0x8   :  { %1863 = vmatpush3.bf16.msra.mxu0 %v2446_v6  ;;  %1927 = vmatprep.subr.bf16.mxu1 %v2414_v1  ;;  %v2549_v22 = vld [vmem:[%s3133_s1 + $0x38] sm:$0xff]   ;;  %v2283_v24 = vld [vmem:[%s3134_s0] ss:$12 sps:$4 sm:$0xff]   ;;  %v2289_v26 = vld [vmem:[%s3134_s0 + $0x68] ss:$12 sps:$4 sm:$0xff]  }
   0x9   :  { %1864 = vmatprep.subr.bf16.mxu0 %v2455_v8  ;;  %346 = vmatprep.mubr.bf16.mxu0 %v2285_v19  ;;  %v2286_v23 = vld [vmem:[%s3134_s0 + $0x50] ss:$12 sps:$4 sm:$0xff]   ;;  %v2290_v27 = vld [vmem:[%s3134_s0 + $0x18] ss:$12 sps:$4 sm:$0xff]   ;;  %v2291_v28 = vld [vmem:[%s3134_s0 + $0x34] ss:$12 sps:$4 sm:$0xff]  }
   0xa   :  { %2133 = vmatmul.mubr.msk.bf16.vlgmr.msra.gmra.mrb[0].mxu1 %vm292_vm1, %v2268_v7  ;;  %v2287_v25 = vld [vmem:[%s3134_s0 + $0x1c] ss:$12 sps:$4 sm:$0xff]   ;;  %v2293_v29 = vld [vmem:[%s3134_s0 + $0x80] ss:$12 sps:$4 sm:$0xff]   ;;  %v2302_v35 = vld [vmem:[%s3134_s0 + $0x64] ss:$12 sps:$4 sm:$0xff]  }
   0xb   :  { %2136 = vmatprep.mubr.msk.bf16.mxu1 %vm2389_vm0, %v2388_v0  ;;  %1928 = vmatpush3.bf16.msra.mxu1 %v2427_v3  ;;  %v2294_v30 = vld [vmem:[%s3134_s0 + $0x30] ss:$12 sps:$4 sm:$0xff]   ;;  %v2295_v31 = vld [vmem:[%s3134_s0 + $0x4c] ss:$12 sps:$4 sm:$0xff]   ;;  %v2298_v33 = vld [vmem:[%s3134_s0 + $0x48] ss:$12 sps:$4 sm:$0xff]  }
   0xc   :  { %1865 = vmatpush3.bf16.msra.mxu0 %v2461_v9  ;;  %1929 = vmatprep.subr.bf16.mxu1 %v2433_v4  ;;  %v2297_v32 = vld [vmem:[%s3134_s0 + $0x98] ss:$0 sps:$4 sm:$0x11]   ;;  %v2301_v34 = vld [vmem:[%s3134_s0 + $0xa0] ss:$12 sps:$4 sm:$0xff]  }
   0xd   :  { %1866 = vmatprep.subr.bf16.mxu0 %v2468_v10  ;;  %v2299_v36 = vld [vmem:[%s3134_s0 + $0x9c] ss:$12 sps:$4 sm:$0xff]   ;;  %v2304_v37 = vld [vmem:[%s3134_s0 + $0x60] ss:$12 sps:$4 sm:$0xff]   ;;  %v2305_v38 = vld [vmem:[%s3134_s0 + $0xb8] ss:$12 sps:$4 sm:$0xff]  }
   0xe   :  { %v2307_v39 = vld [vmem:[%s3134_s0 + $0x7c] ss:$12 sps:$4 sm:$0xff]   ;;  %v2309_v40 = vld [vmem:[%s3134_s0 + $0xb4] ss:$12 sps:$4 sm:$0xff]   ;;  %v2310_v42 = vld [vmem:[%s3134_s0 + $0x78] ss:$12 sps:$4 sm:$0xff]  }
   0xf   :  { %1930 = vmatpush3.bf16.msra.mxu1 %v2446_v6  ;;  %v76_v41 = vld [vmem:[%s3134_s0 + $0x90] sm:$0x11]  ;;  %v2314_v45 = vld [vmem:[%s3134_s0 + $0xcc] ss:$12 sps:$4 sm:$0xff]   ;;  %v2322_v51 = vld [vmem:[%s3134_s0 + $0xfc] ss:$12 sps:$4 sm:$0xff]  }
  0x10   :  { %1867 = vmatpush3.bf16.msra.mxu0 %v2478_v11  ;;  %1931 = vmatprep.subr.bf16.mxu1 %v2455_v8  ;;  %v2311_v43 = vld [vmem:[%s3134_s0 + $0xd0] ss:$12 sps:$4 sm:$0xff]   ;;  %v1645_v44 = vcombine.high %v76_v41, %v76_v41  ;;  %v1644_v46 = vcombine.low %v76_v41, %v76_v41  ;;  %v2316_v47 = vld [vmem:[%s3134_s0 + $0xe8] ss:$12 sps:$4 sm:$0xff]   ;;  %v2320_v50 = vld [vmem:[%s3134_s0 + $0x100] ss:$12 sps:$4 sm:$0xff]  }
  0x11   :  { %1868 = vmatprep.subr.bf16.mxu0 %v2485_v12  ;;  %v2318_v48 = vld [vmem:[%s3134_s0 + $0xe4] ss:$12 sps:$4 sm:$0xff]   ;;  %v2323_v52 = vld [vmem:[%s3134_s0 + $0xbc] ss:$12 sps:$4 sm:$0xff]   ;;  %v2326_v55 = vld [vmem:[%s3134_s0 + $0x114] ss:$12 sps:$4 sm:$0xff]  }
  0x12   :  { %2137 = vmatmul.mubr.msk.bf16.gmra.mrb[4].mxu1 %vm292_vm1, %v2273_v13  ;;  %v2319_v49 = vld [vmem:[%s3134_s0 + $0xa4] ss:$12 sps:$4 sm:$0xff]   ;;  %v2327_v56 = vld [vmem:[%s3134_s0 + $0xd4] ss:$12 sps:$4 sm:$0xff]   ;;  %v2330_v59 = vld [vmem:[%s3134_s0 + $0xec] ss:$12 sps:$4 sm:$0xff]  }
  0x13   :  { %2140 = vmatprep.mubr.msk.bf16.mxu1 %vm2389_vm0, %v2388_v0  ;;  %1932 = vmatpush3.bf16.msra.mxu1 %v2461_v9  ;;  %v2324_v53 = vld [vmem:[%s3134_s0 + $0x118] ss:$12 sps:$4 sm:$0xff]   ;;  %v1696_v54 = vld [vmem:[%s3134_s0 + $0x12c] sm:$0x11]  ;;  %v2333_v60 = vld [vmem:[%s3134_s0 + $0x13c] ss:$12 sps:$4 sm:$0xff]  }
  0x14   :  { %1869 = vmatpush3.bf16.msra.mxu0 %v2495_v14  ;;  %1933 = vmatprep.subr.bf16.mxu1 %v2468_v10  ;;  %v1717_v57 = vcombine.high %v1696_v54, %v1696_v54  ;;  %v1716_v58 = vcombine.low %v1696_v54, %v1696_v54  ;;  %v2331_v61 = vld [vmem:[%s3134_s0 + $0x138] ss:$12 sps:$4 sm:$0xff]   ;;  %v2335_v63 = vld [vmem:[%s3134_s0 + $0x154] ss:$12 sps:$4 sm:$0xff]   ;;  %v2338_v7 = vld [vmem:[%s3134_s0 + $0x11c] ss:$12 sps:$4 sm:$0xff]  }
  0x15   :  { %1870 = vmatprep.subr.bf16.mxu0 %v2502_v15  ;;  %v2334_v62 = vld [vmem:[%s3134_s0 + $0x104] ss:$12 sps:$4 sm:$0xff]   ;;  %v2339_v13 = vld [vmem:[%s3134_s0 + $0x16c] ss:$12 sps:$4 sm:$0xff]  }
  0x17   :  { %1934 = vmatpush3.bf16.msra.mxu1 %v2478_v11 }
  0x18   :  { %1871 = vmatpush3.bf16.msra.mxu0 %v2508_v16  ;;  %1935 = vmatprep.subr.bf16.mxu1 %v2485_v12 }
  0x19   :  { %1872 = vmatprep.subr.bf16.mxu0 %v2522_v18 }
  0x1a   :  { %2141 = vmatmul.mubr.msk.bf16.gmra.mrb[8].mxu1 %vm292_vm1, %v2278_v17  ;;  %v2354_v17 = vld [vmem:[%s3134_s0 + $0x170] ss:$12 sps:$4 sm:$0xff]  }
  0x1b   :  { %2144 = vmatprep.mubr.msk.bf16.mxu1 %vm2389_vm0, %v2388_v0  ;;  %1936 = vmatpush3.bf16.msra.mxu1 %v2495_v14 }
  0x1c   :  { %1873 = vmatpush3.bf16.msra.mxu0 %v2532_v20  ;;  %1937 = vmatprep.subr.bf16.mxu1 %v2502_v15 }
  0x1d   :  { %1874 = vmatprep.subr.bf16.mxu0 %v2538_v21 }
  0x1f   :  { %1938 = vmatpush3.bf16.msra.mxu1 %v2508_v16 }
  0x20   :  { %1875 = vmatpush3.bf16.msra.mxu0 %v2549_v22  ;;  %1939 = vmatprep.subr.bf16.mxu1 %v2522_v18 }
  0x21   :  { %2160 = vmatprep.subr.bf16.mxu0 %v2388_v0 }
  0x22   :  { %2145 = vmatmul.mubr.msk.bf16.gmra.mrb[12].mxu1 %vm292_vm1, %v2286_v23  ;;  %v2361_v23 = vld [vmem:[%s3134_s0 + $0x1a0] ss:$12 sps:$4 sm:$0xff]  }
  0x23   :  { %347 = vmatmul.mubr.bf16.vlgmr.msra.gmra.mrb[0].mxu0 %v2283_v24  ;;  %2148 = vmatprep.mubr.msk.bf16.mxu1 %vm2389_vm0, %v2388_v0  ;;  %v2362_v24 = vld [vmem:[%s3134_s0 + $0x1f0] ss:$12 sps:$4 sm:$0xff]  }
  0x24   :  { %2161 = vmatpush3.bf16.msra.mxu0 %v2421_v2  ;;  %354 = vmatprep.mubr.bf16.mxu0 %v2287_v25  ;;  %v2364_v25 = vld [vmem:[%s3134_s0 + $0x1ec] ss:$12 sps:$4 sm:$0xff]  }
  0x25   :  { %1940 = vmatpush3.bf16.msra.mxu1 %v2532_v20  ;;  %2162 = vmatprep.subr.bf16.mxu0 %v2388_v0 }
  0x26   :  { %1941 = vmatprep.subr.bf16.mxu1 %v2538_v21 }
  0x28   :  { %2163 = vmatpush3.bf16.msra.mxu0 %v2440_v5 }
  0x29   :  { %1942 = vmatpush3.bf16.msra.mxu1 %v2549_v22  ;;  %2192 = vmatprep.subr.bf16.mxu0 %v2388_v0 }
  0x2a   :  { %2149 = vmatmul.mubr.msk.bf16.gmra.mrb[16].mxu1 %vm292_vm1, %v2289_v26  ;;  %1994 = vmatprep.subr.bf16.mxu1 %v2414_v1  ;;  %v2365_v26 = vld [vmem:[%s3134_s0 + $0x1b8] ss:$12 sps:$4 sm:$0xff]  }
  0x2b   :  { %355 = vmatmul.mubr.bf16.gmra.mrb[4].mxu0 %v2290_v27  ;;  %2152 = vmatprep.mubr.msk.bf16.mxu1 %vm2389_vm0, %v2388_v0  ;;  %v2366_v27 = vld [vmem:[%s3134_s0 + $0x208] ss:$12 sps:$4 sm:$0xff]  }
  0x2c   :  { %362 = vmatprep.mubr.bf16.mxu0 %v2291_v28  ;;  %v2369_v28 = vld [vmem:[%s3134_s0 + $0x1d0] ss:$0 sps:$4 sm:$0x11]  }
  0x32   :  { %2153 = vmatmul.mubr.msk.bf16.gmra.mrb[20].mxu1 %vm292_vm1, %v2293_v29  ;;  %v2370_v29 = vld [vmem:[%s3134_s0 + $0x220] ss:$12 sps:$4 sm:$0xff]  }
  0x33   :  { %363 = vmatmul.mubr.bf16.gmra.mrb[8].mxu0 %v2294_v30  ;;  %2156 = vmatprep.mubr.msk.bf16.mxu1 %vm2389_vm0, %v2388_v0  ;;  %v2373_v30 = vld [vmem:[%s3134_s0 + $0x1dc] ss:$12 sps:$4 sm:$0xff]  }
  0x34   :  { %370 = vmatprep.mubr.bf16.mxu0 %v2295_v31  ;;  %v2374_v31 = vld [vmem:[%s3134_s0 + $0x238] ss:$12 sps:$4 sm:$0xff]  }
  0x3a   :  { %2157 = vmatmul.mubr.msk.bf16.gmra.mrb[24].mxu1 %vm292_vm1, %v2297_v32  ;;  %v2376_v32 = vld [vmem:[%s3134_s0 + $0x234] ss:$12 sps:$4 sm:$0xff]  }
  0x3b   :  { %371 = vmatmul.mubr.bf16.gmra.mrb[12].mxu0 %v2298_v33  ;;  %683 = vmatprep.mubr.bf16.mxu1 %v2301_v34  ;;  %v2377_v33 = vld [vmem:[%s3134_s0 + $0x1f4] ss:$12 sps:$4 sm:$0xff]   ;;  %v2378_v34 = vld [vmem:[%s3134_s0 + $0x250] ss:$12 sps:$4 sm:$0xff]  }
  0x3c   :  { %378 = vmatprep.mubr.bf16.mxu0 %v2302_v35  ;;  %v1804_v35 = vld [vmem:[%s3134_s0 + $0x264] sm:$0x11] }
  0x42   :  { %684 = vmatmul.mubr.bf16.vlgmr.msra.gmra.mrb[28].mxu1 %v2299_v36  ;;  %v2380_v36 = vld [vmem:[%s3134_s0 + $0x24c] ss:$12 sps:$4 sm:$0xff]  }
  0x43   :  { %379 = vmatmul.mubr.bf16.gmra.mrb[16].mxu0 %v2304_v37  ;;  %691 = vmatprep.mubr.bf16.mxu1 %v2305_v38  ;;  %v2381_v37 = vld [vmem:[%s3134_s0 + $0x20c] ss:$12 sps:$4 sm:$0xff]   ;;  %v1825_v38 = vcombine.high %v1804_v35, %v1804_v35 }
  0x44   :  { %386 = vmatprep.mubr.bf16.mxu0 %v2307_v39  ;;  %1995 = vmatpush3.bf16.msra.mxu1 %v2427_v3 }
  0x45   :  { %1996 = vmatprep.subr.bf16.mxu1 %v2433_v4 }
  0x48   :  { %1997 = vmatpush3.bf16.msra.mxu1 %v2446_v6 }
  0x49   :  { %1998 = vmatprep.subr.bf16.mxu1 %v2455_v8 }
  0x4a   :  { %692 = vmatmul.mubr.bf16.gmra.mrb[32].mxu1 %v2309_v40  ;;  %v1824_v40 = vcombine.low %v1804_v35, %v1804_v35 }
  0x4b   :  { %387 = vmatmul.mubr.bf16.gmra.mrb[20].mxu0 %v2310_v42  ;;  %699 = vmatprep.mubr.bf16.mxu1 %v2311_v43  ;;  %v2384_v42 = vld [vmem:[%s3134_s0 + $0x224] ss:$12 sps:$4 sm:$0xff]  }
  0x4c   :  { %394 = vmatprep.mubr.bf16.mxu0 %v1645_v44  ;;  %1999 = vmatpush3.bf16.msra.mxu1 %v2461_v9 }
  0x4d   :  { %2000 = vmatprep.subr.bf16.mxu1 %v2468_v10 }
  0x50   :  { %2001 = vmatpush3.bf16.msra.mxu1 %v2478_v11 }
  0x51   :  { %2002 = vmatprep.subr.bf16.mxu1 %v2485_v12 }
  0x52   :  { %700 = vmatmul.mubr.bf16.gmra.mrb[36].mxu1 %v2314_v45 }
  0x53   :  { %395 = vmatmul.mubr.bf16.gmra.mrb[24].mxu0 %v1644_v46  ;;  %707 = vmatprep.mubr.bf16.mxu1 %v2316_v47  ;;  %v2385_v46 = vld [vmem:[%s3134_s0 + $0x26c] ss:$0 sps:$4 sm:$0x11]  }
  0x54   :  { %2164 = vmatprep.mubr.msk.bf16.mxu0 %vm2389_vm0, %v2388_v0  ;;  %2003 = vmatpush3.bf16.msra.mxu1 %v2495_v14 }
  0x55   :  { %2004 = vmatprep.subr.bf16.mxu1 %v2502_v15 }
  0x58   :  { %2005 = vmatpush3.bf16.msra.mxu1 %v2508_v16 }
  0x59   :  { %2006 = vmatprep.subr.bf16.mxu1 %v2522_v18 }
  0x5a   :  { %708 = vmatmul.mubr.bf16.gmra.mrb[40].mxu1 %v2318_v48  ;;  %v2386_v48 = vld [vmem:[%s3134_s0 + $0x23c] ss:$12 sps:$4 sm:$0xff]  }
  0x5b   :  { %2165 = vmatmul.mubr.msk.bf16.vlgmr.msra.gmra.mrb[28].mxu0 %vm292_vm1, %v2319_v49  ;;  %715 = vmatprep.mubr.bf16.mxu1 %v2320_v50 }
  0x5c   :  { %2193 = vmatpush3.bf16.msra.mxu0 %v2421_v2  ;;  %2168 = vmatprep.mubr.msk.bf16.mxu0 %vm2389_vm0, %v2388_v0 }
  0x5d   :  { %2007 = vmatpush3.bf16.msra.mxu1 %v2532_v20  ;;  %2194 = vmatprep.subr.bf16.mxu0 %v2388_v0 }
  0x5e   :  { %2008 = vmatprep.subr.bf16.mxu1 %v2538_v21 }
  0x60   :  { %2195 = vmatpush3.bf16.msra.mxu0 %v2440_v5 }
  0x61   :  { %2009 = vmatpush3.bf16.msra.mxu1 %v2549_v22  ;;  %2224 = vmatprep.subr.bf16.mxu0 %v2388_v0 }
  0x62   :  { %716 = vmatmul.mubr.bf16.gmra.mrb[44].mxu1 %v2322_v51  ;;  %2061 = vmatprep.subr.bf16.mxu1 %v2414_v1  ;;  %v2337_v1 = vld [vmem:[%s3134_s0 + $0x150] ss:$12 sps:$4 sm:$0xff]  }
  0x63   :  { %2169 = vmatmul.mubr.msk.bf16.gmra.mrb[32].mxu0 %vm292_vm1, %v2323_v52  ;;  %723 = vmatprep.mubr.bf16.mxu1 %v2324_v53  ;;  %v2387_v53 = vld [vmem:[%s3134_s0 + $0x254] ss:$12 sps:$4 sm:$0xff]  }
  0x64   :  { %2172 = vmatprep.mubr.msk.bf16.mxu0 %vm2389_vm0, %v2388_v0 }
  0x6a   :  { %724 = vmatmul.mubr.bf16.gmra.mrb[48].mxu1 %v2326_v55 }
  0x6b   :  { %2173 = vmatmul.mubr.msk.bf16.gmra.mrb[36].mxu0 %vm292_vm1, %v2327_v56  ;;  %731 = vmatprep.mubr.bf16.mxu1 %v1717_v57 }
  0x6c   :  { %2176 = vmatprep.mubr.msk.bf16.mxu0 %vm2389_vm0, %v2388_v0 }
  0x72   :  { %732 = vmatmul.mubr.bf16.gmra.mrb[52].mxu1 %v1716_v58 }
  0x73   :  { %2177 = vmatmul.mubr.msk.bf16.gmra.mrb[40].mxu0 %vm292_vm1, %v2330_v59  ;;  %1033 = vmatprep.mubr.bf16.mxu1 %v2333_v60  ;;  %v2911_v59 = vld [vmem:[%s3135_s2] ss:$0 sm:$0xff] }
  0x74   :  { %2180 = vmatprep.mubr.msk.bf16.mxu0 %vm2389_vm0, %v2388_v0 }
  0x7a   :  { %1034 = vmatmul.mubr.bf16.vlgmr.msra.gmra.mrb[56].mxu1 %v2331_v61 }
  0x7b   :  { %2181 = vmatmul.mubr.msk.bf16.gmra.mrb[44].mxu0 %vm292_vm1, %v2334_v62  ;;  %1041 = vmatprep.mubr.bf16.mxu1 %v2335_v63 }
  0x7c   :  { %2184 = vmatprep.mubr.msk.bf16.mxu0 %vm2389_vm0, %v2388_v0  ;;  %2062 = vmatpush3.bf16.msra.mxu1 %v2427_v3  ;;  %v2341_v3 = vld [vmem:[%s3134_s0 + $0x168] ss:$12 sps:$4 sm:$0xff]  }
  0x7d   :  { %2063 = vmatprep.subr.bf16.mxu1 %v2433_v4  ;;  %v2342_v4 = vld [vmem:[%s3134_s0 + $0x134] ss:$0 sps:$4 sm:$0x11]  }
  0x80   :  { %2064 = vmatpush3.bf16.msra.mxu1 %v2446_v6  ;;  %v2343_v6 = vld [vmem:[%s3134_s0 + $0x184] ss:$12 sps:$4 sm:$0xff]  }
  0x81   :  { %2065 = vmatprep.subr.bf16.mxu1 %v2455_v8  ;;  %v2345_v8 = vld [vmem:[%s3134_s0 + $0x180] ss:$12 sps:$4 sm:$0xff]  }
  0x82   :  { %1042 = vmatmul.mubr.bf16.gmra.mrb[60].mxu1 %v2337_v1 }
  0x83   :  { %2185 = vmatmul.mubr.msk.bf16.gmra.mrb[48].mxu0 %vm292_vm1, %v2338_v7  ;;  %1049 = vmatprep.mubr.bf16.mxu1 %v2339_v13 }
  0x84   :  { %2188 = vmatprep.mubr.msk.bf16.mxu0 %vm2389_vm0, %v2388_v0  ;;  %2066 = vmatpush3.bf16.msra.mxu1 %v2461_v9  ;;  %v2346_v9 = vld [vmem:[%s3134_s0 + $0x140] ss:$12 sps:$4 sm:$0xff]  }
  0x85   :  { %2067 = vmatprep.subr.bf16.mxu1 %v2468_v10  ;;  %v2347_v10 = vld [vmem:[%s3134_s0 + $0x19c] ss:$12 sps:$4 sm:$0xff]  }
  0x88   :  { %2068 = vmatpush3.bf16.msra.mxu1 %v2478_v11  ;;  %v2349_v11 = vld [vmem:[%s3134_s0 + $0x198] ss:$12 sps:$4 sm:$0xff]  }
  0x89   :  { %2069 = vmatprep.subr.bf16.mxu1 %v2485_v12  ;;  %v2350_v12 = vld [vmem:[%s3134_s0 + $0x158] ss:$12 sps:$4 sm:$0xff]  }
  0x8a   :  { %1050 = vmatmul.mubr.bf16.gmra.mrb[64].mxu1 %v2341_v3 }
  0x8b   :  { %2189 = vmatmul.mubr.msk.bf16.gmra.mrb[52].mxu0 %vm292_vm1, %v2342_v4  ;;  %1057 = vmatprep.mubr.bf16.mxu1 %v2343_v6 }
  0x8c   :  { %2196 = vmatprep.mubr.msk.bf16.mxu0 %vm2389_vm0, %v2388_v0  ;;  %2070 = vmatpush3.bf16.msra.mxu1 %v2495_v14  ;;  %v2351_v14 = vld [vmem:[%s3134_s0 + $0x1b4] ss:$12 sps:$4 sm:$0xff]  }
  0x8d   :  { %2071 = vmatprep.subr.bf16.mxu1 %v2502_v15  ;;  %v1750_v15 = vld [vmem:[%s3134_s0 + $0x1c8] sm:$0x11] }
  0x8e   :  { %v1770_v19 = vcombine.low %v1750_v15, %v1750_v15 }
  0x90   :  { %2072 = vmatpush3.bf16.msra.mxu1 %v2508_v16  ;;  %v2353_v16 = vld [vmem:[%s3134_s0 + $0x1b0] ss:$12 sps:$4 sm:$0xff]  }
  0x91   :  { %2073 = vmatprep.subr.bf16.mxu1 %v2522_v18  ;;  %v1771_v18 = vcombine.high %v1750_v15, %v1750_v15 }
  0x92   :  { %1058 = vmatmul.mubr.bf16.gmra.mrb[68].mxu1 %v2345_v8 }
  0x93   :  { %2197 = vmatmul.mubr.msk.bf16.vlgmr.msra.gmra.mrb[56].mxu0 %vm292_vm1, %v2346_v9  ;;  %1065 = vmatprep.mubr.bf16.mxu1 %v2347_v10 }
  0x94   :  { %2225 = vmatpush3.bf16.msra.mxu0 %v2421_v2  ;;  %2200 = vmatprep.mubr.msk.bf16.mxu0 %vm2389_vm0, %v2388_v0 }
  0x95   :  { %2074 = vmatpush3.bf16.msra.mxu1 %v2532_v20  ;;  %2226 = vmatprep.subr.bf16.mxu0 %v2388_v0  ;;  %v2357_v20 = vld [vmem:[%s3134_s0 + $0x188] ss:$12 sps:$4 sm:$0xff]  }
  0x96   :  { %2075 = vmatprep.subr.bf16.mxu1 %v2538_v21  ;;  %v2360_v21 = vld [vmem:[%s3134_s0 + $0x1d8] ss:$12 sps:$4 sm:$0xff]  }
  0x98   :  { %2227 = vmatpush3.bf16.msra.mxu0 %v2440_v5 }
  0x99   :  { %2076 = vmatpush3.bf16.msra.mxu1 %v2549_v22  ;;  %v2358_v22 = vld [vmem:[%s3134_s0 + $0x1d4] ss:$12 sps:$4 sm:$0xff]  }
  0x9a   :  { %1066 = vmatmul.mubr.bf16.gmra.mrb[72].mxu1 %v2349_v11  ;;  %2256 = vmatprep.subr.bf16.mxu1 %v2388_v0 }
  0x9b   :  { %2201 = vmatmul.mubr.msk.bf16.gmra.mrb[60].mxu0 %vm292_vm1, %v2350_v12  ;;  %1073 = vmatprep.mubr.bf16.mxu1 %v2351_v14 }
  0x9c   :  { %2204 = vmatprep.mubr.msk.bf16.mxu0 %vm2389_vm0, %v2388_v0 }
  0xa2   :  { %1074 = vmatmul.mubr.bf16.gmra.mrb[76].mxu1 %v2353_v16 }
  0xa3   :  { %2205 = vmatmul.mubr.msk.bf16.gmra.mrb[64].mxu0 %vm292_vm1, %v2354_v17  ;;  %1081 = vmatprep.mubr.bf16.mxu1 %v1771_v18 }
  0xa4   :  { %2208 = vmatprep.mubr.msk.bf16.mxu0 %vm2389_vm0, %v2388_v0 }
  0xaa   :  { %1082 = vmatmul.mubr.bf16.gmra.mrb[80].mxu1 %v1770_v19 }
  0xab   :  { %2209 = vmatmul.mubr.msk.bf16.gmra.mrb[68].mxu0 %vm292_vm1, %v2357_v20  ;;  %1383 = vmatprep.mubr.bf16.mxu1 %v2360_v21 }
  0xac   :  { %2212 = vmatprep.mubr.msk.bf16.mxu0 %vm2389_vm0, %v2388_v0 }
  0xb2   :  { %1384 = vmatmul.mubr.bf16.vlgmr.msra.gmra.mrb[84].mxu1 %v2358_v22 }
  0xb3   :  { %2213 = vmatmul.mubr.msk.bf16.gmra.mrb[72].mxu0 %vm292_vm1, %v2361_v23  ;;  %1391 = vmatprep.mubr.bf16.mxu1 %v2362_v24 }
  0xb4   :  { %2216 = vmatprep.mubr.msk.bf16.mxu0 %vm2389_vm0, %v2388_v0  ;;  %2258 = vmatpush3.bf16.msra.mxu1 %v2421_v2  ;;  %v2368_v2 = vld [vmem:[%s3134_s0 + $0x204] ss:$12 sps:$4 sm:$0xff]  }
  0xb5   :  { %2257 = vmatprep.subr.bf16.mxu1 %v2388_v0 }
  0xb8   :  { %2259 = vmatpush3.bf16.msra.mxu1 %v2440_v5  ;;  %v2372_v5 = vld [vmem:[%s3134_s0 + $0x21c] ss:$12 sps:$4 sm:$0xff]  }
  0xba   :  { %1392 = vmatmul.mubr.bf16.gmra.mrb[88].mxu1 %v2364_v25 }
  0xbb   :  { %2217 = vmatmul.mubr.msk.bf16.gmra.mrb[76].mxu0 %vm292_vm1, %v2365_v26  ;;  %1399 = vmatprep.mubr.bf16.mxu1 %v2366_v27 }
  0xbc   :  { %2220 = vmatprep.mubr.msk.bf16.mxu0 %vm2389_vm0, %v2388_v0 }
  0xc2   :  { %1400 = vmatmul.mubr.bf16.gmra.mrb[92].mxu1 %v2368_v2 }
  0xc3   :  { %2221 = vmatmul.mubr.msk.bf16.gmra.mrb[80].mxu0 %vm292_vm1, %v2369_v28  ;;  %1407 = vmatprep.mubr.bf16.mxu1 %v2370_v29 }
  0xc4   :  { %2228 = vmatprep.mubr.msk.bf16.mxu0 %vm2389_vm0, %v2388_v0 }
  0xca   :  { %1408 = vmatmul.mubr.bf16.gmra.mrb[96].mxu1 %v2372_v5 }
  0xcb   :  { %2229 = vmatmul.mubr.msk.bf16.vlgmr.msra.gmra.mrb[84].mxu0 %vm292_vm1, %v2373_v30  ;;  %1415 = vmatprep.mubr.bf16.mxu1 %v2374_v31 }
  0xcc   :  { %2232 = vmatprep.mubr.msk.bf16.mxu0 %vm2389_vm0, %v2388_v0 }
  0xd2   :  { %1416 = vmatmul.mubr.bf16.gmra.mrb[100].mxu1 %v2376_v32 }
  0xd3   :  { %2233 = vmatmul.mubr.msk.bf16.gmra.mrb[88].mxu0 %vm292_vm1, %v2377_v33  ;;  %1423 = vmatprep.mubr.bf16.mxu1 %v2378_v34 }
  0xd4   :  { %2236 = vmatprep.mubr.msk.bf16.mxu0 %vm2389_vm0, %v2388_v0 }
  0xda   :  { %1424 = vmatmul.mubr.bf16.gmra.mrb[104].mxu1 %v2380_v36 }
  0xdb   :  { %2237 = vmatmul.mubr.msk.bf16.gmra.mrb[92].mxu0 %vm292_vm1, %v2381_v37  ;;  %1431 = vmatprep.mubr.bf16.mxu1 %v1825_v38 }
  0xdc   :  { %2240 = vmatprep.mubr.msk.bf16.mxu0 %vm2389_vm0, %v2388_v0 }
  0xdd   :  { %v436_v39 = vpop.f32.mrb[0].mxu1 }
  0xde   :  { %v2134_v41 = vpop.f32.mrb[1].mxu1 }
  0xdf   :  { %v439_v43 = vpop.f32.mrb[2].mxu1 }
  0xe0   :  { %v2135_v44 = vpop.f32.mrb[3].mxu1 }
  0xe2   :  { %1432 = vmatmul.mubr.bf16.gmra.mrb[108].mxu1 %v1824_v40 }
  0xe3   :  { %2241 = vmatmul.mubr.msk.bf16.gmra.mrb[96].mxu0 %vm292_vm1, %v2384_v42  ;;  %2252 = vmatprep.mubr.msk.bf16.mxu1 %vm2389_vm0, %v2388_v0 }
  0xe4   :  { %2244 = vmatprep.mubr.msk.bf16.mxu0 %vm2389_vm0, %v2388_v0 }
  0xe5   :  { %v444_v45 = vpop.f32.mrb[4].mxu1 }
  0xe6   :  { %v2138_v47 = vpop.f32.mrb[5].mxu1 }
  0xe7   :  { %v447_v49 = vpop.f32.mrb[6].mxu1 }
  0xe8   :  { %v2139_v50 = vpop.f32.mrb[7].mxu1 }
  0xea   :  { %2253 = vmatmul.mubr.msk.bf16.vlgmr.msra.gmra.mrb[112].mxu1 %vm292_vm1, %v2385_v46 }
  0xeb   :  { %2245 = vmatmul.mubr.msk.bf16.gmra.mrb[100].mxu0 %vm292_vm1, %v2386_v48 }
  0xec   :  { %2248 = vmatprep.mubr.msk.bf16.mxu0 %vm2389_vm0, %v2388_v0 }
  0xed   :  { %v452_v51 = vpop.f32.mrb[8].mxu1 }
  0xee   :  { %v2142_v52 = vpop.f32.mrb[9].mxu1 }
  0xef   :  { %v455_v54 = vpop.f32.mrb[10].mxu1 }
  0xf0   :  { %v2143_v55 = vpop.f32.mrb[11].mxu1 }
  0xf3   :  { %2249 = vmatmul.mubr.msk.bf16.gmra.mrb[104].mxu0 %vm292_vm1, %v2387_v53 }
  0xf5   :  { %v460_v56 = vpop.f32.mrb[12].mxu1 }
  0xf6   :  { %v1876_v57 = vpop.f32.mrb[0].mxu0  ;;  %v2146_v58 = vpop.f32.mrb[13].mxu1 }
  0xf7   :  { %v1877_v60 = vpop.f32.mrb[1].mxu0  ;;  %v463_v0 = vpop.f32.mrb[14].mxu1 }
  0xf8   :  { %v1878_v61 = vadd.f32 %v1877_v60, %v1876_v57  ;;  %v1879_v62 = vpop.f32.mrb[2].mxu0  ;;  %v2147_v63 = vpop.f32.mrb[15].mxu1 }
  0xf9   :  { %v1880_v1 = vpop.f32.mrb[3].mxu0 }
  0xfa   :  { %v349_v7 = vadd.f32 %v1878_v61, %v2911_v59  ;;  %v1881_v13 = vadd.f32 %v1880_v1, %v1879_v62 }
  0xfc   :  { %v2914_v3 = vadd.f32 %v436_v39, %v349_v7  ;;  %v352_v4 = vadd.f32 %v1881_v13, %v2911_v59 }
  0xfd   :  { %v468_v6 = vpop.f32.mrb[16].mxu1 }
  0xfe   :  { %v2917_v8 = vadd.f32 %v439_v43, %v352_v4  ;;  %v1882_v9 = vpop.f32.mrb[4].mxu0  ;;  %v2150_v10 = vpop.f32.mrb[17].mxu1 }
  0xff   :  { %v1883_v11 = vpop.f32.mrb[5].mxu0  ;;  %v471_v12 = vpop.f32.mrb[18].mxu1 }
 0x100   :  { %v1884_v14 = vadd.f32 %v1883_v11, %v1882_v9  ;;  %v1885_v15 = vpop.f32.mrb[6].mxu0  ;;  %v2151_v16 = vpop.f32.mrb[19].mxu1 }
 0x101   :  { %v1886_v17 = vpop.f32.mrb[7].mxu0 }
 0x102   :  { %v357_v18 = vadd.f32 %v1884_v14, %v2911_v59  ;;  %v1887_v19 = vadd.f32 %v1886_v17, %v1885_v15 }
 0x104   :  { %v2920_v20 = vadd.f32 %v444_v45, %v357_v18  ;;  %v360_v21 = vadd.f32 %v1887_v19, %v2911_v59 }
 0x105   :  { %v476_v22 = vpop.f32.mrb[20].mxu1 }
 0x106   :  { %v2923_v23 = vadd.f32 %v447_v49, %v360_v21  ;;  %v1888_v24 = vpop.f32.mrb[8].mxu0  ;;  %v2154_v25 = vpop.f32.mrb[21].mxu1 }
 0x107   :  { %v1889_v26 = vpop.f32.mrb[9].mxu0  ;;  %v479_v27 = vpop.f32.mrb[22].mxu1 }
 0x108   :  { %v1890_v2 = vadd.f32 %v1889_v26, %v1888_v24  ;;  %v1891_v28 = vpop.f32.mrb[10].mxu0  ;;  %v2155_v29 = vpop.f32.mrb[23].mxu1 }
 0x109   :  { %v1892_v5 = vpop.f32.mrb[11].mxu0 }
 0x10a   :  { %v365_v30 = vadd.f32 %v1890_v2, %v2911_v59  ;;  %v1893_v31 = vadd.f32 %v1892_v5, %v1891_v28 }
 0x10c   :  { %v2926_v32 = vadd.f32 %v452_v51, %v365_v30  ;;  %v368_v33 = vadd.f32 %v1893_v31, %v2911_v59 }
 0x10d   :  { %v484_v34 = vpop.f32.mrb[24].mxu1 }
 0x10e   :  { %v2929_v35 = vadd.f32 %v455_v54, %v368_v33  ;;  %v1894_v36 = vpop.f32.mrb[12].mxu0  ;;  %v2158_v37 = vpop.f32.mrb[25].mxu1 }
 0x10f   :  { %v1895_v38 = vpop.f32.mrb[13].mxu0  ;;  %v487_v39 = vpop.f32.mrb[26].mxu1 }
 0x110   :  { %v1896_v40 = vadd.f32 %v1895_v38, %v1894_v36  ;;  %v1897_v41 = vpop.f32.mrb[14].mxu0  ;;  %v2159_v42 = vpop.f32.mrb[27].mxu1 }
 0x111   :  { %v1898_v43 = vpop.f32.mrb[15].mxu0 }
 0x112   :  { %v373_v44 = vadd.f32 %v1896_v40, %v2911_v59  ;;  %v1899_v45 = vadd.f32 %v1898_v43, %v1897_v41 }
 0x114   :  { %v2932_v46 = vadd.f32 %v460_v56, %v373_v44  ;;  %v376_v47 = vadd.f32 %v1899_v45, %v2911_v59 }
 0x115   :  { %v1943_v48 = vpop.f32.mrb[28].mxu1 }
 0x116   :  { %v2935_v49 = vadd.f32 %v463_v0, %v376_v47  ;;  %v1900_v50 = vpop.f32.mrb[16].mxu0  ;;  %v1944_v51 = vpop.f32.mrb[29].mxu1 }
 0x117   :  { %v1901_v52 = vpop.f32.mrb[17].mxu0  ;;  %v1945_v53 = vadd.f32 %v1944_v51, %v1943_v48  ;;  %v1946_v54 = vpop.f32.mrb[30].mxu1  ;;  %v490_v51 = vmax.f32 %v2914_v3, 0.0 }
 0x118   :  { %v1902_v55 = vadd.f32 %v1901_v52, %v1900_v50  ;;  %v1903_v57 = vpop.f32.mrb[18].mxu0  ;;  %v1947_v58 = vpop.f32.mrb[31].mxu1 }
 0x119   :  { %v1904_v60 = vpop.f32.mrb[19].mxu0  ;;  %v1948_v61 = vadd.f32 %v1947_v58, %v1946_v54 }
 0x11a   :  { %v381_v62 = vadd.f32 %v1902_v55, %v2911_v59  ;;  %v1905_v63 = vadd.f32 %v1904_v60, %v1903_v57 }
 0x11b   :  { %v689_v44 = vadd.f32 %v1948_v61, %v2911_v59 }
 0x11c   :  { %v2938_v56 = vadd.f32 %v468_v6, %v381_v62  ;;  %v384_v1 = vadd.f32 %v1905_v63, %v2911_v59 }
 0x11d   :  { %v1949_v7 = vpop.f32.mrb[32].mxu1 }
 0x11e   :  { %v2941_v0 = vadd.f32 %v471_v12, %v384_v1  ;;  %v1906_v13 = vpop.f32.mrb[20].mxu0  ;;  %v1950_v4 = vpop.f32.mrb[33].mxu1 }
 0x11f   :  { %v1907_v9 = vpop.f32.mrb[21].mxu0  ;;  %v1951_v10 = vadd.f32 %v1950_v4, %v1949_v7  ;;  %v1952_v11 = vpop.f32.mrb[34].mxu1 }
 0x120   :  { %v1908_v14 = vadd.f32 %v1907_v9, %v1906_v13  ;;  %v1909_v15 = vpop.f32.mrb[22].mxu0  ;;  %v1953_v16 = vpop.f32.mrb[35].mxu1 }
 0x121   :  { %v1910_v17 = vpop.f32.mrb[23].mxu0  ;;  %v1954_v18 = vadd.f32 %v1953_v16, %v1952_v11  ;;  %v694_v62 = vadd.f32 %v1951_v10, %v2911_v59  ;;  %v493_v10 = vmax.f32 %v2923_v23, 0.0 }
 0x122   :  { %v389_v19 = vadd.f32 %v1908_v14, %v2911_v59  ;;  %v1911_v21 = vadd.f32 %v1910_v17, %v1909_v15  ;;  %v492_v15 = vmax.f32 %v2920_v20, 0.0 }
 0x123   :  { %v697_v3 = vadd.f32 %v1954_v18, %v2911_v59 }
 0x124   :  { %v2944_v6 = vadd.f32 %v476_v22, %v389_v19  ;;  %v392_v24 = vadd.f32 %v1911_v21, %v2911_v59  ;;  %v686_v22 = vadd.f32 %v1945_v53, %v2911_v59  ;;  %v491_v53 = vmax.f32 %v2917_v8, 0.0 }
 0x125   :  { %v1955_v25 = vpop.f32.mrb[36].mxu1 }
 0x126   :  { %v2947_v12 = vadd.f32 %v479_v27, %v392_v24  ;;  %v1912_v26 = vpop.f32.mrb[24].mxu0  ;;  %v1956_v2 = vpop.f32.mrb[37].mxu1 }
 0x127   :  { %v1913_v28 = vpop.f32.mrb[25].mxu0  ;;  %v1957_v29 = vadd.f32 %v1956_v2, %v1955_v25  ;;  %v1958_v5 = vpop.f32.mrb[38].mxu1 }
 0x128   :  { %v1914_v30 = vadd.f32 %v1913_v28, %v1912_v26  ;;  %v1915_v31 = vpop.f32.mrb[26].mxu0  ;;  %v1959_v33 = vpop.f32.mrb[39].mxu1 }
 0x129   :  { %v1916_v36 = vpop.f32.mrb[27].mxu0  ;;  %v1960_v37 = vadd.f32 %v1959_v33, %v1958_v5  ;;  %v702_v26 = vadd.f32 %v1957_v29, %v2911_v59  ;;  %v495_v29 = vmax.f32 %v2929_v35, 0.0 }
 0x12a   :  { %v397_v38 = vadd.f32 %v1914_v30, %v2911_v59 }
 0x12b   :  { %v705_v20 = vadd.f32 %v1960_v37, %v2911_v59 }
 0x12c   :  { %v2950_v39 = vadd.f32 %v484_v34, %v397_v38 }
 0x12d   :  { %v1961_v40 = vpop.f32.mrb[40].mxu1 }
 0x12e   :  { %v773_v41 = vpop.f32.mrb[28].mxu0  ;;  %v1962_v27 = vpop.f32.mrb[41].mxu1 }
 0x12f   :  { %v774_v42 = vadd.f32 %v773_v41, %v686_v22  ;;  %v2166_v43 = vpop.f32.mrb[29].mxu0  ;;  %v1963_v45 = vadd.f32 %v1962_v27, %v1961_v40  ;;  %v1964_v47 = vpop.f32.mrb[42].mxu1  ;;  %v494_v22 = vmax.f32 %v2926_v32, 0.0 }
 0x130   :  { %v776_v48 = vpop.f32.mrb[30].mxu0  ;;  %v1965_v50 = vpop.f32.mrb[43].mxu1 }
 0x131   :  { %v827_v52 = vmax.f32 %v774_v42, 0.0  ;;  %v777_v54 = vadd.f32 %v776_v48, %v689_v44  ;;  %v2167_v55 = vpop.f32.mrb[31].mxu0  ;;  %v1966_v34 = vadd.f32 %v1965_v50, %v1964_v47  ;;  %v710_v47 = vadd.f32 %v1963_v45, %v2911_v59 }
 0x132   :  { %v497_v45 = vmax.f32 %v2935_v49, 0.0 }
 0x133   :  { %v2955_v57 = vmax.f32 %v490_v51, %v827_v52  ;;  %v828_v58 = vmax.f32 %v777_v54, 0.0  ;;  %v713_v32 = vadd.f32 %v1966_v34, %v2911_v59 }
 0x135   :  { %v2958_v60 = vmax.f32 %v491_v53, %v828_v58  ;;  %v1967_v61 = vpop.f32.mrb[44].mxu1 }
 0x136   :  { %v781_v63 = vpop.f32.mrb[32].mxu0  ;;  %v1968_v1 = vpop.f32.mrb[45].mxu1 }
 0x137   :  { %v782_v7 = vadd.f32 %v781_v63, %v694_v62  ;;  %v2170_v13 = vpop.f32.mrb[33].mxu0  ;;  %v1969_v4 = vadd.f32 %v1968_v1, %v1967_v61  ;;  %v1970_v9 = vpop.f32.mrb[46].mxu1  ;;  %v496_v62 = vmax.f32 %v2932_v46, 0.0 }
 0x138   :  { %v784_v11 = vpop.f32.mrb[34].mxu0  ;;  %v1971_v14 = vpop.f32.mrb[47].mxu1 }
 0x139   :  { %v829_v16 = vmax.f32 %v782_v7, 0.0  ;;  %v785_v8 = vadd.f32 %v784_v11, %v697_v3  ;;  %v2171_v17 = vpop.f32.mrb[35].mxu0  ;;  %v1972_v19 = vadd.f32 %v1971_v14, %v1970_v9  ;;  %v718_v3 = vadd.f32 %v1969_v4, %v2911_v59 }
 0x13a   :  { %v499_v4 = vmax.f32 %v2941_v0, 0.0 }
 0x13b   :  { %v2963_v21 = vmax.f32 %v492_v15, %v829_v16  ;;  %v830_v24 = vmax.f32 %v785_v8, 0.0  ;;  %v721_v16 = vadd.f32 %v1972_v19, %v2911_v59 }
 0x13d   :  { %v2966_v25 = vmax.f32 %v493_v10, %v830_v24  ;;  %v1973_v18 = vpop.f32.mrb[48].mxu1  ;;  %v498_v24 = vmax.f32 %v2938_v56, 0.0 }
 0x13e   :  { %v789_v2 = vpop.f32.mrb[36].mxu0  ;;  %v1974_v28 = vpop.f32.mrb[49].mxu1 }
 0x13f   :  { %v790_v5 = vadd.f32 %v789_v2, %v702_v26  ;;  %v2174_v30 = vpop.f32.mrb[37].mxu0  ;;  %v1975_v31 = vadd.f32 %v1974_v28, %v1973_v18  ;;  %v1976_v33 = vpop.f32.mrb[50].mxu1 }
 0x140   :  { %v792_v36 = vpop.f32.mrb[38].mxu0  ;;  %v1977_v38 = vpop.f32.mrb[51].mxu1 }
 0x141   :  { %v831_v40 = vmax.f32 %v790_v5, 0.0  ;;  %v793_v23 = vadd.f32 %v792_v36, %v705_v20  ;;  %v2175_v41 = vpop.f32.mrb[39].mxu0  ;;  %v1978_v27 = vadd.f32 %v1977_v38, %v1976_v33  ;;  %v726_v20 = vadd.f32 %v1975_v31, %v2911_v59 }
 0x142   :  { %v501_v31 = vmax.f32 %v2947_v12, 0.0 }
 0x143   :  { %v2971_v42 = vmax.f32 %v494_v22, %v831_v40  ;;  %v832_v43 = vmax.f32 %v793_v23, 0.0  ;;  %v729_v56 = vadd.f32 %v1978_v27, %v2911_v59 }
 0x145   :  { %v2974_v44 = vmax.f32 %v495_v29, %v832_v43  ;;  %v1979_v37 = vpop.f32.mrb[52].mxu1  ;;  %v500_v43 = vmax.f32 %v2944_v6, 0.0 }
 0x146   :  { %v797_v48 = vpop.f32.mrb[40].mxu0  ;;  %v1980_v50 = vpop.f32.mrb[53].mxu1 }
 0x147   :  { %v798_v51 = vadd.f32 %v797_v48, %v710_v47  ;;  %v2178_v52 = vpop.f32.mrb[41].mxu0  ;;  %v1981_v54 = vadd.f32 %v1980_v50, %v1979_v37  ;;  %v1982_v55 = vpop.f32.mrb[54].mxu1 }
 0x148   :  { %v800_v53 = vpop.f32.mrb[42].mxu0  ;;  %v1983_v58 = vpop.f32.mrb[55].mxu1 }
 0x149   :  { %v833_v61 = vmax.f32 %v798_v51, 0.0  ;;  %v801_v35 = vadd.f32 %v800_v53, %v713_v32  ;;  %v2179_v63 = vpop.f32.mrb[43].mxu0  ;;  %v734_v32 = vadd.f32 %v1981_v54, %v2911_v59 }
 0x14b   :  { %v2979_v1 = vmax.f32 %v496_v62, %v833_v61  ;;  %v834_v7 = vmax.f32 %v801_v35, 0.0 }
 0x14d   :  { %v2982_v13 = vmax.f32 %v497_v45, %v834_v7  ;;  %v2010_v9 = vpop.f32.mrb[56].mxu1  ;;  %v502_v45 = vmax.f32 %v2950_v39, 0.0 }
 0x14e   :  { %v805_v34 = vpop.f32.mrb[44].mxu0  ;;  %v2011_v11 = vpop.f32.mrb[57].mxu1 }
 0x14f   :  { %v806_v14 = vadd.f32 %v805_v34, %v718_v3  ;;  %v2182_v15 = vpop.f32.mrb[45].mxu0  ;;  %v2012_v46 = vadd.f32 %v2011_v11, %v2010_v9  ;;  %v2013_v8 = vpop.f32.mrb[58].mxu1 }
 0x150   :  { %v808_v17 = vpop.f32.mrb[46].mxu0  ;;  %v2014_v10 = vpop.f32.mrb[59].mxu1 }
 0x151   :  { %v835_v26 = vmax.f32 %v806_v14, 0.0  ;;  %v809_v49 = vadd.f32 %v808_v17, %v721_v16  ;;  %v2183_v18 = vpop.f32.mrb[47].mxu0  ;;  %v2015_v2 = vadd.f32 %v2014_v10, %v2013_v8  ;;  %v1036_v34 = vadd.f32 %v2012_v46, %v2911_v59 }
 0x153   :  { %v2987_v28 = vmax.f32 %v498_v24, %v835_v26  ;;  %v836_v5 = vmax.f32 %v809_v49, 0.0  ;;  %v1039_v8 = vadd.f32 %v2015_v2, %v2911_v59 }
 0x155   :  { %v2990_v30 = vmax.f32 %v499_v4, %v836_v5  ;;  %v2016_v19 = vpop.f32.mrb[60].mxu1 }
 0x156   :  { %v813_v33 = vpop.f32.mrb[48].mxu0  ;;  %v2017_v36 = vpop.f32.mrb[61].mxu1 }
 0x157   :  { %v814_v38 = vadd.f32 %v813_v33, %v726_v20  ;;  %v2186_v22 = vpop.f32.mrb[49].mxu0  ;;  %v2018_v40 = vadd.f32 %v2017_v36, %v2016_v19  ;;  %v2019_v23 = vpop.f32.mrb[62].mxu1 }
 0x158   :  { %v816_v41 = vpop.f32.mrb[50].mxu0  ;;  %v2020_v29 = vpop.f32.mrb[63].mxu1 }
 0x159   :  { %v837_v47 = vmax.f32 %v814_v38, 0.0  ;;  %v817_v0 = vadd.f32 %v816_v41, %v729_v56  ;;  %v2187_v37 = vpop.f32.mrb[51].mxu0  ;;  %v2021_v48 = vadd.f32 %v2020_v29, %v2019_v23  ;;  %v1044_v19 = vadd.f32 %v2018_v40, %v2911_v59 }
 0x15b   :  { %v2995_v50 = vmax.f32 %v500_v43, %v837_v47  ;;  %v838_v51 = vmax.f32 %v817_v0, 0.0  ;;  %v1047_v56 = vadd.f32 %v2021_v48, %v2911_v59 }
 0x15d   :  { %v2998_v52 = vmax.f32 %v501_v31, %v838_v51  ;;  %v2022_v27 = vpop.f32.mrb[64].mxu1 }
 0x15e   :  { %v821_v55 = vpop.f32.mrb[52].mxu0  ;;  %v2023_v53 = vpop.f32.mrb[65].mxu1 }
 0x15f   :  { %v822_v58 = vadd.f32 %v821_v55, %v734_v32  ;;  %v2190_v62 = vpop.f32.mrb[53].mxu0  ;;  %v2024_v61 = vadd.f32 %v2023_v53, %v2022_v27  ;;  %v2025_v6 = vpop.f32.mrb[66].mxu1 }
 0x160   :  { %v824_v35 = vpop.f32.mrb[54].mxu0  ;;  %v2026_v63 = vpop.f32.mrb[67].mxu1 }
 0x161   :  { %v839_v7 = vmax.f32 %v822_v58, 0.0  ;;  %v2191_v3 = vpop.f32.mrb[55].mxu0  ;;  %v2027_v9 = vadd.f32 %v2026_v63, %v2025_v6  ;;  %v1052_v51 = vadd.f32 %v2024_v61, %v2911_v59 }
 0x163   :  { %v3002_v12 = vmax.f32 %v502_v45, %v839_v7  ;;  %v1055_v58 = vadd.f32 %v2027_v9, %v2911_v59 }
 0x165   :  { %v2028_v11 = vpop.f32.mrb[68].mxu1 }
 0x166   :  { %v1123_v54 = vpop.f32.mrb[56].mxu0  ;;  %v2029_v14 = vpop.f32.mrb[69].mxu1 }
 0x167   :  { %v1124_v15 = vadd.f32 %v1123_v54, %v1036_v34  ;;  %v2198_v16 = vpop.f32.mrb[57].mxu0  ;;  %v2030_v17 = vadd.f32 %v2029_v14, %v2028_v11  ;;  %v2031_v10 = vpop.f32.mrb[70].mxu1 }
 0x168   :  { %v1126_v24 = vpop.f32.mrb[58].mxu0  ;;  %v2032_v26 = vpop.f32.mrb[71].mxu1 }
 0x169   :  { %v1177_v49 = vmax.f32 %v1124_v15, 0.0  ;;  %v1127_v39 = vadd.f32 %v1126_v24, %v1039_v8  ;;  %v2199_v18 = vpop.f32.mrb[59].mxu0  ;;  %v2033_v4 = vadd.f32 %v2032_v26, %v2031_v10  ;;  %v1060_v11 = vadd.f32 %v2030_v17, %v2911_v59 }
 0x16b   :  { %v3007_v5 = vmax.f32 %v2955_v57, %v1177_v49  ;;  %v1178_v20 = vmax.f32 %v1127_v39, 0.0  ;;  %v1063_v8 = vadd.f32 %v2033_v4, %v2911_v59 }
 0x16d   :  { %v3010_v46 = vmax.f32 %v2958_v60, %v1178_v20  ;;  %v2034_v33 = vpop.f32.mrb[72].mxu1 }
 0x16e   :  { %v1131_v36 = vpop.f32.mrb[60].mxu0  ;;  %v2035_v2 = vpop.f32.mrb[73].mxu1 }
 0x16f   :  { %v1132_v38 = vadd.f32 %v1131_v36, %v1044_v19  ;;  %v2202_v22 = vpop.f32.mrb[61].mxu0  ;;  %v2036_v23 = vadd.f32 %v2035_v2, %v2034_v33  ;;  %v2037_v41 = vpop.f32.mrb[74].mxu1 }
 0x170   :  { %v1134_v29 = vpop.f32.mrb[62].mxu0  ;;  %v2038_v43 = vpop.f32.mrb[75].mxu1 }
 0x171   :  { %v1179_v47 = vmax.f32 %v1132_v38, 0.0  ;;  %v1135_v57 = vadd.f32 %v1134_v29, %v1047_v56  ;;  %v2203_v0 = vpop.f32.mrb[63].mxu0  ;;  %v2039_v37 = vadd.f32 %v2038_v43, %v2037_v41  ;;  %v1068_v19 = vadd.f32 %v2036_v23, %v2911_v59 }
 0x173   :  { %v3015_v60 = vmax.f32 %v2963_v21, %v1179_v47  ;;  %v1180_v31 = vmax.f32 %v1135_v57, 0.0  ;;  %v1071_v22 = vadd.f32 %v2039_v37, %v2911_v59 }
 0x175   :  { %v3018_v40 = vmax.f32 %v2966_v25, %v1180_v31  ;;  %v2040_v32 = vpop.f32.mrb[76].mxu1 }
 0x176   :  { %v1139_v27 = vpop.f32.mrb[64].mxu0  ;;  %v2041_v48 = vpop.f32.mrb[77].mxu1 }
 0x177   :  { %v1140_v55 = vadd.f32 %v1139_v27, %v1052_v51  ;;  %v2206_v53 = vpop.f32.mrb[65].mxu0  ;;  %v2042_v62 = vadd.f32 %v2041_v48, %v2040_v32  ;;  %v2043_v6 = vpop.f32.mrb[78].mxu1 }
 0x178   :  { %v1142_v35 = vpop.f32.mrb[66].mxu0  ;;  %v2044_v63 = vpop.f32.mrb[79].mxu1 }
 0x179   :  { %v1181_v45 = vmax.f32 %v1140_v55, 0.0  ;;  %v1143_v21 = vadd.f32 %v1142_v35, %v1055_v58  ;;  %v2207_v7 = vpop.f32.mrb[67].mxu0  ;;  %v2045_v3 = vadd.f32 %v2044_v63, %v2043_v6  ;;  %v1076_v51 = vadd.f32 %v2042_v62, %v2911_v59 }
 0x17b   :  { %v3023_v25 = vmax.f32 %v2971_v42, %v1181_v45  ;;  %v1182_v34 = vmax.f32 %v1143_v21, 0.0  ;;  %v1079_v53 = vadd.f32 %v2045_v3, %v2911_v59 }
 0x17d   :  { %v3026_v61 = vmax.f32 %v2974_v44, %v1182_v34  ;;  %v2046_v54 = vpop.f32.mrb[80].mxu1 }
 0x17e   :  { %v1147_v14 = vpop.f32.mrb[68].mxu0  ;;  %v2047_v9 = vpop.f32.mrb[81].mxu1 }
 0x17f   :  { %v1148_v15 = vadd.f32 %v1147_v14, %v1060_v11  ;;  %v2210_v16 = vpop.f32.mrb[69].mxu0  ;;  %v2048_v10 = vadd.f32 %v2047_v9, %v2046_v54  ;;  %v2049_v24 = vpop.f32.mrb[82].mxu1 }
 0x180   :  { %v1150_v26 = vpop.f32.mrb[70].mxu0  ;;  %v2050_v49 = vpop.f32.mrb[83].mxu1 }
 0x181   :  { %v1183_v39 = vmax.f32 %v1148_v15, 0.0  ;;  %v1151_v42 = vadd.f32 %v1150_v26, %v1063_v8  ;;  %v2211_v18 = vpop.f32.mrb[71].mxu0  ;;  %v1084_v11 = vadd.f32 %v2048_v10, %v2911_v59 }
 0x183   :  { %v3031_v20 = vmax.f32 %v2979_v1, %v1183_v39  ;;  %v1184_v44 = vmax.f32 %v1151_v42, 0.0 }
 0x185   :  { %v3034_v17 = vmax.f32 %v2982_v13, %v1184_v44  ;;  %v2077_v33 = vpop.f32.mrb[84].mxu1 }
 0x186   :  { %v1155_v36 = vpop.f32.mrb[72].mxu0  ;;  %v2078_v2 = vpop.f32.mrb[85].mxu1 }
 0x187   :  { %v1156_v4 = vadd.f32 %v1155_v36, %v1068_v19  ;;  %v2214_v38 = vpop.f32.mrb[73].mxu0  ;;  %v2079_v56 = vadd.f32 %v2078_v2, %v2077_v33  ;;  %v2080_v41 = vpop.f32.mrb[86].mxu1 }
 0x188   :  { %v1158_v29 = vpop.f32.mrb[74].mxu0  ;;  %v2081_v43 = vpop.f32.mrb[87].mxu1 }
 0x189   :  { %v1185_v47 = vmax.f32 %v1156_v4, 0.0  ;;  %v1159_v1 = vadd.f32 %v1158_v29, %v1071_v22  ;;  %v2215_v57 = vpop.f32.mrb[75].mxu0  ;;  %v2082_v0 = vadd.f32 %v2081_v43, %v2080_v41 }
 0x18b   :  { %v3039_v13 = vmax.f32 %v2987_v28, %v1185_v47  ;;  %v1186_v31 = vmax.f32 %v1159_v1, 0.0  ;;  %v1389_v36 = vadd.f32 %v2082_v0, %v2911_v59 }
 0x18d   :  { %v3042_v23 = vmax.f32 %v2990_v30, %v1186_v31  ;;  %v2083_v32 = vpop.f32.mrb[88].mxu1 }
 0x18e   :  { %v1163_v27 = vpop.f32.mrb[76].mxu0  ;;  %v2084_v37 = vpop.f32.mrb[89].mxu1 }
 0x18f   :  { %v1164_v48 = vadd.f32 %v1163_v27, %v1076_v51  ;;  %v2218_v55 = vpop.f32.mrb[77].mxu0  ;;  %v2085_v58 = vadd.f32 %v2084_v37, %v2083_v32  ;;  %v2086_v6 = vpop.f32.mrb[90].mxu1 }
 0x190   :  { %v1166_v35 = vpop.f32.mrb[78].mxu0  ;;  %v2087_v63 = vpop.f32.mrb[91].mxu1 }
 0x191   :  { %v1187_v45 = vmax.f32 %v1164_v48, 0.0  ;;  %v1167_v28 = vadd.f32 %v1166_v35, %v1079_v53  ;;  %v2219_v21 = vpop.f32.mrb[79].mxu0  ;;  %v2088_v7 = vadd.f32 %v2087_v63, %v2086_v6  ;;  %v1394_v31 = vadd.f32 %v2085_v58, %v2911_v59 }
 0x193   :  { %v3047_v30 = vmax.f32 %v2995_v50, %v1187_v45  ;;  %v1188_v34 = vmax.f32 %v1167_v28, 0.0 }
 0x195   :  { %v3050_v62 = vmax.f32 %v2998_v52, %v1188_v34  ;;  %v2089_v54 = vpop.f32.mrb[92].mxu1  ;;  %v1386_v52 = vadd.f32 %v2079_v56, %v2911_v59 }
 0x196   :  { %v1171_v14 = vpop.f32.mrb[80].mxu0  ;;  %v2090_v3 = vpop.f32.mrb[93].mxu1 }
 0x197   :  { %v1172_v9 = vadd.f32 %v1171_v14, %v1084_v11  ;;  %v2222_v15 = vpop.f32.mrb[81].mxu0  ;;  %v2091_v16 = vadd.f32 %v2090_v3, %v2089_v54  ;;  %v2092_v8 = vpop.f32.mrb[94].mxu1 }
 0x198   :  { %v1174_v24 = vpop.f32.mrb[82].mxu0  ;;  %v2093_v26 = vpop.f32.mrb[95].mxu1 }
 0x199   :  { %v1189_v49 = vmax.f32 %v1172_v9, 0.0  ;;  %v2223_v39 = vpop.f32.mrb[83].mxu0  ;;  %v2094_v42 = vadd.f32 %v2093_v26, %v2092_v8 }
 0x19b   :  { %v3054_v50 = vmax.f32 %v3002_v12, %v1189_v49  ;;  %v1405_v24 = vadd.f32 %v2094_v42, %v2911_v59 }
 0x19d   :  { %v2095_v18 = vpop.f32.mrb[96].mxu1 }
 0x19e   :  { %v1473_v44 = vpop.f32.mrb[84].mxu0  ;;  %v2096_v10 = vpop.f32.mrb[97].mxu1 }
 0x19f   :  { %v1474_v19 = vadd.f32 %v1473_v44, %v1386_v52  ;;  %v2230_v33 = vpop.f32.mrb[85].mxu0  ;;  %v2097_v2 = vadd.f32 %v2096_v10, %v2095_v18  ;;  %v2098_v4 = vpop.f32.mrb[98].mxu1 }
 0x1a0   :  { %v1476_v38 = vpop.f32.mrb[86].mxu0  ;;  %v2099_v22 = vpop.f32.mrb[99].mxu1 }
 0x1a1   :  { %v1527_v41 = vmax.f32 %v1474_v19, 0.0  ;;  %v1477_v29 = vadd.f32 %v1476_v38, %v1389_v36  ;;  %v2231_v43 = vpop.f32.mrb[87].mxu0  ;;  %v2100_v47 = vadd.f32 %v2099_v22, %v2098_v4  ;;  %v1410_v42 = vadd.f32 %v2097_v2, %v2911_v59 }
 0x1a3   :  { %v1540_v12 = vmax.f32 %v3007_v5, %v1527_v41  ;;  %v1528_v1 = vmax.f32 %v1477_v29, 0.0  ;;  %v1397_v5 = vadd.f32 %v2088_v7, %v2911_v59  ;;  %v1402_v7 = vadd.f32 %v2091_v16, %v2911_v59 }
 0x1a4   :  { %v1413_v43 = vadd.f32 %v2100_v47, %v2911_v59 }
 0x1a5   :  { %v1847_v56 = vpack.c.bf16 %v1540_v12, %v1540_v12  ;;  %v1541_v57 = vmax.f32 %v3010_v46, %v1528_v1  ;;  %v2101_v51 = vpop.f32.mrb[100].mxu1 }
 0x1a6   :  { %v1481_v32 = vpop.f32.mrb[88].mxu0  ;;  %v2102_v0 = vpop.f32.mrb[101].mxu1 }
 0x1a7   :  { %1607 = vst.msk [vmem:[%s3136_s3] sm:$0xf] %vm1606_vm2, %v1847_v56  ;;  %v1848_v27 = vpack.c.bf16 %v1541_v57, %v1541_v57  ;;  %v1482_v37 = vadd.f32 %v1481_v32, %v1394_v31  ;;  %v2234_v48 = vpop.f32.mrb[89].mxu0  ;;  %v2103_v55 = vadd.f32 %v2102_v0, %v2101_v51  ;;  %v2104_v53 = vpop.f32.mrb[102].mxu1 }
 0x1a8   :  { %v1484_v6 = vpop.f32.mrb[90].mxu0  ;;  %v2105_v35 = vpop.f32.mrb[103].mxu1 }
 0x1a9   :  { %1608 = vst.msk [vmem:[%s3136_s3 + $0x4] sm:$0xf] %vm1606_vm2, %v1848_v27  ;;  %v1529_v46 = vmax.f32 %v1482_v37, 0.0  ;;  %v1485_v58 = vadd.f32 %v1484_v6, %v1397_v5  ;;  %v2235_v63 = vpop.f32.mrb[91].mxu0  ;;  %v2106_v45 = vadd.f32 %v2105_v35, %v2104_v53  ;;  %v1418_v37 = vadd.f32 %v2103_v55, %v2911_v59 }
 0x1ab   :  { %v1542_v28 = vmax.f32 %v3015_v60, %v1529_v46  ;;  %v1530_v21 = vmax.f32 %v1485_v58, 0.0 }
 0x1ad   :  { %v1849_v34 = vpack.c.bf16 %v1542_v28, %v1542_v28  ;;  %v1543_v11 = vmax.f32 %v3018_v40, %v1530_v21  ;;  %v2107_v54 = vpop.f32.mrb[104].mxu1 }
 0x1ae   :  { %v1489_v14 = vpop.f32.mrb[92].mxu0  ;;  %v2108_v3 = vpop.f32.mrb[105].mxu1 }
 0x1af   :  { %1609 = vst.msk [vmem:[%s3136_s3 + $0x8] sm:$0xf] %vm1606_vm2, %v1849_v34  ;;  %v1850_v9 = vpack.c.bf16 %v1543_v11, %v1543_v11  ;;  %v1490_v15 = vadd.f32 %v1489_v14, %v1402_v7  ;;  %v2238_v8 = vpop.f32.mrb[93].mxu0  ;;  %v2109_v60 = vadd.f32 %v2108_v3, %v2107_v54  ;;  %v2110_v26 = vpop.f32.mrb[106].mxu1 }
 0x1b0   :  { %v1492_v49 = vpop.f32.mrb[94].mxu0  ;;  %v2111_v39 = vpop.f32.mrb[107].mxu1 }
 0x1b1   :  { %1610 = vst.msk [vmem:[%s3136_s3 + $0xc] sm:$0xf] %vm1606_vm2, %v1850_v9  ;;  %v1531_v40 = vmax.f32 %v1490_v15, 0.0  ;;  %v1493_v16 = vadd.f32 %v1492_v49, %v1405_v24  ;;  %v2239_v52 = vpop.f32.mrb[95].mxu0  ;;  %v2112_v18 = vadd.f32 %v2111_v39, %v2110_v26  ;;  %v1426_v9 = vadd.f32 %v2109_v60, %v2911_v59 }
 0x1b3   :  { %v1544_v44 = vmax.f32 %v3023_v25, %v1531_v40  ;;  %v1532_v10 = vmax.f32 %v1493_v16, 0.0  ;;  %v1429_v24 = vadd.f32 %v2112_v18, %v2911_v59 }
 0x1b5   :  { %v1851_v19 = vpack.c.bf16 %v1544_v44, %v1544_v44  ;;  %v1545_v33 = vmax.f32 %v3026_v61, %v1532_v10  ;;  %v2113_v36 = vpop.f32.mrb[108].mxu1 }
 0x1b6   :  { %v1497_v4 = vpop.f32.mrb[96].mxu0  ;;  %v2114_v38 = vpop.f32.mrb[109].mxu1 }
 0x1b7   :  { %1611 = vst.msk [vmem:[%s3136_s3 + $0x10] sm:$0xf] %vm1606_vm2, %v1851_v19  ;;  %v1852_v22 = vpack.c.bf16 %v1545_v33, %v1545_v33  ;;  %v1498_v41 = vadd.f32 %v1497_v4, %v1410_v42  ;;  %v2242_v29 = vpop.f32.mrb[97].mxu0  ;;  %v2115_v25 = vadd.f32 %v2114_v38, %v2113_v36  ;;  %v2116_v12 = vpop.f32.mrb[110].mxu1 }
 0x1b8   :  { %v1500_v1 = vpop.f32.mrb[98].mxu0  ;;  %v2117_v56 = vpop.f32.mrb[111].mxu1 }
 0x1b9   :  { %1612 = vst.msk [vmem:[%s3136_s3 + $0x14] sm:$0xf] %vm1606_vm2, %v1852_v22  ;;  %v1533_v61 = vmax.f32 %v1498_v41, 0.0  ;;  %v1501_v2 = vadd.f32 %v1500_v1, %v1413_v43  ;;  %v2243_v57 = vpop.f32.mrb[99].mxu0  ;;  %v1434_v31 = vadd.f32 %v2115_v25, %v2911_v59 }
 0x1bb   :  { %v1546_v51 = vmax.f32 %v3031_v20, %v1533_v61  ;;  %v1534_v32 = vmax.f32 %v1501_v2, 0.0  ;;  %v1421_v20 = vadd.f32 %v2106_v45, %v2911_v59 }
 0x1bd   :  { %v1853_v0 = vpack.c.bf16 %v1546_v51, %v1546_v51  ;;  %v1547_v47 = vmax.f32 %v3034_v17, %v1534_v32  ;;  %v1521_v27 = vpop.f32.mrb[112].mxu1 }
 0x1be   :  { %v1522_v48 = vadd.f32 %v1521_v27, %v1434_v31  ;;  %v1505_v5 = vpop.f32.mrb[100].mxu0  ;;  %v2254_v53 = vpop.f32.mrb[113].mxu1 }
 0x1bf   :  { %1613 = vst.msk [vmem:[%s3136_s3 + $0x18] sm:$0xf] %vm1606_vm2, %v1853_v0  ;;  %v1854_v6 = vpack.c.bf16 %v1547_v47, %v1547_v47  ;;  %v1506_v35 = vadd.f32 %v1505_v5, %v1418_v37  ;;  %v2246_v46 = vpop.f32.mrb[101].mxu0  ;;  %v1524_v58 = vpop.f32.mrb[114].mxu1 }
 0x1c0   :  { %v1539_v63 = vmax.f32 %v1522_v48, 0.0  ;;  %v1508_v28 = vpop.f32.mrb[102].mxu0  ;;  %v2255_v17 = vpop.f32.mrb[115].mxu1 }
 0x1c1   :  { %1614 = vst.msk [vmem:[%s3136_s3 + $0x1c] sm:$0xf] %vm1606_vm2, %v1854_v6  ;;  %v1535_v55 = vmax.f32 %v1506_v35, 0.0  ;;  %v1509_v21 = vadd.f32 %v1508_v28, %v1421_v20  ;;  %v2247_v34 = vpop.f32.mrb[103].mxu0 }
 0x1c2   :  { %v1552_v11 = vmax.f32 %v3054_v50, %v1539_v63 }
 0x1c3   :  { %v1548_v7 = vmax.f32 %v3039_v13, %v1535_v55  ;;  %v1536_v54 = vmax.f32 %v1509_v21, 0.0 }
 0x1c4   :  { %v1859_v14 = vpack.c.bf16 %v1552_v11, %v1552_v11 }
 0x1c5   :  { %v1855_v45 = vpack.c.bf16 %v1548_v7, %v1548_v7  ;;  %v1549_v3 = vmax.f32 %v3042_v23, %v1536_v54 }
 0x1c6   :  { %1620 = vst.msk [vmem:[%s3136_s3 + $0x30] sm:$0x1] %vm1619_vm3, %v1859_v14  ;;  %v1513_v15 = vpop.f32.mrb[104].mxu0 }
 0x1c7   :  { %1615 = vst.msk [vmem:[%s3136_s3 + $0x20] sm:$0xf] %vm1606_vm2, %v1855_v45  ;;  %v1856_v50 = vpack.c.bf16 %v1549_v3, %v1549_v3  ;;  %v1514_v8 = vadd.f32 %v1513_v15, %v1426_v9  ;;  %v2250_v13 = vpop.f32.mrb[105].mxu0 }
 0x1c8   :  { %v1516_v26 = vpop.f32.mrb[106].mxu0 }
 0x1c9   :  { %1616 = vst.msk [vmem:[%s3136_s3 + $0x24] sm:$0xf] %vm1606_vm2, %v1856_v50  ;;  %v1537_v23 = vmax.f32 %v1514_v8, 0.0  ;;  %v1517_v60 = vadd.f32 %v1516_v26, %v1429_v24  ;;  %v2251_v49 = vpop.f32.mrb[107].mxu0 }
 0x1cb   :  { %v1550_v39 = vmax.f32 %v3047_v30, %v1537_v23  ;;  %v1538_v40 = vmax.f32 %v1517_v60, 0.0 }
 0x1cd   :  { %v1857_v16 = vpack.c.bf16 %v1550_v39, %v1550_v39  ;;  %v1551_v52 = vmax.f32 %v3050_v62, %v1538_v40 }
 0x1cf   :  { %1617 = vst.msk [vmem:[%s3136_s3 + $0x28] sm:$0xf] %vm1606_vm2, %v1857_v16  ;;  %v1858_v59 = vpack.c.bf16 %v1551_v52, %v1551_v52 }
 0x1d1   :  { %1618 = vst.msk [vmem:[%s3136_s3 + $0x2c] sm:$0xf] %vm1606_vm2, %v1858_v59 }

// kernel: cnn_forward.5
= control target key start
LH: loop header
LB: loop body
LE: loop exit
PB: predicated region body
PF: predicated region fallthrough
CT: control target
= control target key end

     0   :  { %v433_v27 = vlaneseq  ;;  %v3209_v35 = vmov 1966171168   ;;  %s3946_s0 = inlined_call_operand.vmem [shape: bf16[2,3136], index: 0, kind: input, shape index: {}]   ;;  %s3947_s1 = inlined_call_operand.vmem [shape: bf16[3136,128], index: 1, kind: input, shape index: {}]   ;;  %s3948_s2 = inlined_call_operand.vmem [shape: f32[1,128], index: 2, kind: input, shape index: {}]   ;;  %s3949_s3 = inlined_call_operand.vmem [shape: f32[128,6], index: 3, kind: input, shape index: {}]   ;;  %s3950_s4 = inlined_call_operand.vmem [shape: f32[1,6], index: 4, kind: input, shape index: {}]   ;;  %s3951_s5 = inlined_call_operand.hbm [shape: f32[2,6], index: 5, kind: output, shape index: {}]  }
   0x1   :  { %v2986_v0 = vld [vmem:[%s3947_s1 + $0x40] sm:$0xff]   ;;  %v2990_v4 = vld [vmem:[%s3947_s1 + $0x48] sm:$0xff]   ;;  %v2994_v8 = vld [vmem:[%s3947_s1 + $0x50] sm:$0xff]   ;;  %v431_v36 = vunpack.c.l.s4 %v3209_v35 }
   0x2   :  { %v2987_v1 = vld [vmem:[%s3947_s1] sm:$0xff]   ;;  %2624 = vmatprep.subr.bf16.mxu0 %v2986_v0  ;;  %v2991_v5 = vld [vmem:[%s3947_s1 + $0x8] sm:$0xff]   ;;  %v2995_v9 = vld [vmem:[%s3947_s1 + $0x10] sm:$0xff]   ;;  %v434_v32 = vshrl.u32 %v433_v27, 7 }
   0x3   :  { %v2988_v2 = vld [vmem:[%s3947_s1 + $0xc0] sm:$0xff]   ;;  %2625 = vmatpush3.bf16.msra.mxu0 %v2987_v1  ;;  %v2992_v6 = vld [vmem:[%s3947_s1 + $0xc8] sm:$0xff]   ;;  %v2996_v10 = vld [vmem:[%s3947_s1 + $0xd0] sm:$0xff]   ;;  %v432_v39 = vunpack.c.0.s8 %v431_v36 }
   0x4   :  { %v2989_v3 = vld [vmem:[%s3947_s1 + $0x80] sm:$0xff]   ;;  %2646 = vmatprep.subr.bf16.mxu1 %v2988_v2  ;;  %2626 = vmatprep.subr.bf16.mxu0 %v2990_v4  ;;  %v2993_v7 = vld [vmem:[%s3947_s1 + $0x88] sm:$0xff]   ;;  %v2997_v11 = vld [vmem:[%s3947_s1 + $0x90] sm:$0xff]  }
   0x5   :  { %2647 = vmatpush3.bf16.msra.mxu1 %v2989_v3  ;;  %v2998_v12 = vld [vmem:[%s3947_s1 + $0x58] sm:$0xff]   ;;  %v3002_v16 = vld [vmem:[%s3947_s1 + $0x60] sm:$0xff]   ;;  %v3006_v20 = vld [vmem:[%s3947_s1 + $0x68] sm:$0xff]   ;;  %v3349_v41 = vsub.s32 %v432_v39, %v434_v32 }
   0x6   :  { %2648 = vmatprep.subr.bf16.mxu1 %v2992_v6  ;;  %v2999_v13 = vld [vmem:[%s3947_s1 + $0x18] sm:$0xff]   ;;  %v3003_v17 = vld [vmem:[%s3947_s1 + $0x20] sm:$0xff]   ;;  %v3007_v21 = vld [vmem:[%s3947_s1 + $0x28] sm:$0xff]  }
   0x7   :  { %2627 = vmatpush3.bf16.msra.mxu0 %v2991_v5  ;;  %v3000_v14 = vld [vmem:[%s3947_s1 + $0xd8] sm:$0xff]   ;;  %v3004_v18 = vld [vmem:[%s3947_s1 + $0xe0] sm:$0xff]   ;;  %v3008_v22 = vld [vmem:[%s3947_s1 + $0xe8] sm:$0xff]  }
   0x8   :  { %2628 = vmatprep.subr.bf16.mxu0 %v2994_v8  ;;  %v3001_v15 = vld [vmem:[%s3947_s1 + $0x98] sm:$0xff]   ;;  %v3005_v19 = vld [vmem:[%s3947_s1 + $0xa0] sm:$0xff]   ;;  %v3009_v23 = vld [vmem:[%s3947_s1 + $0xa8] sm:$0xff]  }
   0x9   :  { %2649 = vmatpush3.bf16.msra.mxu1 %v2993_v7  ;;  %v3010_v24 = vld [vmem:[%s3947_s1 + $0x70] sm:$0xff]   ;;  %v3014_v29 = vld [vmem:[%s3947_s1 + $0x78] sm:$0xff]   ;;  %v22_v33 = vld [vmem:[%s3946_s0] sm:$0xff] }
   0xa   :  { %2650 = vmatprep.subr.bf16.mxu1 %v2996_v10  ;;  %v3011_v25 = vld [vmem:[%s3947_s1 + $0x30] sm:$0xff]   ;;  %v3015_v30 = vld [vmem:[%s3947_s1 + $0x38] sm:$0xff]   ;;  %v3019_v37 = vld [vmem:[%s3947_s1 + $0x140] sm:$0xff]   ;;  %v429_v38 = vcombine.high %v22_v33, %v22_v33  ;;  %v436_v42 = vrot.slane %v22_v33, %v3349_v41 }
   0xb   :  { %2629 = vmatpush3.bf16.msra.mxu0 %v2995_v9  ;;  %v3012_v26 = vld [vmem:[%s3947_s1 + $0xf0] sm:$0xff]   ;;  %v3016_v31 = vld [vmem:[%s3947_s1 + $0xf8] sm:$0xff]   ;;  %v3021_v40 = vld [vmem:[%s3947_s1 + $0x1c0] sm:$0xff]  }
   0xc   :  { %2630 = vmatprep.subr.bf16.mxu0 %v2998_v12  ;;  %v3013_v28 = vld [vmem:[%s3947_s1 + $0xb0] sm:$0xff]   ;;  %v3018_v34 = vld [vmem:[%s3947_s1 + $0xb8] sm:$0xff]   ;;  %v3353_v43 = vrot.slane %v429_v38, %v3349_v41  ;;  %v444_v44 = vcombine.high %v436_v42, %v436_v42  ;;  %v452_v45 = vrot.slane %v436_v42, %v3349_v41  ;;  %v3020_v48 = vld [vmem:[%s3947_s1 + $0x100] sm:$0xff]  }
   0xd   :  { %2651 = vmatpush3.bf16.msra.mxu1 %v2997_v11  ;;  %v3023_v51 = vld [vmem:[%s3947_s1 + $0x148] sm:$0xff]   ;;  %v3022_v53 = vld [vmem:[%s3947_s1 + $0x180] sm:$0xff]   ;;  %v3027_v57 = vld [vmem:[%s3947_s1 + $0x150] sm:$0xff]  }
   0xe   :  { %2652 = vmatprep.subr.bf16.mxu1 %v3000_v14  ;;  %v445_v46 = vcombine.high %v3353_v43, %v3353_v43  ;;  %v466_v47 = vrot.slane %v444_v44, %v3349_v41  ;;  %v474_v50 = vcombine.high %v452_v45, %v452_v45  ;;  %v3025_v54 = vld [vmem:[%s3947_s1 + $0x1c8] sm:$0xff]   ;;  %v3029_v59 = vld [vmem:[%s3947_s1 + $0x1d0] sm:$0xff]   ;;  %v3031_v61 = vld [vmem:[%s3947_s1 + $0x158] sm:$0xff]  }
   0xf   :  { %2631 = vmatpush3.bf16.msra.mxu0 %v2999_v13  ;;  %v3024_v56 = vld [vmem:[%s3947_s1 + $0x108] sm:$0xff]   ;;  %v3028_v60 = vld [vmem:[%s3947_s1 + $0x110] sm:$0xff]   ;;  %v3033_v63 = vld [vmem:[%s3947_s1 + $0x1d8] sm:$0xff]  }
  0x10   :  { %2632 = vmatprep.subr.bf16.mxu0 %v3002_v16  ;;  %v473_v49 = vrot.slane %v445_v46, %v3349_v41  ;;  %1826 = vmatprep.mubr.bf16.mxu0 %v466_v47  ;;  %v476_v52 = vcombine.high %v466_v47, %v466_v47  ;;  %v3026_v58 = vld [vmem:[%s3947_s1 + $0x188] sm:$0xff]   ;;  %v3030_v62 = vld [vmem:[%s3947_s1 + $0x190] sm:$0xff]   ;;  %v3032_v0 = vld [vmem:[%s3947_s1 + $0x118] sm:$0xff]  }
  0x11   :  { %2653 = vmatpush3.bf16.msra.mxu1 %v3001_v15  ;;  %v3035_v1 = vld [vmem:[%s3947_s1 + $0x160] sm:$0xff]   ;;  %v3034_v2 = vld [vmem:[%s3947_s1 + $0x198] sm:$0xff]   ;;  %v3039_v5 = vld [vmem:[%s3947_s1 + $0x168] sm:$0xff]  }
  0x12   :  { %2654 = vmatprep.subr.bf16.mxu1 %v3004_v18  ;;  %v477_v55 = vcombine.high %v473_v49, %v473_v49  ;;  %1866 = vmatprep.mubr.bf16.mxu1 %v476_v52  ;;  %v3037_v3 = vld [vmem:[%s3947_s1 + $0x1e0] sm:$0xff]   ;;  %v3041_v7 = vld [vmem:[%s3947_s1 + $0x1e8] sm:$0xff]   ;;  %v3043_v9 = vld [vmem:[%s3947_s1 + $0x170] sm:$0xff]  }
  0x13   :  { %2633 = vmatpush3.bf16.msra.mxu0 %v3003_v17  ;;  %v3036_v4 = vld [vmem:[%s3947_s1 + $0x120] sm:$0xff]   ;;  %v3040_v8 = vld [vmem:[%s3947_s1 + $0x128] sm:$0xff]   ;;  %v3045_v11 = vld [vmem:[%s3947_s1 + $0x1f0] sm:$0xff]   ;;  %v459_v17 = vrot.slane %v3353_v43, %v3349_v41 }
  0x14   :  { %2634 = vmatprep.subr.bf16.mxu0 %v3006_v20  ;;  %v3038_v6 = vld [vmem:[%s3947_s1 + $0x1a0] sm:$0xff]   ;;  %v3042_v10 = vld [vmem:[%s3947_s1 + $0x1a8] sm:$0xff]   ;;  %v3044_v12 = vld [vmem:[%s3947_s1 + $0x130] sm:$0xff]  }
  0x15   :  { %2655 = vmatpush3.bf16.msra.mxu1 %v3005_v19  ;;  %v3047_v13 = vld [vmem:[%s3947_s1 + $0x178] sm:$0xff]   ;;  %v3046_v14 = vld [vmem:[%s3947_s1 + $0x1b0] sm:$0xff]   ;;  %v3051_v18 = vld [vmem:[%s3947_s1 + $0x240] sm:$0xff]  }
  0x16   :  { %2656 = vmatprep.subr.bf16.mxu1 %v3008_v22  ;;  %v3049_v15 = vld [vmem:[%s3947_s1 + $0x1f8] sm:$0xff]   ;;  %v3053_v20 = vld [vmem:[%s3947_s1 + $0x2c0] sm:$0xff]   ;;  %v475_v22 = vcombine.high %v459_v17, %v459_v17  ;;  %v3059_v27 = vld [vmem:[%s3947_s1 + $0x250] sm:$0xff]  }
  0x17   :  { %2635 = vmatpush3.bf16.msra.mxu0 %v3007_v21  ;;  %v3048_v16 = vld [vmem:[%s3947_s1 + $0x138] sm:$0xff]   ;;  %v3052_v21 = vld [vmem:[%s3947_s1 + $0x200] sm:$0xff]   ;;  %v3062_v32 = vld [vmem:[%s3947_s1 + $0x290] sm:$0xff]  }
  0x18   :  { %2636 = vmatprep.subr.bf16.mxu0 %v3010_v24  ;;  %v3050_v19 = vld [vmem:[%s3947_s1 + $0x1b8] sm:$0xff]   ;;  %v3054_v24 = vld [vmem:[%s3947_s1 + $0x280] sm:$0xff]   ;;  %v3071_v39 = vld [vmem:[%s3947_s1 + $0x268] sm:$0xff]  }
  0x19   :  { %2657 = vmatpush3.bf16.msra.mxu1 %v3009_v23  ;;  %v3055_v23 = vld [vmem:[%s3947_s1 + $0x248] sm:$0xff]   ;;  %v3065_v33 = vld [vmem:[%s3947_s1 + $0x2d8] sm:$0xff]   ;;  %v3067_v35 = vld [vmem:[%s3947_s1 + $0x260] sm:$0xff]  }
  0x1a   :  { %2658 = vmatprep.subr.bf16.mxu1 %v3012_v26  ;;  %v3056_v26 = vld [vmem:[%s3947_s1 + $0x208] sm:$0xff]   ;;  %v3066_v36 = vld [vmem:[%s3947_s1 + $0x298] sm:$0xff]   ;;  %v3068_v38 = vld [vmem:[%s3947_s1 + $0x220] sm:$0xff]  }
  0x1b   :  { %2637 = vmatpush3.bf16.msra.mxu0 %v3011_v25  ;;  %v3057_v25 = vld [vmem:[%s3947_s1 + $0x2c8] sm:$0xff]   ;;  %v3075_v44 = vld [vmem:[%s3947_s1 + $0x270] sm:$0xff]  }
  0x1c   :  { %2638 = vmatprep.subr.bf16.mxu0 %v3014_v29  ;;  %v3061_v29 = vld [vmem:[%s3947_s1 + $0x2d0] sm:$0xff]   ;;  %v3073_v42 = vld [vmem:[%s3947_s1 + $0x2e8] sm:$0xff]  }
  0x1d   :  { %2659 = vmatpush3.bf16.msra.mxu1 %v3013_v28  ;;  %v3058_v28 = vld [vmem:[%s3947_s1 + $0x288] sm:$0xff]  }
  0x1e   :  { %2660 = vmatprep.subr.bf16.mxu1 %v3016_v31  ;;  %v3063_v31 = vld [vmem:[%s3947_s1 + $0x258] sm:$0xff]   ;;  %v3072_v43 = vld [vmem:[%s3947_s1 + $0x228] sm:$0xff]  }
  0x1f   :  { %2639 = vmatpush3.bf16.msra.mxu0 %v3015_v30  ;;  %v3060_v30 = vld [vmem:[%s3947_s1 + $0x210] sm:$0xff]   ;;  %v3074_v46 = vld [vmem:[%s3947_s1 + $0x2a8] sm:$0xff]  }
  0x20   :  { %2668 = vmatprep.subr.bf16.mxu0 %v3019_v37  ;;  %v3069_v37 = vld [vmem:[%s3947_s1 + $0x2e0] sm:$0xff]  }
  0x21   :  { %2661 = vmatpush3.bf16.msra.mxu1 %v3018_v34  ;;  %v3064_v34 = vld [vmem:[%s3947_s1 + $0x218] sm:$0xff]  }
  0x22   :  { %2690 = vmatprep.subr.bf16.mxu1 %v3021_v40  ;;  %1827 = vmatmul.mubr.bf16.vlgmr.msra.gmra.mrb[0].mxu0 %v452_v45  ;;  %v3070_v40 = vld [vmem:[%s3947_s1 + $0x2a0] sm:$0xff]   ;;  %v23_v45 = vld [vmem:[%s3946_s0 + $0x8] sm:$0xff] }
  0x23   :  { %2669 = vmatpush3.bf16.msra.mxu0 %v3020_v48  ;;  %1906 = vmatprep.mubr.bf16.mxu0 %v473_v49  ;;  %v485_v47 = vrot.slane %v23_v45, %v3349_v41  ;;  %v478_v48 = vcombine.high %v23_v45, %v23_v45  ;;  %v3077_v49 = vld [vmem:[%s3947_s1 + $0x2f0] sm:$0xff]  }
  0x24   :  { %1867 = vmatmul.mubr.bf16.vlgmr.msra.gmra.mrb[0].mxu1 %v474_v50  ;;  %2670 = vmatprep.subr.bf16.mxu0 %v3023_v51  ;;  %v3076_v50 = vld [vmem:[%s3947_s1 + $0x230] sm:$0xff]  }
  0x25   :  { %2691 = vmatpush3.bf16.msra.mxu1 %v3022_v53  ;;  %1946 = vmatprep.mubr.bf16.mxu1 %v477_v55  ;;  %v493_v51 = vcombine.high %v485_v47, %v485_v47  ;;  %v3538_v52 = vrot.slane %v478_v48, %v3349_v41  ;;  %v3079_v53 = vld [vmem:[%s3947_s1 + $0x278] sm:$0xff]   ;;  %v3126_v45 = vld [vmem:[%s3947_s1 + $0x4d0] sm:$0xff]  }
  0x26   :  { %2692 = vmatprep.subr.bf16.mxu1 %v3025_v54  ;;  %v3078_v54 = vld [vmem:[%s3947_s1 + $0x2b0] sm:$0xff]  }
  0x27   :  { %2671 = vmatpush3.bf16.msra.mxu0 %v3024_v56  ;;  %v515_v55 = vrot.slane %v493_v51, %v3349_v41  ;;  %v494_v56 = vcombine.high %v3538_v52, %v3538_v52  ;;  %v3127_v48 = vld [vmem:[%s3947_s1 + $0x490] sm:$0xff]   ;;  %v3132_v51 = vld [vmem:[%s3947_s1 + $0x460] sm:$0xff]  }
  0x28   :  { %2672 = vmatprep.subr.bf16.mxu0 %v3027_v57  ;;  %v3081_v57 = vld [vmem:[%s3947_s1 + $0x2f8] sm:$0xff]  }
  0x29   :  { %2693 = vmatpush3.bf16.msra.mxu1 %v3026_v58  ;;  %v3080_v58 = vld [vmem:[%s3947_s1 + $0x238] sm:$0xff]  }
  0x2a   :  { %2694 = vmatprep.subr.bf16.mxu1 %v3029_v59  ;;  %v525_v59 = vcombine.high %v515_v55, %v515_v55 }
  0x2b   :  { %2673 = vmatpush3.bf16.msra.mxu0 %v3028_v60  ;;  %v501_v60 = vrot.slane %v485_v47, %v3349_v41  ;;  %v3128_v47 = vld [vmem:[%s3947_s1 + $0x458] sm:$0xff]  }
  0x2c   :  { %2674 = vmatprep.subr.bf16.mxu0 %v3031_v61  ;;  %v3083_v61 = vld [vmem:[%s3947_s1 + $0x340] sm:$0xff]  }
  0x2d   :  { %2695 = vmatpush3.bf16.msra.mxu1 %v3030_v62  ;;  %v3082_v62 = vld [vmem:[%s3947_s1 + $0x2b8] sm:$0xff]  }
  0x2e   :  { %2696 = vmatprep.subr.bf16.mxu1 %v3033_v63  ;;  %v522_v63 = vrot.slane %v494_v56, %v3349_v41  ;;  %v3135_v56 = vld [vmem:[%s3947_s1 + $0x4a0] sm:$0xff]  }
  0x2f   :  { %2675 = vmatpush3.bf16.msra.mxu0 %v3032_v0  ;;  %v3085_v0 = vld [vmem:[%s3947_s1 + $0x3c0] sm:$0xff]  }
  0x30   :  { %2676 = vmatprep.subr.bf16.mxu0 %v3035_v1  ;;  %v3084_v1 = vld [vmem:[%s3947_s1 + $0x300] sm:$0xff]  }
  0x31   :  { %2697 = vmatpush3.bf16.msra.mxu1 %v3034_v2  ;;  %v523_v2 = vcombine.high %v501_v60, %v501_v60 }
  0x32   :  { %2698 = vmatprep.subr.bf16.mxu1 %v3037_v3  ;;  %v3087_v3 = vld [vmem:[%s3947_s1 + $0x348] sm:$0xff]  }
  0x33   :  { %2677 = vmatpush3.bf16.msra.mxu0 %v3036_v4  ;;  %v3086_v4 = vld [vmem:[%s3947_s1 + $0x380] sm:$0xff]  }
  0x34   :  { %2678 = vmatprep.subr.bf16.mxu0 %v3039_v5  ;;  %v526_v5 = vcombine.high %v522_v63, %v522_v63 }
  0x35   :  { %2699 = vmatpush3.bf16.msra.mxu1 %v3038_v6  ;;  %v3089_v6 = vld [vmem:[%s3947_s1 + $0x3c8] sm:$0xff]  }
  0x36   :  { %2700 = vmatprep.subr.bf16.mxu1 %v3041_v7  ;;  %v3088_v7 = vld [vmem:[%s3947_s1 + $0x308] sm:$0xff]  }
  0x37   :  { %2679 = vmatpush3.bf16.msra.mxu0 %v3040_v8  ;;  %v3091_v8 = vld [vmem:[%s3947_s1 + $0x350] sm:$0xff]  }
  0x38   :  { %2680 = vmatprep.subr.bf16.mxu0 %v3043_v9  ;;  %v3090_v9 = vld [vmem:[%s3947_s1 + $0x388] sm:$0xff]  }
  0x39   :  { %2701 = vmatpush3.bf16.msra.mxu1 %v3042_v10  ;;  %v3093_v10 = vld [vmem:[%s3947_s1 + $0x3d0] sm:$0xff]  }
  0x3a   :  { %2702 = vmatprep.subr.bf16.mxu1 %v3045_v11  ;;  %v3092_v11 = vld [vmem:[%s3947_s1 + $0x310] sm:$0xff]  }
  0x3b   :  { %2681 = vmatpush3.bf16.msra.mxu0 %v3044_v12  ;;  %v3095_v12 = vld [vmem:[%s3947_s1 + $0x358] sm:$0xff]  }
  0x3c   :  { %2682 = vmatprep.subr.bf16.mxu0 %v3047_v13  ;;  %v3094_v13 = vld [vmem:[%s3947_s1 + $0x390] sm:$0xff]  }
  0x3d   :  { %2703 = vmatpush3.bf16.msra.mxu1 %v3046_v14  ;;  %v3097_v14 = vld [vmem:[%s3947_s1 + $0x3d8] sm:$0xff]  }
  0x3e   :  { %2704 = vmatprep.subr.bf16.mxu1 %v3049_v15  ;;  %v3096_v15 = vld [vmem:[%s3947_s1 + $0x318] sm:$0xff]  }
  0x3f   :  { %2683 = vmatpush3.bf16.msra.mxu0 %v3048_v16  ;;  %v3099_v16 = vld [vmem:[%s3947_s1 + $0x360] sm:$0xff]  }
  0x40   :  { %2712 = vmatprep.subr.bf16.mxu0 %v3051_v18  ;;  %v3101_v18 = vld [vmem:[%s3947_s1 + $0x3e0] sm:$0xff]  }
  0x41   :  { %2705 = vmatpush3.bf16.msra.mxu1 %v3050_v19  ;;  %v3100_v19 = vld [vmem:[%s3947_s1 + $0x320] sm:$0xff]  }
  0x42   :  { %1907 = vmatmul.mubr.bf16.vlgmr.msra.gmra.mrb[4].mxu0 %v459_v17  ;;  %2734 = vmatprep.subr.bf16.mxu1 %v3053_v20  ;;  %v3098_v17 = vld [vmem:[%s3947_s1 + $0x398] sm:$0xff]   ;;  %v3103_v20 = vld [vmem:[%s3947_s1 + $0x368] sm:$0xff]  }
  0x43   :  { %2713 = vmatpush3.bf16.msra.mxu0 %v3052_v21  ;;  %1986 = vmatprep.mubr.bf16.mxu0 %v515_v55  ;;  %v3102_v21 = vld [vmem:[%s3947_s1 + $0x3a0] sm:$0xff]   ;;  %v3136_v55 = vld [vmem:[%s3947_s1 + $0x468] sm:$0xff]  }
  0x44   :  { %1947 = vmatmul.mubr.bf16.vlgmr.msra.gmra.mrb[4].mxu1 %v475_v22  ;;  %2714 = vmatprep.subr.bf16.mxu0 %v3055_v23  ;;  %v3105_v22 = vld [vmem:[%s3947_s1 + $0x3e8] sm:$0xff]  }
  0x45   :  { %2735 = vmatpush3.bf16.msra.mxu1 %v3054_v24  ;;  %2026 = vmatprep.mubr.bf16.mxu1 %v525_v59  ;;  %v3104_v23 = vld [vmem:[%s3947_s1 + $0x328] sm:$0xff]   ;;  %v3107_v24 = vld [vmem:[%s3947_s1 + $0x370] sm:$0xff]  }
  0x46   :  { %2736 = vmatprep.subr.bf16.mxu1 %v3057_v25  ;;  %v3106_v25 = vld [vmem:[%s3947_s1 + $0x3a8] sm:$0xff]   ;;  %v3140_v59 = vld [vmem:[%s3947_s1 + $0x470] sm:$0xff]  }
  0x47   :  { %2715 = vmatpush3.bf16.msra.mxu0 %v3056_v26  ;;  %v3109_v26 = vld [vmem:[%s3947_s1 + $0x3f0] sm:$0xff]  }
  0x48   :  { %2716 = vmatprep.subr.bf16.mxu0 %v3059_v27  ;;  %v3108_v27 = vld [vmem:[%s3947_s1 + $0x330] sm:$0xff]  }
  0x49   :  { %2737 = vmatpush3.bf16.msra.mxu1 %v3058_v28  ;;  %v3111_v28 = vld [vmem:[%s3947_s1 + $0x378] sm:$0xff]  }
  0x4a   :  { %2738 = vmatprep.subr.bf16.mxu1 %v3061_v29  ;;  %v3110_v29 = vld [vmem:[%s3947_s1 + $0x3b0] sm:$0xff]  }
  0x4b   :  { %2717 = vmatpush3.bf16.msra.mxu0 %v3060_v30  ;;  %v3113_v30 = vld [vmem:[%s3947_s1 + $0x3f8] sm:$0xff]  }
  0x4c   :  { %2718 = vmatprep.subr.bf16.mxu0 %v3063_v31  ;;  %v3112_v31 = vld [vmem:[%s3947_s1 + $0x338] sm:$0xff]  }
  0x4d   :  { %2739 = vmatpush3.bf16.msra.mxu1 %v3062_v32  ;;  %v508_v32 = vrot.slane %v3538_v52, %v3349_v41  ;;  %v3131_v52 = vld [vmem:[%s3947_s1 + $0x498] sm:$0xff]  }
  0x4e   :  { %2740 = vmatprep.subr.bf16.mxu1 %v3065_v33  ;;  %v3116_v33 = vld [vmem:[%s3947_s1 + $0x440] sm:$0xff]  }
  0x4f   :  { %2719 = vmatpush3.bf16.msra.mxu0 %v3064_v34  ;;  %v3115_v34 = vld [vmem:[%s3947_s1 + $0x3b8] sm:$0xff]  }
  0x50   :  { %2720 = vmatprep.subr.bf16.mxu0 %v3067_v35  ;;  %v3118_v35 = vld [vmem:[%s3947_s1 + $0x4c0] sm:$0xff]  }
  0x51   :  { %2741 = vmatpush3.bf16.msra.mxu1 %v3066_v36  ;;  %v3117_v36 = vld [vmem:[%s3947_s1 + $0x400] sm:$0xff]  }
  0x52   :  { %2742 = vmatprep.subr.bf16.mxu1 %v3069_v37  ;;  %v524_v37 = vcombine.high %v508_v32, %v508_v32 }
  0x53   :  { %2721 = vmatpush3.bf16.msra.mxu0 %v3068_v38  ;;  %v3120_v38 = vld [vmem:[%s3947_s1 + $0x448] sm:$0xff]  }
  0x54   :  { %2722 = vmatprep.subr.bf16.mxu0 %v3071_v39  ;;  %v3119_v39 = vld [vmem:[%s3947_s1 + $0x480] sm:$0xff]  }
  0x55   :  { %2743 = vmatpush3.bf16.msra.mxu1 %v3070_v40  ;;  %v3122_v40 = vld [vmem:[%s3947_s1 + $0x4c8] sm:$0xff]  }
  0x56   :  { %2744 = vmatprep.subr.bf16.mxu1 %v3073_v42  ;;  %v3121_v42 = vld [vmem:[%s3947_s1 + $0x408] sm:$0xff]  }
  0x57   :  { %2723 = vmatpush3.bf16.msra.mxu0 %v3072_v43  ;;  %v3124_v43 = vld [vmem:[%s3947_s1 + $0x450] sm:$0xff]  }
  0x58   :  { %2724 = vmatprep.subr.bf16.mxu0 %v3075_v44  ;;  %v3123_v44 = vld [vmem:[%s3947_s1 + $0x488] sm:$0xff]  }
  0x59   :  { %2745 = vmatpush3.bf16.msra.mxu1 %v3074_v46  ;;  %v3125_v46 = vld [vmem:[%s3947_s1 + $0x410] sm:$0xff]  }
  0x5a   :  { %2746 = vmatprep.subr.bf16.mxu1 %v3077_v49  ;;  %v3130_v49 = vld [vmem:[%s3947_s1 + $0x4d8] sm:$0xff]  }
  0x5b   :  { %2725 = vmatpush3.bf16.msra.mxu0 %v3076_v50  ;;  %v3129_v50 = vld [vmem:[%s3947_s1 + $0x418] sm:$0xff]  }
  0x5c   :  { %2726 = vmatprep.subr.bf16.mxu0 %v3079_v53  ;;  %v3134_v53 = vld [vmem:[%s3947_s1 + $0x4e0] sm:$0xff]  }
  0x5d   :  { %2747 = vmatpush3.bf16.msra.mxu1 %v3078_v54  ;;  %v3133_v54 = vld [vmem:[%s3947_s1 + $0x420] sm:$0xff]  }
  0x5e   :  { %2748 = vmatprep.subr.bf16.mxu1 %v3081_v57  ;;  %v3138_v57 = vld [vmem:[%s3947_s1 + $0x4e8] sm:$0xff]  }
  0x5f   :  { %2727 = vmatpush3.bf16.msra.mxu0 %v3080_v58  ;;  %v3137_v58 = vld [vmem:[%s3947_s1 + $0x428] sm:$0xff]  }
  0x60   :  { %2756 = vmatprep.subr.bf16.mxu0 %v3083_v61  ;;  %v3139_v61 = vld [vmem:[%s3947_s1 + $0x4a8] sm:$0xff]  }
  0x61   :  { %2749 = vmatpush3.bf16.msra.mxu1 %v3082_v62 }
  0x62   :  { %1987 = vmatmul.mubr.bf16.vlgmr.msra.gmra.mrb[8].mxu0 %v501_v60  ;;  %2778 = vmatprep.subr.bf16.mxu1 %v3085_v0  ;;  %v24_v60 = vld [vmem:[%s3946_s0 + $0x10] sm:$0xff] }
  0x63   :  { %2757 = vmatpush3.bf16.msra.mxu0 %v3084_v1  ;;  %2066 = vmatprep.mubr.bf16.mxu0 %v522_v63  ;;  %v534_v62 = vrot.slane %v24_v60, %v3349_v41  ;;  %v527_v63 = vcombine.high %v24_v60, %v24_v60  ;;  %v3142_v0 = vld [vmem:[%s3947_s1 + $0x4f0] sm:$0xff]  }
  0x64   :  { %2027 = vmatmul.mubr.bf16.vlgmr.msra.gmra.mrb[8].mxu1 %v523_v2  ;;  %2758 = vmatprep.subr.bf16.mxu0 %v3087_v3  ;;  %v3141_v1 = vld [vmem:[%s3947_s1 + $0x430] sm:$0xff]  }
  0x65   :  { %2779 = vmatpush3.bf16.msra.mxu1 %v3086_v4  ;;  %2106 = vmatprep.mubr.bf16.mxu1 %v526_v5  ;;  %v542_v2 = vcombine.high %v534_v62, %v534_v62  ;;  %v3744_v3 = vrot.slane %v527_v63, %v3349_v41  ;;  %v3144_v4 = vld [vmem:[%s3947_s1 + $0x478] sm:$0xff]   ;;  %v3143_v5 = vld [vmem:[%s3947_s1 + $0x4b0] sm:$0xff]  }
  0x66   :  { %2780 = vmatprep.subr.bf16.mxu1 %v3089_v6 }
  0x67   :  { %2759 = vmatpush3.bf16.msra.mxu0 %v3088_v7  ;;  %v564_v6 = vrot.slane %v542_v2, %v3349_v41  ;;  %v543_v7 = vcombine.high %v3744_v3, %v3744_v3 }
  0x68   :  { %2760 = vmatprep.subr.bf16.mxu0 %v3091_v8  ;;  %v3146_v8 = vld [vmem:[%s3947_s1 + $0x4f8] sm:$0xff]  }
  0x69   :  { %2781 = vmatpush3.bf16.msra.mxu1 %v3090_v9  ;;  %v3145_v9 = vld [vmem:[%s3947_s1 + $0x438] sm:$0xff]  }
  0x6a   :  { %2782 = vmatprep.subr.bf16.mxu1 %v3093_v10  ;;  %v574_v10 = vcombine.high %v564_v6, %v564_v6 }
  0x6b   :  { %2761 = vmatpush3.bf16.msra.mxu0 %v3092_v11  ;;  %v550_v11 = vrot.slane %v534_v62, %v3349_v41 }
  0x6c   :  { %2762 = vmatprep.subr.bf16.mxu0 %v3095_v12  ;;  %v3148_v12 = vld [vmem:[%s3947_s1 + $0x540] sm:$0xff]  }
  0x6d   :  { %2783 = vmatpush3.bf16.msra.mxu1 %v3094_v13  ;;  %v3147_v13 = vld [vmem:[%s3947_s1 + $0x4b8] sm:$0xff]  }
  0x6e   :  { %2784 = vmatprep.subr.bf16.mxu1 %v3097_v14  ;;  %v571_v14 = vrot.slane %v543_v7, %v3349_v41 }
  0x6f   :  { %2763 = vmatpush3.bf16.msra.mxu0 %v3096_v15  ;;  %v3150_v15 = vld [vmem:[%s3947_s1 + $0x5c0] sm:$0xff]  }
  0x70   :  { %2764 = vmatprep.subr.bf16.mxu0 %v3099_v16  ;;  %v3149_v16 = vld [vmem:[%s3947_s1 + $0x500] sm:$0xff]  }
  0x71   :  { %2785 = vmatpush3.bf16.msra.mxu1 %v3098_v17  ;;  %v572_v17 = vcombine.high %v550_v11, %v550_v11 }
  0x72   :  { %2786 = vmatprep.subr.bf16.mxu1 %v3101_v18  ;;  %v3152_v18 = vld [vmem:[%s3947_s1 + $0x548] sm:$0xff]  }
  0x73   :  { %2765 = vmatpush3.bf16.msra.mxu0 %v3100_v19  ;;  %v3151_v19 = vld [vmem:[%s3947_s1 + $0x580] sm:$0xff]  }
  0x74   :  { %2766 = vmatprep.subr.bf16.mxu0 %v3103_v20  ;;  %v575_v20 = vcombine.high %v571_v14, %v571_v14 }
  0x75   :  { %2787 = vmatpush3.bf16.msra.mxu1 %v3102_v21  ;;  %v3154_v21 = vld [vmem:[%s3947_s1 + $0x5c8] sm:$0xff]  }
  0x76   :  { %2788 = vmatprep.subr.bf16.mxu1 %v3105_v22  ;;  %v3153_v22 = vld [vmem:[%s3947_s1 + $0x508] sm:$0xff]  }
  0x77   :  { %2767 = vmatpush3.bf16.msra.mxu0 %v3104_v23  ;;  %v3156_v23 = vld [vmem:[%s3947_s1 + $0x550] sm:$0xff]  }
  0x78   :  { %2768 = vmatprep.subr.bf16.mxu0 %v3107_v24  ;;  %v3155_v24 = vld [vmem:[%s3947_s1 + $0x588] sm:$0xff]  }
  0x79   :  { %2789 = vmatpush3.bf16.msra.mxu1 %v3106_v25  ;;  %v3158_v25 = vld [vmem:[%s3947_s1 + $0x5d0] sm:$0xff]  }
  0x7a   :  { %2790 = vmatprep.subr.bf16.mxu1 %v3109_v26  ;;  %v3157_v26 = vld [vmem:[%s3947_s1 + $0x510] sm:$0xff]  }
  0x7b   :  { %2769 = vmatpush3.bf16.msra.mxu0 %v3108_v27  ;;  %v3160_v27 = vld [vmem:[%s3947_s1 + $0x558] sm:$0xff]  }
  0x7c   :  { %2770 = vmatprep.subr.bf16.mxu0 %v3111_v28  ;;  %v3159_v28 = vld [vmem:[%s3947_s1 + $0x590] sm:$0xff]  }
  0x7d   :  { %2791 = vmatpush3.bf16.msra.mxu1 %v3110_v29  ;;  %v3162_v29 = vld [vmem:[%s3947_s1 + $0x5d8] sm:$0xff]  }
  0x7e   :  { %2792 = vmatprep.subr.bf16.mxu1 %v3113_v30  ;;  %v3161_v30 = vld [vmem:[%s3947_s1 + $0x518] sm:$0xff]  }
  0x7f   :  { %2771 = vmatpush3.bf16.msra.mxu0 %v3112_v31  ;;  %v3164_v31 = vld [vmem:[%s3947_s1 + $0x560] sm:$0xff]  }
  0x80   :  { %2800 = vmatprep.subr.bf16.mxu0 %v3116_v33  ;;  %v3166_v33 = vld [vmem:[%s3947_s1 + $0x5e0] sm:$0xff]  }
  0x81   :  { %2793 = vmatpush3.bf16.msra.mxu1 %v3115_v34  ;;  %v3165_v34 = vld [vmem:[%s3947_s1 + $0x520] sm:$0xff]  }
  0x82   :  { %2067 = vmatmul.mubr.bf16.vlgmr.msra.gmra.mrb[12].mxu0 %v508_v32  ;;  %2822 = vmatprep.subr.bf16.mxu1 %v3118_v35  ;;  %v3163_v32 = vld [vmem:[%s3947_s1 + $0x598] sm:$0xff]   ;;  %v3168_v35 = vld [vmem:[%s3947_s1 + $0x568] sm:$0xff]  }
  0x83   :  { %2801 = vmatpush3.bf16.msra.mxu0 %v3117_v36  ;;  %2146 = vmatprep.mubr.bf16.mxu0 %v564_v6  ;;  %v3167_v36 = vld [vmem:[%s3947_s1 + $0x5a0] sm:$0xff]  }
  0x84   :  { %2107 = vmatmul.mubr.bf16.vlgmr.msra.gmra.mrb[12].mxu1 %v524_v37  ;;  %2802 = vmatprep.subr.bf16.mxu0 %v3120_v38  ;;  %v3170_v37 = vld [vmem:[%s3947_s1 + $0x5e8] sm:$0xff]  }
  0x85   :  { %2823 = vmatpush3.bf16.msra.mxu1 %v3119_v39  ;;  %2186 = vmatprep.mubr.bf16.mxu1 %v574_v10  ;;  %v3169_v38 = vld [vmem:[%s3947_s1 + $0x528] sm:$0xff]   ;;  %v3172_v39 = vld [vmem:[%s3947_s1 + $0x570] sm:$0xff]  }
  0x86   :  { %2824 = vmatprep.subr.bf16.mxu1 %v3122_v40  ;;  %v3171_v40 = vld [vmem:[%s3947_s1 + $0x5a8] sm:$0xff]  }
  0x87   :  { %2803 = vmatpush3.bf16.msra.mxu0 %v3121_v42  ;;  %v3174_v42 = vld [vmem:[%s3947_s1 + $0x5f0] sm:$0xff]  }
  0x88   :  { %2804 = vmatprep.subr.bf16.mxu0 %v3124_v43  ;;  %v3173_v43 = vld [vmem:[%s3947_s1 + $0x530] sm:$0xff]  }
  0x89   :  { %2825 = vmatpush3.bf16.msra.mxu1 %v3123_v44  ;;  %v3176_v44 = vld [vmem:[%s3947_s1 + $0x578] sm:$0xff]  }
  0x8a   :  { %2826 = vmatprep.subr.bf16.mxu1 %v3126_v45  ;;  %v3175_v45 = vld [vmem:[%s3947_s1 + $0x5b0] sm:$0xff]  }
  0x8b   :  { %2805 = vmatpush3.bf16.msra.mxu0 %v3125_v46  ;;  %v3178_v46 = vld [vmem:[%s3947_s1 + $0x5f8] sm:$0xff]  }
  0x8c   :  { %2806 = vmatprep.subr.bf16.mxu0 %v3128_v47  ;;  %v3177_v47 = vld [vmem:[%s3947_s1 + $0x538] sm:$0xff]  }
  0x8d   :  { %2827 = vmatpush3.bf16.msra.mxu1 %v3127_v48 }
  0x8e   :  { %2828 = vmatprep.subr.bf16.mxu1 %v3130_v49 }
  0x8f   :  { %2807 = vmatpush3.bf16.msra.mxu0 %v3129_v50 }
  0x90   :  { %2808 = vmatprep.subr.bf16.mxu0 %v3132_v51 }
  0x91   :  { %2829 = vmatpush3.bf16.msra.mxu1 %v3131_v52 }
  0x92   :  { %2830 = vmatprep.subr.bf16.mxu1 %v3134_v53 }
  0x93   :  { %2809 = vmatpush3.bf16.msra.mxu0 %v3133_v54 }
  0x94   :  { %2810 = vmatprep.subr.bf16.mxu0 %v3136_v55 }
  0x95   :  { %2831 = vmatpush3.bf16.msra.mxu1 %v3135_v56 }
  0x96   :  { %2832 = vmatprep.subr.bf16.mxu1 %v3138_v57 }
  0x97   :  { %2811 = vmatpush3.bf16.msra.mxu0 %v3137_v58 }
  0x98   :  { %2812 = vmatprep.subr.bf16.mxu0 %v3140_v59 }
  0x99   :  { %2833 = vmatpush3.bf16.msra.mxu1 %v3139_v61 }
  0x9a   :  { %2834 = vmatprep.subr.bf16.mxu1 %v3142_v0 }
  0x9b   :  { %2813 = vmatpush3.bf16.msra.mxu0 %v3141_v1 }
  0x9c   :  { %2814 = vmatprep.subr.bf16.mxu0 %v3144_v4 }
  0x9d   :  { %2835 = vmatpush3.bf16.msra.mxu1 %v3143_v5 }
  0x9e   :  { %2836 = vmatprep.subr.bf16.mxu1 %v3146_v8 }
  0x9f   :  { %2815 = vmatpush3.bf16.msra.mxu0 %v3145_v9 }
  0xa0   :  { %2844 = vmatprep.subr.bf16.mxu0 %v3148_v12 }
  0xa1   :  { %2837 = vmatpush3.bf16.msra.mxu1 %v3147_v13 }
  0xa2   :  { %2147 = vmatmul.mubr.bf16.vlgmr.msra.gmra.mrb[16].mxu0 %v550_v11  ;;  %2866 = vmatprep.subr.bf16.mxu1 %v3150_v15 }
  0xa3   :  { %2845 = vmatpush3.bf16.msra.mxu0 %v3149_v16  ;;  %2226 = vmatprep.mubr.bf16.mxu0 %v571_v14 }
  0xa4   :  { %2187 = vmatmul.mubr.bf16.vlgmr.msra.gmra.mrb[16].mxu1 %v572_v17  ;;  %2846 = vmatprep.subr.bf16.mxu0 %v3152_v18 }
  0xa5   :  { %2867 = vmatpush3.bf16.msra.mxu1 %v3151_v19  ;;  %2266 = vmatprep.mubr.bf16.mxu1 %v575_v20 }
  0xa6   :  { %2868 = vmatprep.subr.bf16.mxu1 %v3154_v21 }
  0xa7   :  { %2847 = vmatpush3.bf16.msra.mxu0 %v3153_v22 }
  0xa8   :  { %2848 = vmatprep.subr.bf16.mxu0 %v3156_v23 }
  0xa9   :  { %2869 = vmatpush3.bf16.msra.mxu1 %v3155_v24 }
  0xaa   :  { %2870 = vmatprep.subr.bf16.mxu1 %v3158_v25 }
  0xab   :  { %2849 = vmatpush3.bf16.msra.mxu0 %v3157_v26 }
  0xac   :  { %2850 = vmatprep.subr.bf16.mxu0 %v3160_v27 }
  0xad   :  { %2871 = vmatpush3.bf16.msra.mxu1 %v3159_v28 }
  0xae   :  { %2872 = vmatprep.subr.bf16.mxu1 %v3162_v29 }
  0xaf   :  { %2851 = vmatpush3.bf16.msra.mxu0 %v3161_v30 }
  0xb0   :  { %2852 = vmatprep.subr.bf16.mxu0 %v3164_v31 }
  0xb1   :  { %2873 = vmatpush3.bf16.msra.mxu1 %v3163_v32 }
  0xb2   :  { %2874 = vmatprep.subr.bf16.mxu1 %v3166_v33 }
  0xb3   :  { %2853 = vmatpush3.bf16.msra.mxu0 %v3165_v34 }
  0xb4   :  { %2854 = vmatprep.subr.bf16.mxu0 %v3168_v35 }
  0xb5   :  { %2875 = vmatpush3.bf16.msra.mxu1 %v3167_v36 }
  0xb6   :  { %2876 = vmatprep.subr.bf16.mxu1 %v3170_v37 }
  0xb7   :  { %2855 = vmatpush3.bf16.msra.mxu0 %v3169_v38 }
  0xb8   :  { %2856 = vmatprep.subr.bf16.mxu0 %v3172_v39 }
  0xb9   :  { %2877 = vmatpush3.bf16.msra.mxu1 %v3171_v40 }
  0xba   :  { %2878 = vmatprep.subr.bf16.mxu1 %v3174_v42 }
  0xbb   :  { %2857 = vmatpush3.bf16.msra.mxu0 %v3173_v43 }
  0xbc   :  { %10 = vsyncpa [#allocation3], 0  ;;  %2858 = vmatprep.subr.bf16.mxu0 %v3176_v44  ;;  %v557_v48 = vrot.slane %v3744_v3, %v3349_v41  ;;  %v3180_v49 = vld [vmem:[%s3947_s1 + $0x5b8] sm:$0xff]   ;;  %v3181_v50 = vld [vmem:[%s3947_s1 + $0x600] sm:$0xff]   ;;  %v3210_v51 = vmov 0.0   ;;  %vm3211_vm0 = vmmov 0  }
  0xbd   :  { %2879 = vmatpush3.bf16.msra.mxu1 %v3175_v45  ;;  %v3182_v53 = vld [vmem:[%s3947_s1 + $0x608] sm:$0xff]   ;;  %v3183_v54 = vld [vmem:[%s3947_s1 + $0x610] sm:$0xff]   ;;  %v3184_v55 = vld [vmem:[%s3947_s1 + $0x618] sm:$0xff]   ;;  %vm1790_vm1 = vcmask 523264   ;;  %v3212_v9 = vmov 0.0|0.0   ;;  %s3213_s22 = smov [#allocation2]  }
  0xbe   :  { %2880 = vmatprep.subr.bf16.mxu1 %v3178_v46  ;;  %v573_v52 = vcombine.high %v557_v48, %v557_v48  ;;  %v2425_v56 = vld.sshfl [vmem:[%s3946_s0 + $0x18] sm:$0x1 pattern:$0x75316420]  ;;  %v2424_v59 = vld [vmem:[%s3948_s2] ss:$0 sm:$0xff] }
  0xbf   :  { %2859 = vmatpush3.bf16.msra.mxu0 %v3177_v47  ;;  %v589_v57 = vrot.slane %v2425_v56, %v3349_v41  ;;  %v2315_v41 = vld [vmem:[%s3949_s3] sm:$0xff]  ;;  %v2316_v7 = vld [vmem:[%s3949_s3 + $0x8] sm:$0xff]  ;;  %v2317_v8 = vld [vmem:[%s3949_s3 + $0x10] sm:$0xff]  ;;  %s2416_s23 = sshll.u32 %s3213_s22, 4  ;;  %vm2408_vm2 = vcmask 41984   ;;  %s2417_s23 = int_to_ptr.vmem [resolvable:$true] %s2416_s23 }
  0xc0   :  { %2910 = vmatprep.subr.bf16.mxu0 %v3210_v51  ;;  %v2958_v10 = vpack.c.bf16 %v2316_v7, %v2315_v41  ;;  %v2318_v11 = vld [vmem:[%s3949_s3 + $0x18] sm:$0xff]  ;;  %v2319_v13 = vld [vmem:[%s3949_s3 + $0x20] sm:$0xff]  ;;  %v2320_v14 = vld [vmem:[%s3949_s3 + $0x28] sm:$0xff]  ;;  %s3185_s24 = scalar_lea.vmem %s2417_s23, 32  ;;  %p3190_p1 = scmp.lt.s32.totalorder %s2417_s23, %s2417_s23 }
  0xc1   :  { %2881 = vmatpush3.bf16.msra.mxu1 %v3180_v49  ;;  %v2961_v12 = vpack.c.bf16 %v2318_v11, %v2317_v8  ;;  %v2964_v15 = vpack.c.bf16 %v2320_v14, %v2319_v13  ;;  %v2321_v16 = vld [vmem:[%s3949_s3 + $0x30] sm:$0xff]  ;;  %v2322_v17 = vld [vmem:[%s3949_s3 + $0x38] sm:$0xff]  ;;  %v2323_v26 = vld [vmem:[%s3949_s3 + $0x40] sm:$0xff]  ;;  %p3186_p0 = scmp.ne.s32.totalorder %s2417_s23, %s3185_s24  ;;  %p3191_p2 = scmp.lt.s32.totalorder %s3185_s24, %s3185_s24 }
  0xc2   :  { %2227 = vmatmul.mubr.bf16.vlgmr.msra.gmra.mrb[20].mxu0 %v557_v48  ;;  %2957 = vmatprep.subr.bf16.mxu1 %v3212_v9  ;;  %v2967_v19 = vpack.c.bf16 %v2322_v17, %v2321_v16  ;;  %v2324_v27 = vld [vmem:[%s3949_s3 + $0x48] sm:$0xff]  ;;  %v2325_v32 = vld [vmem:[%s3949_s3 + $0x50] sm:$0xff]  ;;  %v2326_v33 = vld [vmem:[%s3949_s3 + $0x58] sm:$0xff] }
  0xc3   :  { %2911 = vmatpush3.bf16.msra.mxu0 %v3181_v50  ;;  %2918 = vmatprep.mubr.msk.bf16.mxu0 %vm3211_vm0, %v3210_v51  ;;  %v2970_v31 = vpack.c.bf16 %v2324_v27, %v2323_v26  ;;  %v2973_v36 = vpack.c.bf16 %v2326_v33, %v2325_v32  ;;  %v2327_v37 = vld [vmem:[%s3949_s3 + $0x60] sm:$0xff]  ;;  %v2328_v38 = vld [vmem:[%s3949_s3 + $0x68] sm:$0xff]  ;;  %v2329_v40 = vld [vmem:[%s3949_s3 + $0x70] sm:$0xff]  ;;  %p3192_p3 = por %p3191_p2, %p3190_p1 }
  0xc4   :  { %2267 = vmatmul.mubr.bf16.vlgmr.msra.gmra.mrb[20].mxu1 %v573_v52  ;;  %2912 = vmatprep.subr.bf16.mxu0 %v3210_v51  ;;  %v2976_v39 = vpack.c.bf16 %v2328_v38, %v2327_v37  ;;  %v2330_v42 = vld [vmem:[%s3949_s3 + $0x78] sm:$0xff]  ;;  %v2623_v33 = vld [vmem:[%s3950_s4] ss:$0 sm:$0xff] }
  0xc5   :  { %2954 = vmatprep.mubr.msk.f32.mxu1 %vm3211_vm0, %v3210_v51  ;;  %2959 = vmatpush3.bf16.msra.mxu1 %v2958_v10  ;;  %v2979_v43 = vpack.c.bf16 %v2330_v42, %v2329_v40  ;;  %p3193_p4 = pnand %p3192_p3, %p3186_p0 }
  0xc6   :  { %2960 = vmatprep.subr.bf16.mxu1 %v3212_v9 }
  0xc7   :  { %2913 = vmatpush3.bf16.msra.mxu0 %v3182_v53 }
  0xc8   :  { %2914 = vmatprep.subr.bf16.mxu0 %v3210_v51 }
  0xc9   :  { %2962 = vmatpush3.bf16.msra.mxu1 %v2961_v12 }
  0xca   :  { %2963 = vmatprep.subr.bf16.mxu1 %v3212_v9 }
  0xcb   :  { %2915 = vmatpush3.bf16.msra.mxu0 %v3183_v54 }
  0xcc   :  { %2916 = vmatprep.subr.bf16.mxu0 %v3210_v51 }
  0xcd   :  { %2965 = vmatpush3.bf16.msra.mxu1 %v2964_v15 }
  0xce   :  { %2966 = vmatprep.subr.bf16.mxu1 %v3212_v9 }
  0xcf   :  { %2917 = vmatpush3.bf16.msra.mxu0 %v3184_v55 }
  0xd1   :  { %2968 = vmatpush3.bf16.msra.mxu1 %v2967_v19 }
  0xd2   :  { %2919 = vmatmul.mubr.msk.bf16.vlgmr.msra.gmra.mrb[24].mxu0 %vm1790_vm1, %v589_v57  ;;  %2969 = vmatprep.subr.bf16.mxu1 %v3212_v9 }
  0xd5   :  { %2971 = vmatpush3.bf16.msra.mxu1 %v2970_v31 }
  0xd6   :  { %2972 = vmatprep.subr.bf16.mxu1 %v3212_v9 }
  0xd9   :  { %2974 = vmatpush3.bf16.msra.mxu1 %v2973_v36 }
  0xda   :  { %2975 = vmatprep.subr.bf16.mxu1 %v3212_v9 }
  0xdd   :  { %2977 = vmatpush3.bf16.msra.mxu1 %v2976_v39 }
  0xde   :  { %2978 = vmatprep.subr.bf16.mxu1 %v3212_v9 }
  0xe1   :  { %2980 = vmatpush3.bf16.msra.mxu1 %v2979_v43 }
  0xf5   :  { %v2640_v58 = vpop.f32.mrb[0].mxu0 }
  0xf6   :  { %v2641_v60 = vpop.f32.mrb[1].mxu0 }
  0xf7   :  { %v2642_v61 = vadd.f32 %v2641_v60, %v2640_v58  ;;  %v2643_v62 = vpop.f32.mrb[2].mxu0  ;;  %v2662_v63 = vpop.f32.mrb[0].mxu1 }
  0xf8   :  { %v2644_v0 = vpop.f32.mrb[3].mxu0  ;;  %v2663_v1 = vpop.f32.mrb[1].mxu1 }
  0xf9   :  { %v1829_v2 = vadd.f32 %v2642_v61, %v2424_v59  ;;  %v2664_v3 = vadd.f32 %v2663_v1, %v2662_v63  ;;  %v2665_v4 = vpop.f32.mrb[2].mxu1 }
  0xfa   :  { %v2666_v5 = vpop.f32.mrb[3].mxu1 }
  0xfb   :  { %v1869_v6 = vadd.f32 %v2664_v3, %v1829_v2 }
 0x115   :  { %v2684_v18 = vpop.f32.mrb[4].mxu0 }
 0x116   :  { %v2685_v20 = vpop.f32.mrb[5].mxu0 }
 0x117   :  { %v2686_v21 = vadd.f32 %v2685_v20, %v2684_v18  ;;  %v2687_v22 = vpop.f32.mrb[6].mxu0  ;;  %v2706_v23 = vpop.f32.mrb[4].mxu1 }
 0x118   :  { %v2688_v24 = vpop.f32.mrb[7].mxu0  ;;  %v2707_v25 = vpop.f32.mrb[5].mxu1 }
 0x119   :  { %v1909_v28 = vadd.f32 %v2686_v21, %v1869_v6  ;;  %v2708_v29 = vadd.f32 %v2707_v25, %v2706_v23  ;;  %v2709_v30 = vpop.f32.mrb[6].mxu1 }
 0x11a   :  { %v2710_v34 = vpop.f32.mrb[7].mxu1 }
 0x11b   :  { %v1949_v35 = vadd.f32 %v2708_v29, %v1909_v28 }
 0x135   :  { %v2728_v44 = vpop.f32.mrb[8].mxu0 }
 0x136   :  { %v2729_v45 = vpop.f32.mrb[9].mxu0 }
 0x137   :  { %v2730_v46 = vadd.f32 %v2729_v45, %v2728_v44  ;;  %v2731_v47 = vpop.f32.mrb[10].mxu0  ;;  %v2750_v48 = vpop.f32.mrb[8].mxu1 }
 0x138   :  { %v2732_v49 = vpop.f32.mrb[11].mxu0  ;;  %v2751_v50 = vpop.f32.mrb[9].mxu1 }
 0x139   :  { %v1989_v51 = vadd.f32 %v2730_v46, %v1949_v35  ;;  %v2752_v52 = vadd.f32 %v2751_v50, %v2750_v48  ;;  %v2753_v53 = vpop.f32.mrb[10].mxu1 }
 0x13a   :  { %v2754_v54 = vpop.f32.mrb[11].mxu1 }
 0x13b   :  { %v2029_v55 = vadd.f32 %v2752_v52, %v1989_v51 }
 0x155   :  { %v2772_v56 = vpop.f32.mrb[12].mxu0 }
 0x156   :  { %v2773_v57 = vpop.f32.mrb[13].mxu0 }
 0x157   :  { %v2774_v58 = vadd.f32 %v2773_v57, %v2772_v56  ;;  %v2775_v59 = vpop.f32.mrb[14].mxu0  ;;  %v2794_v60 = vpop.f32.mrb[12].mxu1 }
 0x158   :  { %v2776_v61 = vpop.f32.mrb[15].mxu0  ;;  %v2795_v62 = vpop.f32.mrb[13].mxu1 }
 0x159   :  { %v2069_v63 = vadd.f32 %v2774_v58, %v2029_v55  ;;  %v2796_v0 = vadd.f32 %v2795_v62, %v2794_v60  ;;  %v2797_v1 = vpop.f32.mrb[14].mxu1 }
 0x15a   :  { %v2798_v2 = vpop.f32.mrb[15].mxu1 }
 0x15b   :  { %v2109_v3 = vadd.f32 %v2796_v0, %v2069_v63 }
 0x175   :  { %v2816_v4 = vpop.f32.mrb[16].mxu0 }
 0x176   :  { %v2817_v5 = vpop.f32.mrb[17].mxu0 }
 0x177   :  { %v2818_v6 = vadd.f32 %v2817_v5, %v2816_v4  ;;  %v2819_v41 = vpop.f32.mrb[18].mxu0  ;;  %v2838_v7 = vpop.f32.mrb[16].mxu1 }
 0x178   :  { %v2820_v8 = vpop.f32.mrb[19].mxu0  ;;  %v2839_v9 = vpop.f32.mrb[17].mxu1 }
 0x179   :  { %v2149_v10 = vadd.f32 %v2818_v6, %v2109_v3  ;;  %v2840_v11 = vadd.f32 %v2839_v9, %v2838_v7  ;;  %v2841_v12 = vpop.f32.mrb[18].mxu1 }
 0x17a   :  { %v2842_v13 = vpop.f32.mrb[19].mxu1 }
 0x17b   :  { %v2189_v14 = vadd.f32 %v2840_v11, %v2149_v10 }
 0x195   :  { %v2860_v15 = vpop.f32.mrb[20].mxu0 }
 0x196   :  { %v2861_v16 = vpop.f32.mrb[21].mxu0 }
 0x197   :  { %v2862_v17 = vadd.f32 %v2861_v16, %v2860_v15  ;;  %v2863_v18 = vpop.f32.mrb[22].mxu0  ;;  %v2882_v19 = vpop.f32.mrb[20].mxu1 }
 0x198   :  { %v2864_v20 = vpop.f32.mrb[23].mxu0  ;;  %v2883_v21 = vpop.f32.mrb[21].mxu1 }
 0x199   :  { %v2229_v22 = vadd.f32 %v2862_v17, %v2189_v14  ;;  %v2884_v23 = vadd.f32 %v2883_v21, %v2882_v19  ;;  %v2885_v24 = vpop.f32.mrb[22].mxu1 }
 0x19a   :  { %v2886_v25 = vpop.f32.mrb[23].mxu1 }
 0x19b   :  { %v2269_v26 = vadd.f32 %v2884_v23, %v2229_v22 }
 0x1a5   :  { %v2308_v27 = vpop.f32.mrb[24].mxu0 }
 0x1a6   :  { %v2309_v28 = vadd.f32 %v2308_v27, %v2269_v26  ;;  %v2920_v29 = vpop.f32.mrb[25].mxu0 }
 0x1a7   :  { %v2311_v30 = vpop.f32.mrb[26].mxu0 }
 0x1a8   :  { %v2314_v31 = vmax.f32 %v2309_v28, 0.0  ;;  %v2921_v32 = vpop.f32.mrb[27].mxu0 }
 0x1aa   :  { %2955 = vmatmul.mubr.f32.vlgmr.msra.gmra.mrb[24].mxu1 %v2314_v31 }
 0x27d   :  { %v2404_v34 = vpop.f32.mrb[24].mxu1 }
 0x27e   :  { %v2405_v35 = vadd.f32 %v2623_v33, %v2404_v34  ;;  %v2956_v36 = vpop.f32.mrb[25].mxu1 }
 0x280   :  { %2409 = vst.msk [vmem:[#allocation2] sm:$0x3] %vm2408_vm2, %v2405_v35 }
 0x281   :  { %3196 = shalt.err (!%p3193_p4)
}
 0x282   :  { %s3197_s27 = scalar_lea.hbm %s3951_s5, 32 }
 0x283   :  { %p3198_p5 = scmp.ne.s32.totalorder %s3951_s5, %s3197_s27  ;;  %p3201_p6 = scmp.lt.u32.totalorder %s3197_s27, %s3951_s5 }
 0x285   :  { %p3203_p7 = pnand %p3201_p6, %p3198_p5 }
 0x287   :  { %3206 = shalt.err (!%p3203_p7)
}
 0x288   :  { %2419 = dma.vmem_to_hbm [thread:$0]  %s2417_s23, 32, %s3951_s5, [#allocation3]  }
 0x289   :  { %3207 = dma.done.wait [#allocation3], 32  }
 0x28a   :  { %3208 = vsyncadd [#allocation3], 4294967264 }
 0x28b   :  { %2423 = vsyncpa [#allocation3], 1 }

</bundles_post_ra>
